<compile_context>
chip_gen: v5e
topology: v5e:2x2
jax: 0.10.0
libtpu: 0.0.40
codegen_flags: <defaults>
</compile_context>

<pallas_src>
import jax
import jax.numpy as jnp
from jax.experimental import pallas as pl
from jax.experimental.pallas import tpu as pltpu


def _pick_tk(K, tk):
    """Largest K-tile <= tk that divides K and is lane aligned (mult. of 128)."""
    tk = min(tk, K)
    if K % tk == 0 and (tk % 128 == 0 or tk == K):
        return tk
    best = 0
    d = 128
    while d <= tk:
        if K % d == 0:
            best = d
        d += 128
    return best if best > 0 else K


def _make_mincam_kernel(half_scale, sum_coeff):
    """Kernel with the folded sensor-affine constants baked in.

    The mask stream arrives pre-scaled by 0.5 and pre-transposed to (K, Mc)
    bf16, so the hot loop is just p = tanh(m); acc += img_bf16 @ p.
    The sigmoid affine + mask range map + sensor gain collapse into:
        x = half_scale * acc + sum_coeff * rowsum(imgs)
          == sensor_gain * imgs @ (sigmoid(masks)*(max-min)+min).T

    NOTE: half_scale / sum_coeff are trace-time constants; changing
    sensor_gain / mask_min / mask_max retraces & recompiles the kernel.
    """
    neg_slope = 0.1

    def kernel(img_ref, mask_ref,              # (B, tk) f32 , (tk, Mc) bf16
               w1_ref, b1_ref,                 # (Mc, H), (1, H)
               w2_ref, b2_ref,                 # (H, H),  (1, H)
               w3_ref, b3_ref,                 # (H, O),  (1, O)
               out_ref,                        # (B, O)
               acc_ref, imgsum_ref):           # VMEM scratch: (B, Mc), (B, 1) f32
        k = pl.program_id(0)

        @pl.when(k == 0)
        def _init():
            acc_ref[...] = jnp.zeros_like(acc_ref)
            imgsum_ref[...] = jnp.zeros_like(imgsum_ref)

        # Hot path, bf16 end-to-end: native bf16 tanh (EUP), bf16 x bf16 MXU
        # dot with f32 accumulate.  No full-tile f32 temps.
        p = jnp.tanh(mask_ref[...]).astype(jnp.bfloat16)     # (tk, Mc)
        img_f32 = img_ref[...]                               # (B, tk)
        acc_ref[...] += jnp.dot(img_f32.astype(jnp.bfloat16), p,
                                preferred_element_type=jnp.float32)
        # Exact f32 row sum for the folded affine (cheap XLU lane reduce).
        imgsum_ref[...] += jnp.sum(img_f32, axis=1, keepdims=True)

        @pl.when(k == pl.num_programs(0) - 1)
        def _epilogue():
            # Folded: sigmoid affine + mask range map + sensor gain.
            x = acc_ref[...] * half_scale + imgsum_ref[...] * sum_coeff
            # TaskNetwork: linear1 -> LeakyReLU -> linear2 -> LeakyReLU -> linear3
            h = jnp.dot(x, w1_ref[...], preferred_element_type=jnp.float32) + b1_ref[...]
            h = jnp.where(h >= 0, h, neg_slope * h)
            h = jnp.dot(h, w2_ref[...], preferred_element_type=jnp.float32) + b2_ref[...]
            h = jnp.where(h >= 0, h, neg_slope * h)
            y = jnp.dot(h, w3_ref[...], preferred_element_type=jnp.float32) + b3_ref[...]
            out_ref[...] = y.astype(out_ref.dtype)

    return kernel


def prepare_mincam_params(masks, lin1, lin2, lin3, *,
                          mask_stream_dtype=jnp.bfloat16):
    """One-time parameter repack — call once per parameter update, NOT per forward.

    masks: (mincam_size, H*W) f32 (module layout); lin* = (W, b) in PyTorch
    (out_features, in_features) convention.

    The (K, Mc) bf16 shadow copy of the masks is the dominant HBM stream of the
    forward; rebuilding it every call costs ~3x the kernel's own mask traffic.
    The 0.5 pre-scale folds the sigmoid affine out of the kernel's hot loop.
    """
    masks = jnp.asarray(masks, jnp.float32)
    masks_kc = (0.5 * masks).T.astype(mask_stream_dtype)      # (K, Mc)

    def prep_linear(lin):
        w, b = lin
        w = jnp.asarray(w, jnp.float32)
        b = jnp.asarray(b, jnp.float32)
        return w.T, b.reshape(1, -1)                          # (in, out), (1, out)

    w1t, b1r = prep_linear(lin1)
    w2t, b2r = prep_linear(lin2)
    w3t, b3r = prep_linear(lin3)
    return (masks_kc, w1t, b1r, w2t, b2r, w3t, b3r)


def mincam_forward(imgs, params, *, sensor_gain, mask_min, mask_max, tk=4096):
    """imgs: (B, 1, H, W) f32; params: output of prepare_mincam_params."""
    masks_kc, w1t, b1r, w2t, b2r, w3t, b3r = params
    B = imgs.shape[0]
    K, Mc = masks_kc.shape
    Hh = w1t.shape[1]
    O = w3t.shape[1]
    imgs_flat = imgs.reshape(B, K).astype(jnp.float32)        # no-copy reshape

    tk = _pick_tk(K, tk)
    grid = (K // tk,)

    # Folded sensor-affine constants (see _make_mincam_kernel docstring).
    half_scale = 0.5 * float(sensor_gain) * (float(mask_max) - float(mask_min))
    sum_coeff = float(sensor_gain) * (0.5 * (float(mask_max) - float(mask_min))
                                      + float(mask_min))
    kernel = _make_mincam_kernel(half_scale, sum_coeff)

    mlp_flops = 2 * B * (Mc * Hh + Hh * Hh + Hh * O)
    weight_bytes = 4 * (w1t.size + w2t.size + w3t.size
                        + b1r.size + b2r.size + b3r.size)
    cost = pl.CostEstimate(
        flops=2 * B * K * Mc + mlp_flops,
        transcendentals=K * Mc,
        bytes_accessed=(masks_kc.size * masks_kc.dtype.itemsize
                        + imgs_flat.size * 4 + weight_bytes + B * O * 4),
    )

    return pl.pallas_call(
        kernel,
        out_shape=jax.ShapeDtypeStruct((B, O), jnp.float32),
        grid=grid,
        in_specs=[
            pl.BlockSpec((B, tk), lambda k: (0, k)),      # imgs_flat (B, K)
            pl.BlockSpec((tk, Mc), lambda k: (k, 0)),     # 0.5*masks^T (K, Mc) bf16
            pl.BlockSpec((Mc, Hh), lambda k: (0, 0)),     # W1^T (resident)
            pl.BlockSpec((1, Hh), lambda k: (0, 0)),      # b1
            pl.BlockSpec((Hh, Hh), lambda k: (0, 0)),     # W2^T
            pl.BlockSpec((1, Hh), lambda k: (0, 0)),      # b2
            pl.BlockSpec((Hh, O), lambda k: (0, 0)),      # W3^T
            pl.BlockSpec((1, O), lambda k: (0, 0)),       # b3
        ],
        out_specs=pl.BlockSpec((B, O), lambda k: (0, 0)),
        scratch_shapes=[pltpu.VMEM((B, Mc), jnp.float32),   # sensor accumulator
                        pltpu.VMEM((B, 1), jnp.float32)],   # image row sums
        compiler_params=pltpu.CompilerParams(
            dimension_semantics=("arbitrary",)),
        cost_estimate=cost,
    )(imgs_flat, masks_kc, w1t, b1r, w2t, b2r, w3t, b3r)


if __name__ == "__main__":
    # Config consistent with the module (img_size is asserted to be (128,128)).
    B = 8
    H_img, W_img = 128, 128
    mincam_size = 128
    hidden_layer_size = 128
    output_size = 8
    sensor_gain = 2.0
    mask_min, mask_max = 0.05, 0.95   # exercises the folded row-sum term

    key = jax.random.PRNGKey(0)
    k_img, k_mask, k_w1, k_b1, k_w2, k_b2, k_w3, k_b3 = jax.random.split(key, 8)

    imgs = jax.random.uniform(k_img, (B, 1, H_img, W_img), dtype=jnp.float32)

    # _mincam_init_masks('random'): masks = logit((rand*2*hr + mid - hr - min)/(max-min))
    mid, hr = 0.1, 0.1 / 5.0
    u = jax.random.uniform(k_mask, (mincam_size, H_img * W_img), dtype=jnp.float32)
    y0 = u * 2.0 * hr + (mid - hr)
    p0 = (y0 - mask_min) / (mask_max - mask_min)
    masks = jnp.log(p0 / (1.0 - p0))  # logit

    def lin_init(kw, kb, fan_in, fan_out):
        bound = 1.0 / float(fan_in) ** 0.5
        w = jax.random.uniform(kw, (fan_out, fan_in), minval=-bound, maxval=bound,
                               dtype=jnp.float32)
        b = jax.random.uniform(kb, (fan_out,), minval=-bound, maxval=bound,
                               dtype=jnp.float32)
        return w, b

    w1, b1 = lin_init(k_w1, k_b1, mincam_size, hidden_layer_size)
    w2, b2 = lin_init(k_w2, k_b2, hidden_layer_size, hidden_layer_size)
    w3, b3 = lin_init(k_w3, k_b3, hidden_layer_size, output_size)

    # HOISTED: built once per parameter update, reused by every forward call.
    params = prepare_mincam_params(masks, (w1, b1), (w2, b2), (w3, b3))
    params = jax.block_until_ready(params)

    out = mincam_forward(imgs, params, sensor_gain=sensor_gain,
                         mask_min=mask_min, mask_max=mask_max)
    out = jax.block_until_ready(out)

    # Pure-JAX f32 reference of the module forward pass.
    def reference():
        M = jax.nn.sigmoid(masks) * (mask_max - mask_min) + mask_min
        x = imgs.reshape(B, -1) @ M.T
        x = x * sensor_gain

        def lrelu(v):
            return jnp.where(v >= 0, v, 0.1 * v)

        h = lrelu(x @ w1.T + b1)
        h = lrelu(h @ w2.T + b2)
        return h @ w3.T + b3

    ref = reference()

    assert out.shape == (B, output_size)
    assert bool(jnp.all(jnp.isfinite(out)))
    scaled_err = float(jnp.max(jnp.abs(out - ref))
                       / jnp.maximum(jnp.max(jnp.abs(ref)), 1.0))
    # bf16 mask stream + bf16 img/tanh MXU operands (f32 accumulate): stays
    # well inside the module-level tolerance.
    assert scaled_err < 2e-2, f"scaled err vs f32 module reference: {scaled_err}"
    print("KERNEL_OK")
</pallas_src>

<mosaic_0001>
module attributes {stable_mosaic.version = 11 : i64} {
  func.func @kernel(%arg0: i32, %arg1: memref<8x4096xf32, #tpu.memory_space<vmem>>, %arg2: memref<4096x128xbf16, #tpu.memory_space<vmem>>, %arg3: memref<128x128xf32, #tpu.memory_space<vmem>>, %arg4: memref<1x128xf32, #tpu.memory_space<vmem>>, %arg5: memref<128x128xf32, #tpu.memory_space<vmem>>, %arg6: memref<1x128xf32, #tpu.memory_space<vmem>>, %arg7: memref<128x8xf32, #tpu.memory_space<vmem>>, %arg8: memref<1x8xf32, #tpu.memory_space<vmem>>, %arg9: memref<8x8xf32, #tpu.memory_space<vmem>>, %arg10: memref<8x128xf32, #tpu.memory_space<vmem>>, %arg11: memref<8x1xf32, #tpu.memory_space<vmem>>) attributes {dimension_semantics = [#tpu.dimension_semantics<arbitrary>], iteration_bounds = array<i64: 4>, scalar_prefetch = 0 : i64, scratch_operands = 2 : i64, tpu.core_type = #tpu.core_type<tc>, window_params = [{transform_indices = @transform_0, window_bounds = array<i64: 8, 4096>}, {transform_indices = @transform_1, window_bounds = array<i64: 4096, 128>}, {pipeline_mode = #tpu.pipeline_mode<synchronous>, transform_indices = @transform_2, window_bounds = array<i64: 128, 128>}, {pipeline_mode = #tpu.pipeline_mode<synchronous>, transform_indices = @transform_3, window_bounds = array<i64: 1, 128>}, {pipeline_mode = #tpu.pipeline_mode<synchronous>, transform_indices = @transform_4, window_bounds = array<i64: 128, 128>}, {pipeline_mode = #tpu.pipeline_mode<synchronous>, transform_indices = @transform_5, window_bounds = array<i64: 1, 128>}, {pipeline_mode = #tpu.pipeline_mode<synchronous>, transform_indices = @transform_6, window_bounds = array<i64: 128, 8>}, {pipeline_mode = #tpu.pipeline_mode<synchronous>, transform_indices = @transform_7, window_bounds = array<i64: 1, 8>}, {pipeline_mode = #tpu.pipeline_mode<synchronous>, transform_indices = @transform_8, window_bounds = array<i64: 8, 8>}]} {
    %c0_i32 = arith.constant 0 : i32
    %0 = arith.cmpi eq, %arg0, %c0_i32 : i32
    %1 = arith.extui %0 : i1 to i32
    %c0_i32_0 = arith.constant 0 : i32
    %2 = arith.cmpi ne, %1, %c0_i32_0 : i32
    scf.if %2 {
      %cst_14 = arith.constant 0.000000e+00 : f32
      %19 = vector.broadcast %cst_14 : f32 to vector<8x128xf32>
      %c0_15 = arith.constant 0 : index
      %c0_16 = arith.constant 0 : index
      %20 = vector.load %arg10[%c0_15, %c0_16] : memref<8x128xf32, #tpu.memory_space<vmem>>, vector<8x128xf32>
      tpu.vector_store %arg10[%c0_15, %c0_16], %19 {strides = array<i32>} : memref<8x128xf32, #tpu.memory_space<vmem>>, vector<8x128xf32>,
      %cst_17 = arith.constant 0.000000e+00 : f32
      %21 = vector.broadcast %cst_17 : f32 to vector<8x1xf32>
      %c0_18 = arith.constant 0 : index
      %c0_19 = arith.constant 0 : index
      %22 = vector.load %arg11[%c0_18, %c0_19] : memref<8x1xf32, #tpu.memory_space<vmem>>, vector<8x1xf32>
      tpu.vector_store %arg11[%c0_18, %c0_19], %21 {strides = array<i32>} : memref<8x1xf32, #tpu.memory_space<vmem>>, vector<8x1xf32>,
    } else {
    }
    %c0 = arith.constant 0 : index
    %c0_1 = arith.constant 0 : index
    %3 = vector.load %arg2[%c0, %c0_1] : memref<4096x128xbf16, #tpu.memory_space<vmem>>, vector<4096x128xbf16>
    %4 = math.tanh %3 : vector<4096x128xbf16>
    %c0_2 = arith.constant 0 : index
    %c0_3 = arith.constant 0 : index
    %5 = vector.load %arg1[%c0_2, %c0_3] : memref<8x4096xf32, #tpu.memory_space<vmem>>, vector<8x4096xf32>
    %c0_4 = arith.constant 0 : index
    %c0_5 = arith.constant 0 : index
    %6 = vector.load %arg10[%c0_4, %c0_5] : memref<8x128xf32, #tpu.memory_space<vmem>>, vector<8x128xf32>
    %7 = arith.truncf %5 : vector<8x4096xf32> to vector<8x4096xbf16>
    %cst = arith.constant dense<0.000000e+00> : vector<8x128xf32>
    %8 = tpu.matmul %7, %4, %cst {dimension_numbers = #tpu.dot_dimension_numbers<[1], [0], [0], [1], [0, 0, 1, 1], [], []>} : vector<8x4096xbf16>, vector<4096x128xbf16>, vector<8x128xf32> -> vector<8x128xf32>
    %9 = arith.addf %6, %8 : vector<8x128xf32>
    %c0_6 = arith.constant 0 : index
    %c0_7 = arith.constant 0 : index
    %10 = vector.load %arg10[%c0_6, %c0_7] : memref<8x128xf32, #tpu.memory_space<vmem>>, vector<8x128xf32>
    tpu.vector_store %arg10[%c0_6, %c0_7], %9 {strides = array<i32>} : memref<8x128xf32, #tpu.memory_space<vmem>>, vector<8x128xf32>,
    %c0_8 = arith.constant 0 : index
    %c0_9 = arith.constant 0 : index
    %11 = vector.load %arg11[%c0_8, %c0_9] : memref<8x1xf32, #tpu.memory_space<vmem>>, vector<8x1xf32>
    %cst_10 = arith.constant dense<0.000000e+00> : vector<8xf32>
    %12 = vector.multi_reduction <add>, %5, %cst_10 [1] : vector<8x4096xf32> to vector<8xf32>
    %13 = vector.shape_cast %12 : vector<8xf32> to vector<8x1xf32>
    %14 = arith.addf %11, %13 : vector<8x1xf32>
    %c0_11 = arith.constant 0 : index
    %c0_12 = arith.constant 0 : index
    %15 = vector.load %arg11[%c0_11, %c0_12] : memref<8x1xf32, #tpu.memory_space<vmem>>, vector<8x1xf32>
    tpu.vector_store %arg11[%c0_11, %c0_12], %14 {strides = array<i32>} : memref<8x1xf32, #tpu.memory_space<vmem>>, vector<8x1xf32>,
    %c3_i32 = arith.constant 3 : i32
    %16 = arith.cmpi eq, %arg0, %c3_i32 : i32
    %17 = arith.extui %16 : i1 to i32
    %c0_i32_13 = arith.constant 0 : i32
    %18 = arith.cmpi ne, %17, %c0_i32_13 : i32
    scf.if %18 {
      %c0_14 = arith.constant 0 : index
      %c0_15 = arith.constant 0 : index
      %19 = vector.load %arg10[%c0_14, %c0_15] : memref<8x128xf32, #tpu.memory_space<vmem>>, vector<8x128xf32>
      %cst_16 = arith.constant 0.899999976 : f32
      %20 = vector.broadcast %cst_16 : f32 to vector<8x128xf32>
      %21 = arith.mulf %19, %20 : vector<8x128xf32>
      %c0_17 = arith.constant 0 : index
      %c0_18 = arith.constant 0 : index
      %22 = vector.load %arg11[%c0_17, %c0_18] : memref<8x1xf32, #tpu.memory_space<vmem>>, vector<8x1xf32>
      %cst_19 = arith.constant 1.000000e+00 : f32
      %23 = vector.broadcast %cst_19 : f32 to vector<8x1xf32>
      %24 = arith.mulf %22, %23 : vector<8x1xf32>
      %25 = vector.broadcast %24 : vector<8x1xf32> to vector<8x128xf32>
      %26 = arith.addf %21, %25 : vector<8x128xf32>
      %c0_20 = arith.constant 0 : index
      %c0_21 = arith.constant 0 : index
      %27 = vector.load %arg3[%c0_20, %c0_21] : memref<128x128xf32, #tpu.memory_space<vmem>>, vector<128x128xf32>
      %cst_22 = arith.constant dense<0.000000e+00> : vector<8x128xf32>
      %28 = tpu.matmul %26, %27, %cst_22 {dimension_numbers = #tpu.dot_dimension_numbers<[1], [0], [0], [1], [0, 0, 1, 1], [], []>} : vector<8x128xf32>, vector<128x128xf32>, vector<8x128xf32> -> vector<8x128xf32>
      %c0_23 = arith.constant 0 : index
      %c0_24 = arith.constant 0 : index
      %29 = vector.load %arg4[%c0_23, %c0_24] : memref<1x128xf32, #tpu.memory_space<vmem>>, vector<1x128xf32>
      %30 = vector.broadcast %29 : vector<1x128xf32> to vector<8x128xf32>
      %31 = arith.addf %28, %30 : vector<8x128xf32>
      %cst_25 = arith.constant 0.000000e+00 : f32
      %32 = vector.broadcast %cst_25 : f32 to vector<8x128xf32>
      %33 = arith.cmpf oge, %31, %32 : vector<8x128xf32>
      %cst_26 = arith.constant 1.000000e-01 : f32
      %34 = vector.broadcast %cst_26 : f32 to vector<8x128xf32>
      %35 = arith.mulf %34, %31 : vector<8x128xf32>
      %36 = arith.select %33, %31, %35 : vector<8x128xi1>, vector<8x128xf32>
      %c0_27 = arith.constant 0 : index
      %c0_28 = arith.constant 0 : index
      %37 = vector.load %arg5[%c0_27, %c0_28] : memref<128x128xf32, #tpu.memory_space<vmem>>, vector<128x128xf32>
      %cst_29 = arith.constant dense<0.000000e+00> : vector<8x128xf32>
      %38 = tpu.matmul %36, %37, %cst_29 {dimension_numbers = #tpu.dot_dimension_numbers<[1], [0], [0], [1], [0, 0, 1, 1], [], []>} : vector<8x128xf32>, vector<128x128xf32>, vector<8x128xf32> -> vector<8x128xf32>
      %c0_30 = arith.constant 0 : index
      %c0_31 = arith.constant 0 : index
      %39 = vector.load %arg6[%c0_30, %c0_31] : memref<1x128xf32, #tpu.memory_space<vmem>>, vector<1x128xf32>
      %40 = vector.broadcast %39 : vector<1x128xf32> to vector<8x128xf32>
      %41 = arith.addf %38, %40 : vector<8x128xf32>
      %cst_32 = arith.constant 0.000000e+00 : f32
      %42 = vector.broadcast %cst_32 : f32 to vector<8x128xf32>
      %43 = arith.cmpf oge, %41, %42 : vector<8x128xf32>
      %cst_33 = arith.constant 1.000000e-01 : f32
      %44 = vector.broadcast %cst_33 : f32 to vector<8x128xf32>
      %45 = arith.mulf %44, %41 : vector<8x128xf32>
      %46 = arith.select %43, %41, %45 : vector<8x128xi1>, vector<8x128xf32>
      %c0_34 = arith.constant 0 : index
      %c0_35 = arith.constant 0 : index
      %47 = vector.load %arg7[%c0_34, %c0_35] : memref<128x8xf32, #tpu.memory_space<vmem>>, vector<128x8xf32>
      %cst_36 = arith.constant dense<0.000000e+00> : vector<8x8xf32>
      %48 = tpu.matmul %46, %47, %cst_36 {dimension_numbers = #tpu.dot_dimension_numbers<[1], [0], [0], [1], [0, 0, 1, 1], [], []>} : vector<8x128xf32>, vector<128x8xf32>, vector<8x8xf32> -> vector<8x8xf32>
      %c0_37 = arith.constant 0 : index
      %c0_38 = arith.constant 0 : index
      %49 = vector.load %arg8[%c0_37, %c0_38] : memref<1x8xf32, #tpu.memory_space<vmem>>, vector<1x8xf32>
      %50 = vector.broadcast %49 : vector<1x8xf32> to vector<8x8xf32>
      %51 = arith.addf %48, %50 : vector<8x8xf32>
      %c0_39 = arith.constant 0 : index
      %c0_40 = arith.constant 0 : index
      %52 = vector.load %arg9[%c0_39, %c0_40] : memref<8x8xf32, #tpu.memory_space<vmem>>, vector<8x8xf32>
      tpu.vector_store %arg9[%c0_39, %c0_40], %51 {strides = array<i32>} : memref<8x8xf32, #tpu.memory_space<vmem>>, vector<8x8xf32>,
    } else {
    }
    return
  }
  func.func @transform_0(%arg0: i32) -> (i32, i32) {
    %c0_i32 = arith.constant 0 : i32
    %c0_i32_0 = arith.constant 0 : i32
    return %c0_i32, %arg0 : i32, i32
  }
  func.func @transform_1(%arg0: i32) -> (i32, i32) {
    %c0_i32 = arith.constant 0 : i32
    %c0_i32_0 = arith.constant 0 : i32
    return %arg0, %c0_i32 : i32, i32
  }
  func.func @transform_2(%arg0: i32) -> (i32, i32) {
    %c0_i32 = arith.constant 0 : i32
    %c0_i32_0 = arith.constant 0 : i32
    %c0_i32_1 = arith.constant 0 : i32
    return %c0_i32, %c0_i32_0 : i32, i32
  }
  func.func @transform_3(%arg0: i32) -> (i32, i32) {
    %c0_i32 = arith.constant 0 : i32
    %c0_i32_0 = arith.constant 0 : i32
    %c0_i32_1 = arith.constant 0 : i32
    return %c0_i32, %c0_i32_0 : i32, i32
  }
  func.func @transform_4(%arg0: i32) -> (i32, i32) {
    %c0_i32 = arith.constant 0 : i32
    %c0_i32_0 = arith.constant 0 : i32
    %c0_i32_1 = arith.constant 0 : i32
    return %c0_i32, %c0_i32_0 : i32, i32
  }
  func.func @transform_5(%arg0: i32) -> (i32, i32) {
    %c0_i32 = arith.constant 0 : i32
    %c0_i32_0 = arith.constant 0 : i32
    %c0_i32_1 = arith.constant 0 : i32
    return %c0_i32, %c0_i32_0 : i32, i32
  }
  func.func @transform_6(%arg0: i32) -> (i32, i32) {
    %c0_i32 = arith.constant 0 : i32
    %c0_i32_0 = arith.constant 0 : i32
    %c0_i32_1 = arith.constant 0 : i32
    return %c0_i32, %c0_i32_0 : i32, i32
  }
  func.func @transform_7(%arg0: i32) -> (i32, i32) {
    %c0_i32 = arith.constant 0 : i32
    %c0_i32_0 = arith.constant 0 : i32
    %c0_i32_1 = arith.constant 0 : i32
    return %c0_i32, %c0_i32_0 : i32, i32
  }
  func.func @transform_8(%arg0: i32) -> (i32, i32) {
    %c0_i32 = arith.constant 0 : i32
    %c0_i32_0 = arith.constant 0 : i32
    %c0_i32_1 = arith.constant 0 : i32
    return %c0_i32, %c0_i32_0 : i32, i32
  }
}

</mosaic_0001>

<bundles_post_ra>
// kernel: tpu_custom_call.1
= control target key start
LH: loop header
LB: loop body
LE: loop exit
PB: predicated region body
PF: predicated region fallthrough
CT: control target
= control target key end

     0   :  { %s6476_s0 = inlined_call_operand.hbm [shape: f32[8,16384], index: 0, kind: input, shape index: {}]   ;;  %s6477_s1 = inlined_call_operand.hbm [shape: bf16[16384,128], index: 1, kind: input, shape index: {}]   ;;  %s6478_s2 = inlined_call_operand.hbm [shape: f32[128,128], index: 2, kind: input, shape index: {}]   ;;  %s6479_s3 = inlined_call_operand.hbm [shape: f32[1,128], index: 3, kind: input, shape index: {}]   ;;  %s6480_s4 = inlined_call_operand.hbm [shape: f32[128,128], index: 4, kind: input, shape index: {}]   ;;  %s6481_s5 = inlined_call_operand.hbm [shape: f32[1,128], index: 5, kind: input, shape index: {}]   ;;  %s6482_s6 = inlined_call_operand.vmem [shape: f32[128,8], index: 6, kind: input, shape index: {}]   ;;  %s6483_s7 = inlined_call_operand.hbm [shape: f32[1,8], index: 7, kind: input, shape index: {}]   ;;  %s6484_s8 = inlined_call_operand.hbm [shape: f32[8,8], index: 8, kind: output, shape index: {}]  }
   0x1   :  { %6485 = sst [smem:[#allocation23_spill]] %s6478_s2 }
   0x2   :  { %6486 = sst [smem:[#allocation24_spill]] %s6479_s3 }
   0x3   :  { %6487 = sst [smem:[#allocation25_spill]] %s6480_s4 }
   0x4   :  { %6488 = sst [smem:[#allocation26_spill]] %s6481_s5 }
   0x5   :  { %13 = vsyncpa [#allocation5], 0 }
   0x6   :  { %15 = vsyncpa [#allocation5 + $0x1], 0 }
   0x7   :  { %16 = vsyncpa [#allocation8], 0 }
   0x8   :  { %18 = vsyncpa [#allocation8 + $0x1], 0 }
   0x9   :  { %19 = vsyncpa [#allocation11], 0 }
   0xa   :  { %20 = vsyncpa [#allocation14], 0 }
   0xb   :  { %21 = vsyncpa [#allocation6], 0  ;;  %s5817_s27 = smov 0   ;;  %s5819_s28 = smov 0  }
   0xc   :  { %s5821_s29 = smov 0   ;;  %s5823_s30 = smov 0  }
   0xd LB: > { %s6489_s2 = sld [smem:[#allocation23_spill]]  ;;  %s5841_s12 = sadd.s32 4294967295, %s5758_s30   ;;  %s5758_s30 = sphi %s5823_s30, %s6500_s30   ;;  %s5754_s29 = sphi %s5821_s29, %s6499_s29   ;;  %s5750_s28 = sphi %s5819_s28, %s6498_s28   ;;  %s5746_s27 = sphi %s5817_s27, %s6497_s27  }
   0xe   : > { %p3022_p0 = scmp.ge.s32.totalorder %s5758_s30, 1  ;;  %p48_p1 = scmp.eq.s32.totalorder %s5841_s12, 0 }
   0xf   : > { %p231_p2 = scmp.lt.s32.totalorder %s5758_s30, 5  ;;  %p3023_p3 = scmp.ne.s32.totalorder %s5841_s12, 0 }
  0x10   : > { %s5760_s14 = smov [#allocation9]   ;;  %s6491_s3 = sld [smem:[#allocation24_spill]] }
  0x11   : > { %p5847_p4 = pnand %p3022_p0, %p231_p2  ;;  %s244_s15 = sshll.u32 %s5760_s14, 4  ;;  %s245_s15 = int_to_ptr.vmem [resolvable:$true] %s244_s15 }
  0x12   : > { %s6493_s5 = sld [smem:[#allocation26_spill]]  ;;  %s5761_s23 = smov [#allocation10]  }
  0x13   : > { %s242_s11 = sshll.u32 %s6489_s2, 4  ;;  %p4358_p5 = pneg %p5847_p4  ;;  %s243_s11 = int_to_ptr.hbm [resolvable:$true] %s242_s11 }
  0x14   : > { %s259_s24 = sshll.u32 %s5761_s23, 4  ;;  %s5762_s25 = smov 128   ;;  %s260_s24 = int_to_ptr.vmem [resolvable:$true] %s259_s24 }
  0x15   : > { %p5858_p6 = pnand %p4358_p5, %p48_p1  ;;  %s5763_s26 = smov 8  }
  0x16   : > { %s257_s18 = sshll.u32 %s6491_s3, 4  ;;  %s6494_s4 = sld [smem:[#allocation25_spill]]  ;;  %s258_s18 = int_to_ptr.hbm [resolvable:$true] %s257_s18 }
  0x17   : > { %4361 = dma.hbm_to_vmem [thread:$0]  (!%p5858_p6), %s243_s11, 2048, %s245_s15, [#allocation8], %s5762_s25, %s5762_s25, %s5763_s26  }
  0x18   : > { %s283_s22 = sshll.u32 %s6493_s5, 4  ;;  %s5764_s16 = smov [#allocation13]   ;;  %s284_s22 = int_to_ptr.hbm [resolvable:$true] %s283_s22 }
  0x19   : > { %4364 = dma.hbm_to_vmem [thread:$0]  (!%p5858_p6), %s258_s18, 16, %s260_s24, [#allocation11]  }
  0x1a   : > { %s285_s17 = sshll.u32 %s5764_s16, 4  ;;  %s5765_s11 = smov [#allocation12]   ;;  %s286_s17 = int_to_ptr.vmem [resolvable:$true] %s285_s17 }
  0x1b   : > { %4370 = dma.hbm_to_vmem [thread:$0]  (!%p5858_p6), %s284_s22, 16, %s286_s17, [#allocation14]  }
  0x1c   : > { %s268_s14 = sshll.u32 %s6494_s4, 4  ;;  %s270_s15 = sshll.u32 %s5765_s11, 4  ;;  %s269_s14 = int_to_ptr.hbm [resolvable:$true] %s268_s14  ;;  %s271_s15 = int_to_ptr.vmem [resolvable:$true] %s270_s15 }
  0x1d   : > { %s298_s21 = sshll.u32 %s6483_s7, 4  ;;  %s5766_s23 = smov [#allocation15]   ;;  %s299_s21 = int_to_ptr.hbm [resolvable:$true] %s298_s21 }
  0x1e   : > { %4367 = dma.hbm_to_vmem [thread:$0]  (!%p5858_p6), %s269_s14, 2048, %s271_s15, [#allocation11], %s5762_s25, %s5762_s25, %s5763_s26  }
  0x1f   : > { %s300_s24 = sshll.u32 %s5766_s23, 4  ;;  %s5882_s22 = sadd.s32 1, %s5758_s30   ;;  %s301_s24 = int_to_ptr.vmem [resolvable:$true] %s300_s24 }
  0x20   : > { %4373 = dma.hbm_to_vmem [thread:$0]  (!%p5858_p6), %s299_s21, 16, %s301_s24, [#allocation14]  }
  0x21   : > { %s31_s9 = ssub.s32 %s5758_s30, %s5882_s22  ;;  %s34_s10 = sadd.s32 1, %s5754_s29 }
  0x22   : > { %p32_p7 = scmp.eq.s32.totalorder %s31_s9, 0  ;;  %p41_p8 = scmp.ne.s32.totalorder %s5754_s29, %s5750_s28 }
  0x23   : > { %p42_p9 = scmp.eq.s32.totalorder %s5758_s30, 0  ;;  %p47_p10 = scmp.ne.s32.totalorder %s5750_s28, %s5746_s27 }
  0x24   : > { %s5893_s16 = scalar_select %p32_p7, %s5754_s29, %s34_s10  }
  0x25   : > { %p43_p11 = por %p42_p9, %p41_p8  ;;  %p5897_p12 = por %p48_p1, %p47_p10 }
  0x26   : > { %p4386_p13 = scmp.lt.s32.totalorder %s5758_s30, 4  ;;  %s311_s19 = sand.u32 1, %s5754_s29  }
  0x27   : > { %s3029_s26 = sshll.u32 %s311_s19, 8  ;;  %s3049_s14 = sshll.u32 %s5758_s30, 8 }
  0x28   : > { %s320_s15 = scalar_lea.hbm %s6476_s0, %s3049_s14  ;;  %s315_s18 = scalar_lea.vmem [#allocation4], %s3029_s26 }
  0x29   : > { %s324_s20 = sshll.u32 %s315_s18, 4  ;;  %s322_s27 = sshll.u32 %s320_s15, 4  ;;  %s325_s20 = int_to_ptr.vmem [resolvable:$true] %s324_s20  ;;  %s323_s27 = int_to_ptr.hbm [resolvable:$true] %s322_s27 }
  0x2a   : > { %p5907_p0 = pnand %p4386_p13, %p43_p11  ;;  %s3032_s23 = sshll.u32 %s311_s19, 11 }
  0x2b   : > { %s331_s24 = sand.u32 1, %s5758_s30   ;;  %s312_s9 = scalar_lea.sflag [#allocation5], %s311_s19 }
  0x2c   : > { %s5616_s10 = sshra.s32 %s323_s27, 4  ;;  %p5620_p5 = pneg %p5907_p0  ;;  %s5617_s10 = int_to_ptr.hbm [resolvable:$true] %s5616_s10 }
  0x2d   : > { %s5618_s2 = scalar_lea.hbm %s5617_s10, 256  ;;  %s5623_s17 = scalar_lea.hbm %s6476_s0, 1024 }
  0x2e   : > { %p5619_p2 = scmp.ne.s32.totalorder %s5617_s10, %s5618_s2  ;;  %p5624_p8 = scmp.lt.s32.totalorder %s5617_s10, %s6476_s0 }
  0x2f   : > { %p5625_p9 = scmp.lt.s32.totalorder %s5623_s17, %s5618_s2 }
  0x30   : > { %p5621_p6 = pnand %p5620_p5, %p5619_p2 }
  0x31   : > { %p5626_p10 = por %p5625_p9, %p5624_p8 }
  0x32   : > { %p5622_p7 = pneg %p5621_p6 }
  0x34   : > { %p5627_p11 = pnand %p5626_p10, %p5622_p7 }
  0x36   : > { %5630 = shalt.err (!%p5627_p11)
}
  0x37   : > { %4377 = dma.hbm_to_vmem [thread:$0]  (!%p5907_p0), %s323_s27, 4096, %s325_s20, %s312_s9  }
  0x38   : > { %s335_s19 = scalar_lea.vmem [#allocation7], %s3032_s23  ;;  %s3050_s3 = sshll.u32 %s5758_s30, 11 }
  0x39   : > { %s343_s18 = sshll.u32 %s335_s19, 4  ;;  %s340_s14 = scalar_lea.hbm %s6477_s1, %s3050_s3  ;;  %s344_s18 = int_to_ptr.vmem [resolvable:$true] %s343_s18 }
  0x3a   : > { %s341_s5 = sshll.u32 %s340_s14, 4  ;;  %s332_s10 = scalar_lea.sflag [#allocation8], %s331_s24  ;;  %s342_s5 = int_to_ptr.hbm [resolvable:$true] %s341_s5 }
  0x3b   : > { %s5646_s2 = sshra.s32 %s342_s5, 4  ;;  %s5653_s23 = scalar_lea.hbm %s6477_s1, 8192  ;;  %s5647_s2 = int_to_ptr.hbm [resolvable:$true] %s5646_s2 }
  0x3c   : > { %s5648_s17 = scalar_lea.hbm %s5647_s2, 2048  ;;  %p5654_p7 = scmp.lt.s32.totalorder %s5647_s2, %s6477_s1 }
  0x3d   : > { %p5649_p13 = scmp.ne.s32.totalorder %s5647_s2, %s5648_s17  ;;  %p5655_p8 = scmp.lt.s32.totalorder %s5653_s23, %s5648_s17 }
  0x3f   : > { %p5651_p2 = pnand %p5649_p13, %p5620_p5  ;;  %p5656_p9 = por %p5655_p8, %p5654_p7 }
  0x41   : > { %p5652_p6 = pneg %p5651_p2 }
  0x43   : > { %p5657_p10 = pnand %p5656_p9, %p5652_p6 }
  0x45   : > { %5660 = shalt.err (!%p5657_p10)
}
  0x46   : > { %s5767_s3 = smov 64   ;;  %s5768_s4 = smov 4  }
  0x47   : > { %4380 = dma.hbm_to_vmem [thread:$0]  (!%p5907_p0), %s342_s5, 32768, %s344_s18, %s332_s10, %s5767_s3, %s5767_s3, %s5768_s4  }
  0x48   : > { %355 = sbr.rel (%p5847_p4) target bundleno = 1282 (0x502), region = 52  ;;  %s357_s24 = sand.u32 (!%p5847_p4), 1, %s5750_s28  }
  0x49   : > { %s3036_s11 = sshll.u32 (!%p5847_p4), %s357_s24, 8  ;;  %s358_s15 = scalar_lea.sflag (!%p5847_p4), [#allocation5], %s357_s24 }
  0x4a   : > { %s5943_s19 = scalar_lea.vmem (!%p5847_p4), [#allocation4], %s3036_s11 }
  0x4d   : > { %5721 = dma.done.wait (%p5897_p12), %s358_s15, 4096  }
  0x4e   : > { %5723 = vsyncadd (%p5897_p12), %s358_s15, 4294963200  ;;  %s367_s26 = sand.u32 1, %s5841_s12   ;;  %s3037_s21 = sshll.u32 %s357_s24, 11 }
  0x4f   : > { %s368_s5 = scalar_lea.sflag [#allocation8], %s367_s26  ;;  %s5950_s18 = scalar_lea.vmem [#allocation7], %s3037_s21 }
  0x50   : > { %5725 = dma.done.wait (%p5897_p12), %s368_s5, 32768  }
  0x51   : > { %5727 = vsyncadd (%p5897_p12), %s368_s5, 4294934528 }
  0x52   : > { %5729 = dma.done.wait (%p48_p1), [#allocation8], 2048  }
  0x53   : > { %5731 = vsyncadd (%p48_p1), [#allocation8], 4294965248 }
  0x54   : > { %5733 = dma.done.wait (%p48_p1), [#allocation11], 2064  }
  0x55   : > { %5735 = vsyncadd (%p48_p1), [#allocation11], 4294965232 }
  0x56   : > { %5737 = dma.done.wait (%p48_p1), [#allocation14], 32  }
  0x57   : > { %5739 = vsyncadd (%p48_p1), [#allocation14], 4294967264  ;;  %435 = sbr.rel (%p3023_p3) target bundleno = 95 (0x5f), region = 84 }
  0x5c   : > { %vm437_vm0 = vcmask 7168   ;;  %v5769_v0 = vmov 0.0  }
  0x5d   : > { %436 = vst [vmem:[#allocation2] sm:$0xff] %v5769_v0 }
  0x5e   : > { %438 = vst.msk [vmem:[#allocation3] sm:$0xff] %vm437_vm0, %v5769_v0 }
  0x5f PF: > { %v4081_v1 = vld [vmem:[%s5950_s18 + $0x38] sm:$0xff]   ;;  %v4080_v11 = vld [vmem:[%s5950_s18 + $0x30] sm:$0xff]   ;;  %v4079_v28 = vld [vmem:[%s5950_s18 + $0x28] sm:$0xff]   ;;  %vm2749_vm1 = vcmask 7168   ;;  %p3044_p1 = scmp.ne.s32.totalorder %s5841_s12, 3 }
  0x60   : > { %v4089_v2 = vld [vmem:[%s5950_s18 + $0x78] sm:$0xff]   ;;  %v3081_v4 = vunpack.c.l.bf16 %v4081_v1  ;;  %v3082_v5 = vunpack.c.h.bf16 %v4081_v1  ;;  %v4088_v14 = vld [vmem:[%s5950_s18 + $0x70] sm:$0xff]   ;;  %v3077_v15 = vunpack.c.l.bf16 %v4080_v11  ;;  %v3078_v16 = vunpack.c.h.bf16 %v4080_v11  ;;  %v4087_v34 = vld [vmem:[%s5950_s18 + $0x68] sm:$0xff]  }
  0x61   : > { %v4097_v3 = vld [vmem:[%s5950_s18 + $0xb8] sm:$0xff]   ;;  %v3113_v6 = vunpack.c.l.bf16 %v4089_v2  ;;  %v3114_v7 = vunpack.c.h.bf16 %v4089_v2  ;;  %v4096_v17 = vld [vmem:[%s5950_s18 + $0xb0] sm:$0xff]   ;;  %v3109_v19 = vunpack.c.l.bf16 %v4088_v14  ;;  %v3110_v21 = vunpack.c.h.bf16 %v4088_v14  ;;  %v4095_v40 = vld [vmem:[%s5950_s18 + $0xa8] sm:$0xff]  }
  0x62   : > { %v4105_v8 = vld [vmem:[%s5950_s18 + $0xf8] sm:$0xff]   ;;  %4438 = vtanh.f32 %v3081_v4  ;;  %v3145_v9 = vunpack.c.l.bf16 %v4097_v3  ;;  %v3146_v10 = vunpack.c.h.bf16 %v4097_v3  ;;  %v4104_v22 = vld [vmem:[%s5950_s18 + $0xf0] sm:$0xff]   ;;  %v3141_v25 = vunpack.c.l.bf16 %v4096_v17  ;;  %v4103_v46 = vld [vmem:[%s5950_s18 + $0xe8] sm:$0xff]  }
  0x63   : > { %4440 = vtanh.f32 %v3082_v5  ;;  %v3177_v12 = vunpack.c.l.bf16 %v4105_v8  ;;  %v3178_v13 = vunpack.c.h.bf16 %v4105_v8  ;;  %v3142_v27 = vunpack.c.h.bf16 %v4096_v17  ;;  %v4078_v52 = vld [vmem:[%s5950_s18 + $0x20] sm:$0xff]  }
  0x64   : > { %4442 = vtanh.f32 %v3113_v6  ;;  %v3173_v31 = vunpack.c.l.bf16 %v4104_v22  ;;  %v3174_v33 = vunpack.c.h.bf16 %v4104_v22  ;;  %v3073_v37 = vunpack.c.l.bf16 %v4079_v28  ;;  %v4086_v58 = vld [vmem:[%s5950_s18 + $0x60] sm:$0xff]  }
  0x65   : > { %4444 = vtanh.f32 %v3114_v7  ;;  %v3074_v39 = vunpack.c.h.bf16 %v4079_v28  ;;  %v3105_v43 = vunpack.c.l.bf16 %v4087_v34  ;;  %v3106_v45 = vunpack.c.h.bf16 %v4087_v34  ;;  %v4094_v0 = vld [vmem:[%s5950_s18 + $0xa0] sm:$0xff]  }
  0x66   : > { %4446 = vtanh.f32 %v3145_v9  ;;  %v3137_v49 = vunpack.c.l.bf16 %v4095_v40  ;;  %v3138_v51 = vunpack.c.h.bf16 %v4095_v40  ;;  %v3169_v55 = vunpack.c.l.bf16 %v4103_v46  ;;  %v4102_v6 = vld [vmem:[%s5950_s18 + $0xe0] sm:$0xff]  }
  0x67   : > { %4448 = vtanh.f32 %v3146_v10  ;;  %v3170_v57 = vunpack.c.h.bf16 %v4103_v46  ;;  %v3069_v61 = vunpack.c.l.bf16 %v4078_v52  ;;  %v3070_v63 = vunpack.c.h.bf16 %v4078_v52 }
  0x68   : > { %v4439_v18 = vpop.eup %4438  ;;  %4450 = vtanh.f32 %v3177_v12  ;;  %v3101_v3 = vunpack.c.l.bf16 %v4086_v58  ;;  %v3102_v5 = vunpack.c.h.bf16 %v4086_v58  ;;  %v3133_v9 = vunpack.c.l.bf16 %v4094_v0  ;;  %v4077_v12 = vld [vmem:[%s5950_s18 + $0x18] sm:$0xff]  }
  0x69   : > { %v4441_v20 = vpop.eup %4440  ;;  %4452 = vtanh.f32 %v3178_v13  ;;  %v3134_v11 = vunpack.c.h.bf16 %v4094_v0  ;;  %v3166_v17 = vunpack.c.h.bf16 %v4102_v6 }
  0x6a   : > { %v4443_v23 = vpop.eup %4442  ;;  %v1982_v24 = vpack.c.bf16 %v4441_v20, %v4439_v18  ;;  %4454 = vtanh.f32 %v3077_v15  ;;  %v3165_v15 = vunpack.c.l.bf16 %v4102_v6  ;;  %v4085_v18 = vld [vmem:[%s5950_s18 + $0x58] sm:$0xff]  }
  0x6b   : > { %v4445_v26 = vpop.eup %4444  ;;  %4456 = vtanh.f32 %v3078_v16 }
  0x6c   : > { %v4447_v29 = vpop.eup %4446  ;;  %2296 = vmatpush.bf16.msra.mxu0 %v1982_v24  ;;  %v1990_v30 = vpack.c.bf16 %v4445_v26, %v4443_v23  ;;  %4458 = vtanh.f32 %v3109_v19  ;;  %v3066_v23 = vunpack.c.h.bf16 %v4077_v12  ;;  %v4093_v24 = vld [vmem:[%s5950_s18 + $0x98] sm:$0xff]  }
  0x6d   : > { %v4449_v32 = vpop.eup %4448  ;;  %4460 = vtanh.f32 %v3110_v21  ;;  %v3065_v21 = vunpack.c.l.bf16 %v4077_v12 }
  0x6e   : > { %v4451_v35 = vpop.eup %4450  ;;  %2309 = vmatpush.bf16.msra.mxu1 %v1990_v30  ;;  %v1998_v36 = vpack.c.bf16 %v4449_v32, %v4447_v29  ;;  %4462 = vtanh.f32 %v3141_v25  ;;  %v3098_v29 = vunpack.c.h.bf16 %v4085_v18  ;;  %v4101_v30 = vld [vmem:[%s5950_s18 + $0xd8] sm:$0xff]  }
  0x6f   : > { %v4453_v38 = vpop.eup %4452  ;;  %4464 = vtanh.f32 %v3142_v27  ;;  %v3097_v27 = vunpack.c.l.bf16 %v4085_v18 }
  0x70   : > { %v4455_v41 = vpop.eup %4454  ;;  %2322 = vmatpush.bf16.msra.mxu2 %v1998_v36  ;;  %v2006_v42 = vpack.c.bf16 %v4453_v38, %v4451_v35  ;;  %4466 = vtanh.f32 %v3173_v31  ;;  %v3130_v35 = vunpack.c.h.bf16 %v4093_v24  ;;  %v4076_v36 = vld [vmem:[%s5950_s18 + $0x10] sm:$0xff]  }
  0x71   : > { %v4457_v44 = vpop.eup %4456  ;;  %4468 = vtanh.f32 %v3174_v33  ;;  %v3129_v33 = vunpack.c.l.bf16 %v4093_v24 }
  0x72   : > { %v4459_v47 = vpop.eup %4458  ;;  %2335 = vmatpush.bf16.msra.mxu3 %v2006_v42  ;;  %v1981_v48 = vpack.c.bf16 %v4457_v44, %v4455_v41  ;;  %4470 = vtanh.f32 %v3073_v37  ;;  %v3162_v41 = vunpack.c.h.bf16 %v4101_v30  ;;  %v4084_v42 = vld [vmem:[%s5950_s18 + $0x50] sm:$0xff]  }
  0x73   : > { %v4461_v50 = vpop.eup %4460  ;;  %4472 = vtanh.f32 %v3074_v39  ;;  %v3161_v39 = vunpack.c.l.bf16 %v4101_v30 }
  0x74   : > { %v4463_v53 = vpop.eup %4462  ;;  %2297 = vmatpush.bf16.msra.mxu0 %v1981_v48  ;;  %v1989_v54 = vpack.c.bf16 %v4461_v50, %v4459_v47  ;;  %4474 = vtanh.f32 %v3105_v43  ;;  %v3062_v47 = vunpack.c.h.bf16 %v4076_v36  ;;  %v4092_v48 = vld [vmem:[%s5950_s18 + $0x90] sm:$0xff]  }
  0x75   : > { %v4465_v56 = vpop.eup %4464  ;;  %4476 = vtanh.f32 %v3106_v45  ;;  %v3061_v45 = vunpack.c.l.bf16 %v4076_v36 }
  0x76   : > { %v4467_v59 = vpop.eup %4466  ;;  %2310 = vmatpush.bf16.msra.mxu1 %v1989_v54  ;;  %v1997_v60 = vpack.c.bf16 %v4465_v56, %v4463_v53  ;;  %4478 = vtanh.f32 %v3137_v49  ;;  %v3094_v53 = vunpack.c.h.bf16 %v4084_v42  ;;  %v4100_v54 = vld [vmem:[%s5950_s18 + $0xd0] sm:$0xff]  }
  0x77   : > { %v4469_v62 = vpop.eup %4468  ;;  %4480 = vtanh.f32 %v3138_v51  ;;  %v3093_v51 = vunpack.c.l.bf16 %v4084_v42 }
  0x78   : > { %v4471_v1 = vpop.eup %4470  ;;  %2323 = vmatpush.bf16.msra.mxu2 %v1997_v60  ;;  %v2005_v2 = vpack.c.bf16 %v4469_v62, %v4467_v59  ;;  %4482 = vtanh.f32 %v3169_v55  ;;  %v3126_v59 = vunpack.c.h.bf16 %v4092_v48  ;;  %v4075_v60 = vld [vmem:[%s5950_s18 + $0x8] sm:$0xff]  }
  0x79   : > { %v4473_v4 = vpop.eup %4472  ;;  %4484 = vtanh.f32 %v3170_v57  ;;  %v3125_v57 = vunpack.c.l.bf16 %v4092_v48 }
  0x7a   : > { %v4475_v7 = vpop.eup %4474  ;;  %2336 = vmatpush.bf16.msra.mxu3 %v2005_v2  ;;  %v1980_v8 = vpack.c.bf16 %v4473_v4, %v4471_v1  ;;  %4486 = vtanh.f32 %v3069_v61  ;;  %v3158_v1 = vunpack.c.h.bf16 %v4100_v54  ;;  %v4083_v2 = vld [vmem:[%s5950_s18 + $0x48] sm:$0xff]  }
  0x7b   : > { %v4477_v10 = vpop.eup %4476  ;;  %4488 = vtanh.f32 %v3070_v63  ;;  %v3157_v63 = vunpack.c.l.bf16 %v4100_v54 }
  0x7c   : > { %v4479_v13 = vpop.eup %4478  ;;  %2298 = vmatpush.bf16.msra.mxu0 %v1980_v8  ;;  %v1988_v14 = vpack.c.bf16 %v4477_v10, %v4475_v7  ;;  %4490 = vtanh.f32 %v3101_v3  ;;  %v3058_v7 = vunpack.c.h.bf16 %v4075_v60  ;;  %v4091_v8 = vld [vmem:[%s5950_s18 + $0x88] sm:$0xff]  }
  0x7d   : > { %v4481_v16 = vpop.eup %4480  ;;  %4492 = vtanh.f32 %v3102_v5  ;;  %v3057_v5 = vunpack.c.l.bf16 %v4075_v60 }
  0x7e   : > { %v4483_v19 = vpop.eup %4482  ;;  %2311 = vmatpush.bf16.msra.mxu1 %v1988_v14  ;;  %v1996_v20 = vpack.c.bf16 %v4481_v16, %v4479_v13  ;;  %4494 = vtanh.f32 %v3133_v9  ;;  %v3090_v13 = vunpack.c.h.bf16 %v4083_v2  ;;  %v4099_v14 = vld [vmem:[%s5950_s18 + $0xc8] sm:$0xff]  }
  0x7f   : > { %v4485_v22 = vpop.eup %4484  ;;  %4496 = vtanh.f32 %v3134_v11  ;;  %v3089_v11 = vunpack.c.l.bf16 %v4083_v2 }
  0x80   : > { %v4487_v25 = vpop.eup %4486  ;;  %2324 = vmatpush.bf16.msra.mxu2 %v1996_v20  ;;  %v2004_v26 = vpack.c.bf16 %v4485_v22, %v4483_v19  ;;  %4498 = vtanh.f32 %v3165_v15  ;;  %v3122_v19 = vunpack.c.h.bf16 %v4091_v8  ;;  %v3052_v20 = vld [vmem:[%s5950_s18] sm:$0xff]  }
  0x81   : > { %v4489_v28 = vpop.eup %4488  ;;  %4500 = vtanh.f32 %v3166_v17  ;;  %v3121_v17 = vunpack.c.l.bf16 %v4091_v8 }
  0x82   : > { %v4491_v31 = vpop.eup %4490  ;;  %2337 = vmatpush.bf16.msra.mxu3 %v2004_v26  ;;  %v1979_v32 = vpack.c.bf16 %v4489_v28, %v4487_v25  ;;  %4502 = vtanh.f32 %v3065_v21  ;;  %v3154_v25 = vunpack.c.h.bf16 %v4099_v14  ;;  %v4082_v26 = vld [vmem:[%s5950_s18 + $0x40] sm:$0xff]  }
  0x83   : > { %v4493_v34 = vpop.eup %4492  ;;  %4504 = vtanh.f32 %v3066_v23  ;;  %v3153_v23 = vunpack.c.l.bf16 %v4099_v14 }
  0x84   : > { %v4495_v37 = vpop.eup %4494  ;;  %2299 = vmatpush.bf16.msra.mxu0 %v1979_v32  ;;  %v1987_v38 = vpack.c.bf16 %v4493_v34, %v4491_v31  ;;  %4506 = vtanh.f32 %v3097_v27  ;;  %v3054_v31 = vunpack.c.h.bf16 %v3052_v20  ;;  %v4090_v32 = vld [vmem:[%s5950_s18 + $0x80] sm:$0xff]  }
  0x85   : > { %v4497_v40 = vpop.eup %4496  ;;  %4508 = vtanh.f32 %v3098_v29  ;;  %v3053_v29 = vunpack.c.l.bf16 %v3052_v20 }
  0x86   : > { %v4499_v43 = vpop.eup %4498  ;;  %2312 = vmatpush.bf16.msra.mxu1 %v1987_v38  ;;  %v1995_v44 = vpack.c.bf16 %v4497_v40, %v4495_v37  ;;  %4510 = vtanh.f32 %v3129_v33  ;;  %v3086_v37 = vunpack.c.h.bf16 %v4082_v26  ;;  %v4098_v38 = vld [vmem:[%s5950_s18 + $0xc0] sm:$0xff]  }
  0x87   : > { %v4501_v46 = vpop.eup %4500  ;;  %4512 = vtanh.f32 %v3130_v35  ;;  %v3085_v35 = vunpack.c.l.bf16 %v4082_v26 }
  0x88   : > { %v4503_v49 = vpop.eup %4502  ;;  %2325 = vmatpush.bf16.msra.mxu2 %v1995_v44  ;;  %v2003_v50 = vpack.c.bf16 %v4501_v46, %v4499_v43  ;;  %4514 = vtanh.f32 %v3161_v39  ;;  %v3118_v43 = vunpack.c.h.bf16 %v4090_v32  ;;  %v4113_v44 = vld [vmem:[%s5950_s18 + $0x138] sm:$0xff]  }
  0x89   : > { %v4505_v52 = vpop.eup %4504  ;;  %4516 = vtanh.f32 %v3162_v41  ;;  %v3117_v41 = vunpack.c.l.bf16 %v4090_v32 }
  0x8a   : > { %v4507_v55 = vpop.eup %4506  ;;  %2338 = vmatpush.bf16.msra.mxu3 %v2003_v50  ;;  %v1978_v56 = vpack.c.bf16 %v4505_v52, %v4503_v49  ;;  %4518 = vtanh.f32 %v3061_v45  ;;  %v3150_v49 = vunpack.c.h.bf16 %v4098_v38  ;;  %v4121_v50 = vld [vmem:[%s5950_s18 + $0x178] sm:$0xff]  }
  0x8b   : > { %v4509_v58 = vpop.eup %4508  ;;  %4520 = vtanh.f32 %v3062_v47  ;;  %v3149_v47 = vunpack.c.l.bf16 %v4098_v38 }
  0x8c   : > { %v4511_v61 = vpop.eup %4510  ;;  %2300 = vmatpush.bf16.msra.mxu0 %v1978_v56  ;;  %v1986_v62 = vpack.c.bf16 %v4509_v58, %v4507_v55  ;;  %4522 = vtanh.f32 %v3093_v51  ;;  %v3210_v55 = vunpack.c.h.bf16 %v4113_v44  ;;  %v4129_v56 = vld [vmem:[%s5950_s18 + $0x1b8] sm:$0xff]  }
  0x8d   : > { %v4513_v0 = vpop.eup %4512  ;;  %4524 = vtanh.f32 %v3094_v53  ;;  %v3209_v53 = vunpack.c.l.bf16 %v4113_v44 }
  0x8e   : > { %v4515_v3 = vpop.eup %4514  ;;  %2313 = vmatpush.bf16.msra.mxu1 %v1986_v62  ;;  %v1994_v4 = vpack.c.bf16 %v4513_v0, %v4511_v61  ;;  %4526 = vtanh.f32 %v3125_v57  ;;  %v3242_v61 = vunpack.c.h.bf16 %v4121_v50  ;;  %v4137_v62 = vld [vmem:[%s5950_s18 + $0x1f8] sm:$0xff]  }
  0x8f   : > { %v4517_v6 = vpop.eup %4516  ;;  %4528 = vtanh.f32 %v3126_v59  ;;  %v3241_v59 = vunpack.c.l.bf16 %v4121_v50  ;;  %v2233_v50 = vld [vmem:[%s5943_s19 + $0x10] sm:$0xff] }
  0x90   : > { %v4519_v9 = vpop.eup %4518  ;;  %2326 = vmatpush.bf16.msra.mxu2 %v1994_v4  ;;  %v2002_v10 = vpack.c.bf16 %v4517_v6, %v4515_v3  ;;  %4530 = vtanh.f32 %v3157_v63  ;;  %v3274_v3 = vunpack.c.h.bf16 %v4129_v56  ;;  %v4112_v4 = vld [vmem:[%s5950_s18 + $0x130] sm:$0xff]  }
  0x91   : > { %v4521_v12 = vpop.eup %4520  ;;  %4532 = vtanh.f32 %v3158_v1  ;;  %v3273_v1 = vunpack.c.l.bf16 %v4129_v56 }
  0x92   : > { %v4523_v15 = vpop.eup %4522  ;;  %2339 = vmatpush.bf16.msra.mxu3 %v2002_v10  ;;  %v1977_v16 = vpack.c.bf16 %v4521_v12, %v4519_v9  ;;  %4534 = vtanh.f32 %v3057_v5  ;;  %v3306_v9 = vunpack.c.h.bf16 %v4137_v62  ;;  %v4120_v10 = vld [vmem:[%s5950_s18 + $0x170] sm:$0xff]  }
  0x93   : > { %v4525_v18 = vpop.eup %4524  ;;  %4536 = vtanh.f32 %v3058_v7  ;;  %v3305_v7 = vunpack.c.l.bf16 %v4137_v62 }
  0x94   : > { %v4527_v21 = vpop.eup %4526  ;;  %2301 = vmatpush.bf16.msra.mxu0 %v1977_v16  ;;  %v1985_v22 = vpack.c.bf16 %v4525_v18, %v4523_v15  ;;  %4538 = vtanh.f32 %v3089_v11  ;;  %v3206_v15 = vunpack.c.h.bf16 %v4112_v4  ;;  %v4128_v16 = vld [vmem:[%s5950_s18 + $0x1b0] sm:$0xff]  }
  0x95   : > { %v4529_v24 = vpop.eup %4528  ;;  %4540 = vtanh.f32 %v3090_v13  ;;  %v3205_v13 = vunpack.c.l.bf16 %v4112_v4 }
  0x96   : > { %v4531_v27 = vpop.eup %4530  ;;  %2314 = vmatpush.bf16.msra.mxu1 %v1985_v22  ;;  %v1993_v28 = vpack.c.bf16 %v4529_v24, %v4527_v21  ;;  %4542 = vtanh.f32 %v3121_v17  ;;  %v3238_v21 = vunpack.c.h.bf16 %v4120_v10  ;;  %v4136_v22 = vld [vmem:[%s5950_s18 + $0x1f0] sm:$0xff]  }
  0x97   : > { %v4533_v30 = vpop.eup %4532  ;;  %4544 = vtanh.f32 %v3122_v19  ;;  %v3237_v19 = vunpack.c.l.bf16 %v4120_v10  ;;  %v4134_v10 = vld [vmem:[%s5950_s18 + $0x1e0] sm:$0xff]  }
  0x98   : > { %v4535_v33 = vpop.eup %4534  ;;  %2327 = vmatpush.bf16.msra.mxu2 %v1993_v28  ;;  %v2001_v34 = vpack.c.bf16 %v4533_v30, %v4531_v27  ;;  %4546 = vtanh.f32 %v3153_v23  ;;  %v3270_v27 = vunpack.c.h.bf16 %v4128_v16  ;;  %v4111_v28 = vld [vmem:[%s5950_s18 + $0x128] sm:$0xff]  }
  0x99   : > { %v4537_v36 = vpop.eup %4536  ;;  %4548 = vtanh.f32 %v3154_v25  ;;  %v3269_v25 = vunpack.c.l.bf16 %v4128_v16  ;;  %v2232_v16 = vld [vmem:[%s5943_s19 + $0x8] sm:$0xff] }
  0x9a   : > { %v4539_v39 = vpop.eup %4538  ;;  %2340 = vmatpush.bf16.msra.mxu3 %v2001_v34  ;;  %v1976_v40 = vpack.c.bf16 %v4537_v36, %v4535_v33  ;;  %4550 = vtanh.f32 %v3053_v29  ;;  %v3302_v33 = vunpack.c.h.bf16 %v4136_v22  ;;  %v4119_v34 = vld [vmem:[%s5950_s18 + $0x168] sm:$0xff]  }
  0x9b   : > { %v4541_v42 = vpop.eup %4540  ;;  %4552 = vtanh.f32 %v3054_v31  ;;  %v3301_v31 = vunpack.c.l.bf16 %v4136_v22 }
  0x9c   : > { %v4543_v45 = vpop.eup %4542  ;;  %2302 = vmatpush.bf16.msra.mxu0 %v1976_v40  ;;  %v1984_v46 = vpack.c.bf16 %v4541_v42, %v4539_v39  ;;  %4554 = vtanh.f32 %v3085_v35  ;;  %v3202_v39 = vunpack.c.h.bf16 %v4111_v28  ;;  %v4127_v40 = vld [vmem:[%s5950_s18 + $0x1a8] sm:$0xff]  }
  0x9d   : > { %v4545_v48 = vpop.eup %4544  ;;  %4556 = vtanh.f32 %v3086_v37  ;;  %v3201_v37 = vunpack.c.l.bf16 %v4111_v28 }
  0x9e   : > { %v4547_v51 = vpop.eup %4546  ;;  %2315 = vmatpush.bf16.msra.mxu1 %v1984_v46  ;;  %v1992_v52 = vpack.c.bf16 %v4545_v48, %v4543_v45  ;;  %4558 = vtanh.f32 %v3117_v41  ;;  %v3234_v45 = vunpack.c.h.bf16 %v4119_v34  ;;  %v4135_v46 = vld [vmem:[%s5950_s18 + $0x1e8] sm:$0xff]  }
  0x9f   : > { %v4549_v54 = vpop.eup %4548  ;;  %4560 = vtanh.f32 %v3118_v43  ;;  %v3233_v43 = vunpack.c.l.bf16 %v4119_v34  ;;  %v4125_v34 = vld [vmem:[%s5950_s18 + $0x198] sm:$0xff]  }
  0xa0   : > { %v4551_v57 = vpop.eup %4550  ;;  %2328 = vmatpush.bf16.msra.mxu2 %v1992_v52  ;;  %v2000_v58 = vpack.c.bf16 %v4549_v54, %v4547_v51  ;;  %4562 = vtanh.f32 %v3149_v47  ;;  %v3266_v52 = vunpack.c.h.bf16 %v4127_v40  ;;  %v2266_v54 = vpack.c.bf16 %v2233_v50, %v2233_v50 }
  0xa1   : > { %v4553_v60 = vpop.eup %4552  ;;  %4564 = vtanh.f32 %v3150_v49  ;;  %v3265_v49 = vunpack.c.l.bf16 %v4127_v40 }
  0xa2   : > { %v4555_v63 = vpop.eup %4554  ;;  %2341 = vmatpush.bf16.msra.mxu3 %v2000_v58  ;;  %v1975_v0 = vpack.c.bf16 %v4553_v60, %v4551_v57  ;;  %4566 = vtanh.f32 %v3209_v53  ;;  %v4110_v53 = vld [vmem:[%s5950_s18 + $0x120] sm:$0xff]   ;;  %v3297_v57 = vunpack.c.l.bf16 %v4135_v46 }
  0xa3   : > { %v4557_v2 = vpop.eup %4556  ;;  %4568 = vtanh.f32 %v3210_v55  ;;  %v4118_v60 = vld [vmem:[%s5950_s18 + $0x160] sm:$0xff]  }
  0xa4   : > { %v4559_v5 = vpop.eup %4558  ;;  %2303 = vmatpush.bf16.msra.mxu0 %v1975_v0  ;;  %v1983_v6 = vpack.c.bf16 %v4557_v2, %v4555_v63  ;;  %4570 = vtanh.f32 %v3241_v59  ;;  %v3298_v59 = vunpack.c.h.bf16 %v4135_v46  ;;  %v3197_v63 = vunpack.c.l.bf16 %v4110_v53  ;;  %v4126_v2 = vld [vmem:[%s5950_s18 + $0x1a0] sm:$0xff]  }
  0xa5   : > { %v4561_v8 = vpop.eup %4560  ;;  %4572 = vtanh.f32 %v3242_v61  ;;  %v3258_v46 = vunpack.c.h.bf16 %v4125_v34 }
  0xa6   : > { %v4563_v11 = vpop.eup %4562  ;;  %2316 = vmatpush.bf16.msra.mxu1 %v1983_v6  ;;  %v1991_v12 = vpack.c.bf16 %v4561_v8, %v4559_v5  ;;  %4574 = vtanh.f32 %v3273_v1  ;;  %v3198_v1 = vunpack.c.h.bf16 %v4110_v53  ;;  %v3229_v5 = vunpack.c.l.bf16 %v4118_v60  ;;  %v2231_v6 = vld [vmem:[%s5943_s19] sm:$0xff]  ;;  %v4116_v53 = vld [vmem:[%s5950_s18 + $0x150] sm:$0xff]  }
  0xa7   : > { %v4565_v14 = vpop.eup %4564  ;;  %4576 = vtanh.f32 %v3274_v3 }
  0xa8   : > { %v4567_v17 = vpop.eup %4566  ;;  %2329 = vmatpush.bf16.msra.mxu2 %v1991_v12  ;;  %v1999_v18 = vpack.c.bf16 %v4565_v14, %v4563_v11  ;;  %4578 = vtanh.f32 %v3305_v7  ;;  %v2234_v7 = vld [vmem:[%s5943_s19 + $0x18] sm:$0xff]  ;;  %v2264_v11 = vpack.c.bf16 %v2231_v6, %v2231_v6 }
  0xa9   : > { %v4569_v20 = vpop.eup %4568  ;;  %4580 = vtanh.f32 %v3306_v9  ;;  %v3230_v9 = vunpack.c.h.bf16 %v4118_v60  ;;  %v2267_v12 = vpack.c.bf16 %v2234_v7, %v2234_v7 }
  0xaa   : > { %v4571_v23 = vpop.eup %4570  ;;  %2342 = vmatpush.bf16.msra.mxu3 %v1999_v18  ;;  %v2014_v24 = vpack.c.bf16 %v4569_v20, %v4567_v17  ;;  %4582 = vtanh.f32 %v3205_v13  ;;  %v3262_v18 = vunpack.c.h.bf16 %v4126_v2  ;;  %2304 = vmatmul.bf16.vlgmr.msra.gmra.mxu0 %v2264_v11  ;;  %v2265_v20 = vpack.c.bf16 %v2232_v16, %v2232_v16 }
  0xab   : > { %v4573_v26 = vpop.eup %4572  ;;  %4584 = vtanh.f32 %v3206_v15  ;;  %2330 = vmatmul.bf16.vlgmr.msra.gmra.mxu2 %v2266_v54  ;;  %v3261_v15 = vunpack.c.l.bf16 %v4126_v2 }
  0xac   : > { %v4575_v29 = vpop.eup %4574  ;;  %2348 = vmatpush.bf16.msrb.mxu0 %v2014_v24  ;;  %v2022_v30 = vpack.c.bf16 %v4573_v26, %v4571_v23  ;;  %4586 = vtanh.f32 %v3237_v19  ;;  %v4109_v19 = vld [vmem:[%s5950_s18 + $0x118] sm:$0xff]   ;;  %v3293_v24 = vunpack.c.l.bf16 %v4134_v10  ;;  %v3294_v26 = vunpack.c.h.bf16 %v4134_v10  ;;  %2317 = vmatmul.bf16.vlgmr.msra.gmra.mxu1 %v2265_v20 }
  0xad   : > { %v4577_v32 = vpop.eup %4576  ;;  %4588 = vtanh.f32 %v3238_v21  ;;  %2343 = vmatmul.bf16.vlgmr.msra.gmra.mxu3 %v2267_v12  ;;  %v2715_v21 = vadd.f32 %v2232_v16, %v2231_v6 }
  0xae   : > { %v4579_v35 = vpop.eup %4578  ;;  %2361 = vmatpush.bf16.msrb.mxu1 %v2022_v30  ;;  %v2030_v36 = vpack.c.bf16 %v4577_v32, %v4575_v29  ;;  %4590 = vtanh.f32 %v3269_v25 }
  0xaf   : > { %v4581_v38 = vpop.eup %4580  ;;  %4592 = vtanh.f32 %v3270_v27  ;;  %v4117_v27 = vld [vmem:[%s5950_s18 + $0x158] sm:$0xff]   ;;  %v2716_v28 = vadd.f32 %v2715_v21, %v2233_v50 }
  0xb0   : > { %v4583_v41 = vpop.eup %4582  ;;  %2374 = vmatpush.bf16.msrb.mxu2 %v2030_v36  ;;  %v2038_v42 = vpack.c.bf16 %v4581_v38, %v4579_v35  ;;  %4594 = vtanh.f32 %v3301_v31  ;;  %v3193_v31 = vunpack.c.l.bf16 %v4109_v19  ;;  %v3225_v38 = vunpack.c.l.bf16 %v4117_v27 }
  0xb1   : > { %v4585_v44 = vpop.eup %4584  ;;  %4596 = vtanh.f32 %v3302_v33  ;;  %v3194_v33 = vunpack.c.h.bf16 %v4109_v19  ;;  %v6025_v35 = vadd.f32 %v2716_v28, %v2234_v7  ;;  %v3226_v40 = vunpack.c.h.bf16 %v4117_v27  ;;  %v4107_v7 = vld [vmem:[%s5950_s18 + $0x108] sm:$0xff]  }
  0xb2   : > { %v4587_v47 = vpop.eup %4586  ;;  %2387 = vmatpush.bf16.msrb.mxu3 %v2038_v42  ;;  %v2013_v48 = vpack.c.bf16 %v4585_v44, %v4583_v41  ;;  %4598 = vtanh.f32 %v3201_v37  ;;  %v4133_v41 = vld [vmem:[%s5950_s18 + $0x1d8] sm:$0xff]   ;;  %v3257_v44 = vunpack.c.l.bf16 %v4125_v34  ;;  %v3185_v16 = vunpack.c.l.bf16 %v4107_v7  ;;  %v4123_v19 = vld [vmem:[%s5950_s18 + $0x188] sm:$0xff]  }
  0xb3   : > { %v4589_v51 = vpop.eup %4588  ;;  %4600 = vtanh.f32 %v3202_v39  ;;  %v3289_v50 = vunpack.c.l.bf16 %v4133_v41  ;;  %v3249_v28 = vunpack.c.l.bf16 %v4123_v19 }
  0xb4   : > { %v4591_v55 = vpop.eup %4590  ;;  %2349 = vmatpush.bf16.msrb.mxu0 %v2013_v48  ;;  %v2021_v56 = vpack.c.bf16 %v4589_v51, %v4587_v47  ;;  %4602 = vtanh.f32 %v3233_v43  ;;  %v4108_v47 = vld [vmem:[%s5950_s18 + $0x110] sm:$0xff]  }
  0xb5   : > { %v4593_v58 = vpop.eup %4592  ;;  %4604 = vtanh.f32 %v3234_v45 }
  0xb6   : > { %v4595_v61 = vpop.eup %4594  ;;  %2362 = vmatpush.bf16.msrb.mxu1 %v2021_v56  ;;  %v2029_v62 = vpack.c.bf16 %v4593_v58, %v4591_v55  ;;  %4606 = vtanh.f32 %v3265_v49  ;;  %v3189_v56 = vunpack.c.l.bf16 %v4108_v47  ;;  %v3190_v58 = vunpack.c.h.bf16 %v4108_v47 }
  0xb7   : > { %v4597_v0 = vpop.eup %4596  ;;  %4608 = vtanh.f32 %v3266_v52  ;;  %v3290_v52 = vunpack.c.h.bf16 %v4133_v41 }
  0xb8   : > { %v4599_v3 = vpop.eup %4598  ;;  %2375 = vmatpush.bf16.msrb.mxu2 %v2029_v62  ;;  %v2037_v4 = vpack.c.bf16 %v4597_v0, %v4595_v61  ;;  %4610 = vtanh.f32 %v3297_v57  ;;  %v3221_v62 = vunpack.c.l.bf16 %v4116_v53  ;;  %v3222_v0 = vunpack.c.h.bf16 %v4116_v53 }
  0xb9   : > { %v4601_v8 = vpop.eup %4600  ;;  %4612 = vtanh.f32 %v3298_v59  ;;  %v4124_v59 = vld [vmem:[%s5950_s18 + $0x190] sm:$0xff]  }
  0xba   : > { %v4603_v13 = vpop.eup %4602  ;;  %2388 = vmatpush.bf16.msrb.mxu3 %v2037_v4  ;;  %v2012_v14 = vpack.c.bf16 %v4601_v8, %v4599_v3  ;;  %4614 = vtanh.f32 %v3197_v63  ;;  %v3253_v4 = vunpack.c.l.bf16 %v4124_v59  ;;  %v3254_v6 = vunpack.c.h.bf16 %v4124_v59 }
  0xbb   : > { %v4605_v17 = vpop.eup %4604  ;;  %4616 = vtanh.f32 %v3198_v1  ;;  %v4132_v1 = vld [vmem:[%s5950_s18 + $0x1d0] sm:$0xff]  }
  0xbc   : > { %v4607_v22 = vpop.eup %4606  ;;  %2350 = vmatpush.bf16.msrb.mxu0 %v2012_v14  ;;  %v2020_v23 = vpack.c.bf16 %v4605_v17, %v4603_v13  ;;  %4618 = vtanh.f32 %v3229_v5  ;;  %v3285_v10 = vunpack.c.l.bf16 %v4132_v1  ;;  %v3286_v12 = vunpack.c.h.bf16 %v4132_v1  ;;  %v4115_v13 = vld [vmem:[%s5950_s18 + $0x148] sm:$0xff]  }
  0xbd   : > { %v4609_v25 = vpop.eup %4608  ;;  %4620 = vtanh.f32 %v3230_v9 }
  0xbe   : > { %v4611_v29 = vpop.eup %4610  ;;  %2363 = vmatpush.bf16.msrb.mxu1 %v2020_v23  ;;  %v2028_v30 = vpack.c.bf16 %v4609_v25, %v4607_v22  ;;  %4622 = vtanh.f32 %v3261_v15  ;;  %v3217_v22 = vunpack.c.l.bf16 %v4115_v13  ;;  %v4131_v25 = vld [vmem:[%s5950_s18 + $0x1c8] sm:$0xff]  }
  0xbf   : > { %v4613_v32 = vpop.eup %4612  ;;  %4624 = vtanh.f32 %v3262_v18  ;;  %v3186_v18 = vunpack.c.h.bf16 %v4107_v7  ;;  %v3281_v34 = vunpack.c.l.bf16 %v4131_v25 }
  0xc0   : > { %v4615_v36 = vpop.eup %4614  ;;  %2376 = vmatpush.bf16.msrb.mxu2 %v2028_v30  ;;  %v2036_v37 = vpack.c.bf16 %v4613_v32, %v4611_v29  ;;  %4626 = vtanh.f32 %v3293_v24  ;;  %v3218_v24 = vunpack.c.h.bf16 %v4115_v13  ;;  %v3250_v30 = vunpack.c.h.bf16 %v4123_v19  ;;  %v4144_v19 = vld [vmem:[%s5950_s18 + $0x230] sm:$0xff]  }
  0xc1   : > { %v4617_v39 = vpop.eup %4616  ;;  %4628 = vtanh.f32 %v3294_v26 }
  0xc2   : > { %v4619_v42 = vpop.eup %4618  ;;  %2389 = vmatpush.bf16.msrb.mxu3 %v2036_v37  ;;  %v2011_v43 = vpack.c.bf16 %v4617_v39, %v4615_v36  ;;  %4630 = vtanh.f32 %v3193_v31  ;;  %v4106_v31 = vld [vmem:[%s5950_s18 + $0x100] sm:$0xff]   ;;  %v3282_v37 = vunpack.c.h.bf16 %v4131_v25 }
  0xc3   : > { %v4621_v45 = vpop.eup %4620  ;;  %4632 = vtanh.f32 %v3194_v33  ;;  %v3181_v41 = vunpack.c.l.bf16 %v4106_v31 }
  0xc4   : > { %v4623_v48 = vpop.eup %4622  ;;  %2351 = vmatpush.bf16.msrb.mxu0 %v2011_v43  ;;  %v2019_v49 = vpack.c.bf16 %v4621_v45, %v4619_v42  ;;  %4634 = vtanh.f32 %v3225_v38  ;;  %v4114_v38 = vld [vmem:[%s5950_s18 + $0x140] sm:$0xff]   ;;  %v3182_v43 = vunpack.c.h.bf16 %v4106_v31 }
  0xc5   : > { %v4625_v51 = vpop.eup %4624  ;;  %4636 = vtanh.f32 %v3226_v40  ;;  %v3213_v47 = vunpack.c.l.bf16 %v4114_v38 }
  0xc6   : > { %v4627_v54 = vpop.eup %4626  ;;  %2364 = vmatpush.bf16.msrb.mxu1 %v2019_v49  ;;  %v2027_v55 = vpack.c.bf16 %v4625_v51, %v4623_v48  ;;  %4638 = vtanh.f32 %v3257_v44  ;;  %v4122_v44 = vld [vmem:[%s5950_s18 + $0x180] sm:$0xff]   ;;  %v3214_v49 = vunpack.c.h.bf16 %v4114_v38  ;;  %v4160_v38 = vld [vmem:[%s5950_s18 + $0x2b0] sm:$0xff]  }
  0xc7   : > { %v4629_v57 = vpop.eup %4628  ;;  %4640 = vtanh.f32 %v3258_v46  ;;  %v3245_v53 = vunpack.c.l.bf16 %v4122_v44 }
  0xc8   : > { %v4631_v60 = vpop.eup %4630  ;;  %2377 = vmatpush.bf16.msrb.mxu2 %v2027_v55  ;;  %v2035_v61 = vpack.c.bf16 %v4629_v57, %v4627_v54  ;;  %4642 = vtanh.f32 %v3289_v50  ;;  %v4130_v50 = vld [vmem:[%s5950_s18 + $0x1c0] sm:$0xff]   ;;  %v4145_v57 = vld [vmem:[%s5950_s18 + $0x238] sm:$0xff]  }
  0xc9   : > { %v4633_v63 = vpop.eup %4632  ;;  %4644 = vtanh.f32 %v3290_v52  ;;  %v6041_v54 = vld [vmem:[%s5943_s19 + $0x20] sm:$0xff] }
  0xca   : > { %v4635_v2 = vpop.eup %4634  ;;  %2390 = vmatpush.bf16.msrb.mxu3 %v2035_v61  ;;  %v2010_v3 = vpack.c.bf16 %v4633_v63, %v4631_v60  ;;  %4646 = vtanh.f32 %v3189_v56  ;;  %v3246_v56 = vunpack.c.h.bf16 %v4122_v44  ;;  %v3277_v61 = vunpack.c.l.bf16 %v4130_v50 }
  0xcb   : > { %v4637_v5 = vpop.eup %4636  ;;  %4648 = vtanh.f32 %v3190_v58  ;;  %v2718_v58 = vadd.f32 %v6025_v35, %v6041_v54  ;;  %v3278_v63 = vunpack.c.h.bf16 %v4130_v50  ;;  %v3338_v35 = vunpack.c.h.bf16 %v4145_v57 }
  0xcc   : > { %v4639_v8 = vpop.eup %4638  ;;  %2352 = vmatpush.bf16.msrb.mxu0 %v2010_v3  ;;  %v2018_v9 = vpack.c.bf16 %v4637_v5, %v4635_v2  ;;  %4650 = vtanh.f32 %v3221_v62  ;;  %v3337_v3 = vunpack.c.l.bf16 %v4145_v57  ;;  %v4161_v5 = vld [vmem:[%s5950_s18 + $0x2b8] sm:$0xff]  }
  0xcd   : > { %v4641_v11 = vpop.eup %4640  ;;  %4652 = vtanh.f32 %v3222_v0  ;;  %v4153_v0 = vld [vmem:[%s5950_s18 + $0x278] sm:$0xff]  }
  0xce   : > { %v4643_v14 = vpop.eup %4642  ;;  %2365 = vmatpush.bf16.msrb.mxu1 %v2018_v9  ;;  %v2026_v15 = vpack.c.bf16 %v4641_v11, %v4639_v8  ;;  %4654 = vtanh.f32 %v3253_v4  ;;  %v3369_v8 = vunpack.c.l.bf16 %v4153_v0  ;;  %v4169_v11 = vld [vmem:[%s5950_s18 + $0x2f8] sm:$0xff]  }
  0xcf   : > { %v4645_v17 = vpop.eup %4644  ;;  %4656 = vtanh.f32 %v3254_v6 }
  0xd0   : > { %v4647_v20 = vpop.eup %4646  ;;  %2378 = vmatpush.bf16.msrb.mxu2 %v2026_v15  ;;  %v2034_v21 = vpack.c.bf16 %v4645_v17, %v4643_v14  ;;  %4658 = vtanh.f32 %v3285_v10  ;;  %v3370_v10 = vunpack.c.h.bf16 %v4153_v0  ;;  %v3401_v15 = vunpack.c.l.bf16 %v4161_v5 }
  0xd1   : > { %v4649_v23 = vpop.eup %4648  ;;  %4660 = vtanh.f32 %v3286_v12  ;;  %v2236_v12 = vld [vmem:[%s5943_s19 + $0x28] sm:$0xff] }
  0xd2   : > { %v4651_v26 = vpop.eup %4650  ;;  %2391 = vmatpush.bf16.msrb.mxu3 %v2034_v21  ;;  %v2009_v27 = vpack.c.bf16 %v4649_v23, %v4647_v20  ;;  %4662 = vtanh.f32 %v3185_v16  ;;  %v2719_v16 = vadd.f32 %v2718_v58, %v2236_v12  ;;  %v2237_v20 = vld [vmem:[%s5943_s19 + $0x30] sm:$0xff]  ;;  %v2268_v21 = vpack.c.bf16 %v6041_v54, %v6041_v54  ;;  %v4143_v54 = vld [vmem:[%s5950_s18 + $0x228] sm:$0xff]  }
  0xd3   : > { %v4653_v29 = vpop.eup %4652  ;;  %4664 = vtanh.f32 %v3186_v18  ;;  %v3402_v18 = vunpack.c.h.bf16 %v4161_v5 }
  0xd4   : > { %v4655_v32 = vpop.eup %4654  ;;  %2353 = vmatpush.bf16.msrb.mxu0 %v2009_v27  ;;  %v2017_v33 = vpack.c.bf16 %v4653_v29, %v4651_v26  ;;  %4666 = vtanh.f32 %v3217_v22  ;;  %v2720_v25 = vadd.f32 %v2719_v16, %v2237_v20  ;;  %v3434_v27 = vunpack.c.h.bf16 %v4169_v11  ;;  %v2238_v29 = vld [vmem:[%s5943_s19 + $0x38] sm:$0xff] }
  0xd5   : > { %v4657_v36 = vpop.eup %4656  ;;  %4668 = vtanh.f32 %v3218_v24  ;;  %v3433_v24 = vunpack.c.l.bf16 %v4169_v11 }
  0xd6   : > { %v4659_v39 = vpop.eup %4658  ;;  %2366 = vmatpush.bf16.msrb.mxu1 %v2017_v33  ;;  %v2025_v40 = vpack.c.bf16 %v4657_v36, %v4655_v32  ;;  %4670 = vtanh.f32 %v3249_v28  ;;  %v4152_v28 = vld [vmem:[%s5950_s18 + $0x270] sm:$0xff]   ;;  %v3333_v33 = vunpack.c.l.bf16 %v4144_v19 }
  0xd7   : > { %v4661_v42 = vpop.eup %4660  ;;  %4672 = vtanh.f32 %v3250_v30  ;;  %v2269_v30 = vpack.c.bf16 %v2236_v12, %v2236_v12 }
  0xd8   : > { %v4663_v45 = vpop.eup %4662  ;;  %2379 = vmatpush.bf16.msrb.mxu2 %v2025_v40  ;;  %v2033_v46 = vpack.c.bf16 %v4661_v42, %v4659_v39  ;;  %4674 = vtanh.f32 %v3281_v34  ;;  %v2721_v34 = vadd.f32 %v2720_v25, %v2238_v29  ;;  %v2270_v39 = vpack.c.bf16 %v2237_v20, %v2237_v20  ;;  %v6058_v40 = vld [vmem:[%s5943_s19 + $0x40] sm:$0xff] }
  0xd9   : > { %v4665_v48 = vpop.eup %4664  ;;  %4676 = vtanh.f32 %v3282_v37  ;;  %v3334_v37 = vunpack.c.h.bf16 %v4144_v19  ;;  %v4150_v19 = vld [vmem:[%s5950_s18 + $0x260] sm:$0xff]  }
  0xda   : > { %v4667_v51 = vpop.eup %4666  ;;  %2392 = vmatpush.bf16.msrb.mxu3 %v2033_v46  ;;  %v2008_v52 = vpack.c.bf16 %v4665_v48, %v4663_v45  ;;  %4678 = vtanh.f32 %v3181_v41  ;;  %v6061_v44 = vadd.f32 %v2721_v34, %v6058_v40  ;;  %v3366_v46 = vunpack.c.h.bf16 %v4152_v28  ;;  %v4158_v25 = vld [vmem:[%s5950_s18 + $0x2a0] sm:$0xff]  }
  0xdb   : > { %v4669_v55 = vpop.eup %4668  ;;  %4680 = vtanh.f32 %v3182_v43  ;;  %v3365_v43 = vunpack.c.l.bf16 %v4152_v28  ;;  %v2271_v48 = vpack.c.bf16 %v2238_v29, %v2238_v29  ;;  %v3357_v28 = vunpack.c.l.bf16 %v4150_v19 }
  0xdc   : > { %v4671_v59 = vpop.eup %4670  ;;  %2354 = vmatpush.bf16.msrb.mxu0 %v2008_v52  ;;  %v2016_v60 = vpack.c.bf16 %v4669_v55, %v4667_v51  ;;  %4682 = vtanh.f32 %v3213_v47  ;;  %v4168_v47 = vld [vmem:[%s5950_s18 + $0x2f0] sm:$0xff]   ;;  %v3397_v51 = vunpack.c.l.bf16 %v4160_v38  ;;  %v3389_v34 = vunpack.c.l.bf16 %v4158_v25 }
  0xdd   : > { %v4673_v62 = vpop.eup %4672  ;;  %4684 = vtanh.f32 %v3214_v49  ;;  %v3429_v57 = vunpack.c.l.bf16 %v4168_v47 }
  0xde   : > { %v4675_v1 = vpop.eup %4674  ;;  %2367 = vmatpush.bf16.msrb.mxu1 %v2016_v60  ;;  %v2024_v2 = vpack.c.bf16 %v4673_v62, %v4671_v59  ;;  %4686 = vtanh.f32 %v3245_v53  ;;  %v3398_v53 = vunpack.c.h.bf16 %v4160_v38  ;;  %v3430_v59 = vunpack.c.h.bf16 %v4168_v47  ;;  %v4151_v60 = vld [vmem:[%s5950_s18 + $0x268] sm:$0xff]   ;;  %v4141_v38 = vld [vmem:[%s5950_s18 + $0x218] sm:$0xff]  }
  0xdf   : > { %v4677_v4 = vpop.eup %4676  ;;  %4688 = vtanh.f32 %v3246_v56 }
  0xe0   : > { %v4679_v6 = vpop.eup %4678  ;;  %2380 = vmatpush.bf16.msrb.mxu2 %v2024_v2  ;;  %v2032_v7 = vpack.c.bf16 %v4677_v4, %v4675_v1  ;;  %4690 = vtanh.f32 %v3277_v61  ;;  %v3330_v1 = vunpack.c.h.bf16 %v4143_v54  ;;  %v4159_v2 = vld [vmem:[%s5950_s18 + $0x2a8] sm:$0xff]  }
  0xe1   : > { %v4681_v9 = vpop.eup %4680  ;;  %4692 = vtanh.f32 %v3278_v63  ;;  %v3329_v63 = vunpack.c.l.bf16 %v4143_v54  ;;  %v3394_v12 = vunpack.c.h.bf16 %v4159_v2 }
  0xe2   : > { %v4683_v13 = vpop.eup %4682  ;;  %2393 = vmatpush.bf16.msrb.mxu3 %v2032_v7  ;;  %v2007_v14 = vpack.c.bf16 %v4681_v9, %v4679_v6  ;;  %4694 = vtanh.f32 %v3337_v3  ;;  %v3362_v6 = vunpack.c.h.bf16 %v4151_v60  ;;  %v4167_v7 = vld [vmem:[%s5950_s18 + $0x2e8] sm:$0xff]  }
  0xe3   : > { %v4685_v17 = vpop.eup %4684  ;;  %4696 = vtanh.f32 %v3338_v35  ;;  %v3361_v35 = vunpack.c.l.bf16 %v4151_v60  ;;  %v3425_v16 = vunpack.c.l.bf16 %v4167_v7 }
  0xe4   : > { %v4687_v22 = vpop.eup %4686  ;;  %2355 = vmatpush.bf16.msrb.mxu0 %v2007_v14  ;;  %v2015_v23 = vpack.c.bf16 %v4685_v17, %v4683_v13  ;;  %4698 = vtanh.f32 %v3369_v8  ;;  %v4142_v13 = vld [vmem:[%s5950_s18 + $0x220] sm:$0xff]  }
  0xe5   : > { %v4689_v26 = vpop.eup %4688  ;;  %4700 = vtanh.f32 %v3370_v10  ;;  %v3393_v10 = vunpack.c.l.bf16 %v4159_v2 }
  0xe6   : > { %v4691_v31 = vpop.eup %4690  ;;  %2368 = vmatpush.bf16.msrb.mxu1 %v2015_v23  ;;  %v2023_v32 = vpack.c.bf16 %v4689_v26, %v4687_v22  ;;  %4702 = vtanh.f32 %v3401_v15  ;;  %v3325_v22 = vunpack.c.l.bf16 %v4142_v13 }
  0xe7   : > { %v4693_v36 = vpop.eup %4692  ;;  %4704 = vtanh.f32 %v3402_v18  ;;  %2356 = vmatmul.bf16.vlgmr.msrb.gmra.mxu0 %v2268_v21  ;;  %v3426_v18 = vunpack.c.h.bf16 %v4167_v7 }
  0xe8   : > { %v4695_v41 = vpop.eup %4694  ;;  %2381 = vmatpush.bf16.msrb.mxu2 %v2023_v32  ;;  %v2031_v42 = vpack.c.bf16 %v4693_v36, %v4691_v31  ;;  %4706 = vtanh.f32 %v3433_v24  ;;  %v3326_v24 = vunpack.c.h.bf16 %v4142_v13  ;;  %v4166_v31 = vld [vmem:[%s5950_s18 + $0x2e0] sm:$0xff]  }
  0xe9   : > { %v4697_v45 = vpop.eup %4696  ;;  %4708 = vtanh.f32 %v3434_v27  ;;  %2369 = vmatmul.bf16.vlgmr.msrb.gmra.mxu1 %v2269_v30  ;;  %v3358_v30 = vunpack.c.h.bf16 %v4150_v19 }
  0xea   : > { %v4699_v49 = vpop.eup %4698  ;;  %2394 = vmatpush.bf16.msrb.mxu3 %v2031_v42  ;;  %v2046_v50 = vpack.c.bf16 %v4697_v45, %v4695_v41  ;;  %4710 = vtanh.f32 %v3333_v33  ;;  %v3421_v42 = vunpack.c.l.bf16 %v4166_v31  ;;  %v3422_v45 = vunpack.c.h.bf16 %v4166_v31 }
  0xeb   : > { %v4701_v52 = vpop.eup %4700  ;;  %4712 = vtanh.f32 %v3334_v37  ;;  %2382 = vmatmul.bf16.vlgmr.msrb.gmra.mxu2 %v2270_v39  ;;  %v3390_v37 = vunpack.c.h.bf16 %v4158_v25 }
  0xec   : > { %v4703_v55 = vpop.eup %4702  ;;  %2400 = vmatpush.bf16.msra.mxu0 %v2046_v50  ;;  %v2054_v56 = vpack.c.bf16 %v4701_v52, %v4699_v49  ;;  %4714 = vtanh.f32 %v3365_v43  ;;  %v3321_v49 = vunpack.c.l.bf16 %v4141_v38  ;;  %v4157_v52 = vld [vmem:[%s5950_s18 + $0x298] sm:$0xff]  }
  0xed   : > { %v4705_v58 = vpop.eup %4704  ;;  %4716 = vtanh.f32 %v3366_v46  ;;  %2395 = vmatmul.bf16.vlgmr.msrb.gmra.mxu3 %v2271_v48  ;;  %v4149_v46 = vld [vmem:[%s5950_s18 + $0x258] sm:$0xff]  }
  0xee   : > { %v4707_v61 = vpop.eup %4706  ;;  %2413 = vmatpush.bf16.msra.mxu1 %v2054_v56  ;;  %v2062_v62 = vpack.c.bf16 %v4705_v58, %v4703_v55  ;;  %4718 = vtanh.f32 %v3397_v51  ;;  %v3322_v51 = vunpack.c.h.bf16 %v4141_v38  ;;  %v3353_v55 = vunpack.c.l.bf16 %v4149_v46  ;;  %v4165_v58 = vld [vmem:[%s5950_s18 + $0x2d8] sm:$0xff]  }
  0xef   : > { %v4709_v0 = vpop.eup %4708  ;;  %4720 = vtanh.f32 %v3398_v53 }
  0xf0   : > { %v4711_v3 = vpop.eup %4710  ;;  %2426 = vmatpush.bf16.msra.mxu2 %v2062_v62  ;;  %v2070_v4 = vpack.c.bf16 %v4709_v0, %v4707_v61  ;;  %4722 = vtanh.f32 %v3429_v57  ;;  %v3354_v57 = vunpack.c.h.bf16 %v4149_v46  ;;  %v3385_v61 = vunpack.c.l.bf16 %v4157_v52  ;;  %v4140_v0 = vld [vmem:[%s5950_s18 + $0x210] sm:$0xff]  }
  0xf1   : > { %v4713_v5 = vpop.eup %4712  ;;  %4724 = vtanh.f32 %v3430_v59 }
  0xf2   : > { %v4715_v8 = vpop.eup %4714  ;;  %2439 = vmatpush.bf16.msra.mxu3 %v2070_v4  ;;  %v2045_v9 = vpack.c.bf16 %v4713_v5, %v4711_v3  ;;  %4726 = vtanh.f32 %v3329_v63  ;;  %v3386_v63 = vunpack.c.h.bf16 %v4157_v52  ;;  %v3417_v3 = vunpack.c.l.bf16 %v4165_v58  ;;  %v4148_v5 = vld [vmem:[%s5950_s18 + $0x250] sm:$0xff]  }
  0xf3   : > { %v4717_v11 = vpop.eup %4716  ;;  %4728 = vtanh.f32 %v3330_v1 }
  0xf4   : > { %v4719_v14 = vpop.eup %4718  ;;  %2401 = vmatpush.bf16.msra.mxu0 %v2045_v9  ;;  %v2053_v15 = vpack.c.bf16 %v4717_v11, %v4715_v8  ;;  %4730 = vtanh.f32 %v3361_v35  ;;  %v3418_v35 = vunpack.c.h.bf16 %v4165_v58  ;;  %v3317_v8 = vunpack.c.l.bf16 %v4140_v0  ;;  %v4156_v11 = vld [vmem:[%s5950_s18 + $0x290] sm:$0xff]  }
  0xf5   : > { %v4721_v17 = vpop.eup %4720  ;;  %4732 = vtanh.f32 %v3362_v6 }
  0xf6   : > { %v4723_v20 = vpop.eup %4722  ;;  %2414 = vmatpush.bf16.msra.mxu1 %v2053_v15  ;;  %v2061_v21 = vpack.c.bf16 %v4721_v17, %v4719_v14  ;;  %4734 = vtanh.f32 %v3393_v10  ;;  %v3318_v10 = vunpack.c.h.bf16 %v4140_v0  ;;  %v3349_v14 = vunpack.c.l.bf16 %v4148_v5  ;;  %v4164_v17 = vld [vmem:[%s5950_s18 + $0x2d0] sm:$0xff]  }
  0xf7   : > { %v4725_v23 = vpop.eup %4724  ;;  %4736 = vtanh.f32 %v3394_v12 }
  0xf8   : > { %v4727_v26 = vpop.eup %4726  ;;  %2427 = vmatpush.bf16.msra.mxu2 %v2061_v21  ;;  %v2069_v27 = vpack.c.bf16 %v4725_v23, %v4723_v20  ;;  %4738 = vtanh.f32 %v3425_v16  ;;  %v3350_v16 = vunpack.c.h.bf16 %v4148_v5  ;;  %v3381_v20 = vunpack.c.l.bf16 %v4156_v11  ;;  %v4139_v23 = vld [vmem:[%s5950_s18 + $0x208] sm:$0xff]  }
  0xf9   : > { %v4729_v29 = vpop.eup %4728  ;;  %4740 = vtanh.f32 %v3426_v18 }
  0xfa   : > { %v4731_v32 = vpop.eup %4730  ;;  %2440 = vmatpush.bf16.msra.mxu3 %v2069_v27  ;;  %v2044_v33 = vpack.c.bf16 %v4729_v29, %v4727_v26  ;;  %4742 = vtanh.f32 %v3325_v22  ;;  %v3382_v22 = vunpack.c.h.bf16 %v4156_v11  ;;  %v3413_v26 = vunpack.c.l.bf16 %v4164_v17  ;;  %v4147_v29 = vld [vmem:[%s5950_s18 + $0x248] sm:$0xff]  }
  0xfb   : > { %v4733_v36 = vpop.eup %4732  ;;  %4744 = vtanh.f32 %v3326_v24 }
  0xfc   : > { %v4735_v39 = vpop.eup %4734  ;;  %2402 = vmatpush.bf16.msra.mxu0 %v2044_v33  ;;  %v2052_v41 = vpack.c.bf16 %v4733_v36, %v4731_v32  ;;  %4746 = vtanh.f32 %v3357_v28  ;;  %v3414_v28 = vunpack.c.h.bf16 %v4164_v17  ;;  %v3313_v32 = vunpack.c.l.bf16 %v4139_v23  ;;  %v4155_v36 = vld [vmem:[%s5950_s18 + $0x288] sm:$0xff]  }
  0xfd   : > { %v4737_v43 = vpop.eup %4736  ;;  %4748 = vtanh.f32 %v3358_v30 }
  0xfe   : > { %v4739_v47 = vpop.eup %4738  ;;  %2415 = vmatpush.bf16.msra.mxu1 %v2052_v41  ;;  %v2060_v48 = vpack.c.bf16 %v4737_v43, %v4735_v39  ;;  %4750 = vtanh.f32 %v3389_v34  ;;  %v3314_v34 = vunpack.c.h.bf16 %v4139_v23  ;;  %v3345_v39 = vunpack.c.l.bf16 %v4147_v29  ;;  %v4163_v43 = vld [vmem:[%s5950_s18 + $0x2c8] sm:$0xff]  }
  0xff   : > { %v4741_v50 = vpop.eup %4740  ;;  %4752 = vtanh.f32 %v3390_v37  ;;  %v3410_v58 = vunpack.c.h.bf16 %v4163_v43 }
 0x100   : > { %v4743_v53 = vpop.eup %4742  ;;  %2428 = vmatpush.bf16.msra.mxu2 %v2060_v48  ;;  %v2068_v54 = vpack.c.bf16 %v4741_v50, %v4739_v47  ;;  %4754 = vtanh.f32 %v3421_v42  ;;  %v3346_v42 = vunpack.c.h.bf16 %v4147_v29  ;;  %v3377_v47 = vunpack.c.l.bf16 %v4155_v36  ;;  %v6085_v48 = vld [vmem:[%s5943_s19 + $0x48] sm:$0xff] }
 0x101   : > { %v4745_v56 = vpop.eup %4744  ;;  %4756 = vtanh.f32 %v3422_v45  ;;  %v3378_v50 = vunpack.c.h.bf16 %v4155_v36  ;;  %v2723_v52 = vadd.f32 %v6061_v44, %v6085_v48 }
 0x102   : > { %v4747_v59 = vpop.eup %4746  ;;  %2441 = vmatpush.bf16.msra.mxu3 %v2068_v54  ;;  %v2043_v60 = vpack.c.bf16 %v4745_v56, %v4743_v53  ;;  %4758 = vtanh.f32 %v3321_v49  ;;  %v6091_v56 = vld [vmem:[%s5943_s19 + $0x50] sm:$0xff] }
 0x103   : > { %v4749_v62 = vpop.eup %4748  ;;  %4760 = vtanh.f32 %v3322_v51  ;;  %v4138_v51 = vld [vmem:[%s5950_s18 + $0x200] sm:$0xff]  }
 0x104   : > { %v4751_v1 = vpop.eup %4750  ;;  %2403 = vmatpush.bf16.msra.mxu0 %v2043_v60  ;;  %v2051_v2 = vpack.c.bf16 %v4749_v62, %v4747_v59  ;;  %4762 = vtanh.f32 %v3353_v55  ;;  %v3409_v55 = vunpack.c.l.bf16 %v4163_v43  ;;  %v4146_v59 = vld [vmem:[%s5950_s18 + $0x240] sm:$0xff]   ;;  %v2724_v60 = vadd.f32 %v2723_v52, %v6091_v56 }
 0x105   : > { %v4753_v4 = vpop.eup %4752  ;;  %4764 = vtanh.f32 %v3354_v57  ;;  %v3309_v44 = vunpack.c.l.bf16 %v4138_v51  ;;  %v3341_v5 = vunpack.c.l.bf16 %v4146_v59 }
 0x106   : > { %v4755_v6 = vpop.eup %4754  ;;  %2416 = vmatpush.bf16.msra.mxu1 %v2051_v2  ;;  %v2059_v7 = vpack.c.bf16 %v4753_v4, %v4751_v1  ;;  %4766 = vtanh.f32 %v3385_v61  ;;  %v3310_v1 = vunpack.c.h.bf16 %v4138_v51  ;;  %v4154_v2 = vld [vmem:[%s5950_s18 + $0x280] sm:$0xff]  }
 0x107   : > { %v4757_v9 = vpop.eup %4756  ;;  %4768 = vtanh.f32 %v3386_v63  ;;  %v6096_v63 = vld [vmem:[%s5943_s19 + $0x58] sm:$0xff]  ;;  %v3373_v11 = vunpack.c.l.bf16 %v4154_v2 }
 0x108   : > { %v4759_v12 = vpop.eup %4758  ;;  %2429 = vmatpush.bf16.msra.mxu2 %v2059_v7  ;;  %v2067_v13 = vpack.c.bf16 %v4757_v9, %v4755_v6  ;;  %4770 = vtanh.f32 %v3417_v3  ;;  %v6100_v3 = vadd.f32 %v2724_v60, %v6096_v63  ;;  %v3342_v7 = vunpack.c.h.bf16 %v4146_v59 }
 0x109   : > { %v4761_v15 = vpop.eup %4760  ;;  %4772 = vtanh.f32 %v3418_v35 }
 0x10a   : > { %v4763_v18 = vpop.eup %4762  ;;  %2442 = vmatpush.bf16.msra.mxu3 %v2067_v13  ;;  %v2042_v19 = vpack.c.bf16 %v4761_v15, %v4759_v12  ;;  %4774 = vtanh.f32 %v3317_v8  ;;  %v4162_v8 = vld [vmem:[%s5950_s18 + $0x2c0] sm:$0xff]   ;;  %v3374_v13 = vunpack.c.h.bf16 %v4154_v2 }
 0x10b   : > { %v4765_v21 = vpop.eup %4764  ;;  %4776 = vtanh.f32 %v3318_v10  ;;  %v3405_v17 = vunpack.c.l.bf16 %v4162_v8 }
 0x10c   : > { %v4767_v24 = vpop.eup %4766  ;;  %2404 = vmatpush.bf16.msra.mxu0 %v2042_v19  ;;  %v2050_v25 = vpack.c.bf16 %v4765_v21, %v4763_v18  ;;  %4778 = vtanh.f32 %v3349_v14  ;;  %v4177_v14 = vld [vmem:[%s5950_s18 + $0x338] sm:$0xff]   ;;  %v3406_v19 = vunpack.c.h.bf16 %v4162_v8 }
 0x10d   : > { %v4769_v27 = vpop.eup %4768  ;;  %4780 = vtanh.f32 %v3350_v16  ;;  %v3465_v23 = vunpack.c.l.bf16 %v4177_v14 }
 0x10e   : > { %v4771_v30 = vpop.eup %4770  ;;  %2417 = vmatpush.bf16.msra.mxu1 %v2050_v25  ;;  %v2058_v31 = vpack.c.bf16 %v4769_v27, %v4767_v24  ;;  %4782 = vtanh.f32 %v3381_v20  ;;  %v4185_v20 = vld [vmem:[%s5950_s18 + $0x378] sm:$0xff]   ;;  %v3466_v25 = vunpack.c.h.bf16 %v4177_v14 }
 0x10f   : > { %v4773_v33 = vpop.eup %4772  ;;  %4784 = vtanh.f32 %v3382_v22  ;;  %v3497_v29 = vunpack.c.l.bf16 %v4185_v20 }
 0x110   : > { %v4775_v37 = vpop.eup %4774  ;;  %2430 = vmatpush.bf16.msra.mxu2 %v2058_v31  ;;  %v2066_v38 = vpack.c.bf16 %v4773_v33, %v4771_v30  ;;  %4786 = vtanh.f32 %v3413_v26  ;;  %v4193_v26 = vld [vmem:[%s5950_s18 + $0x3b8] sm:$0xff]   ;;  %v3498_v31 = vunpack.c.h.bf16 %v4185_v20 }
 0x111   : > { %v4777_v41 = vpop.eup %4776  ;;  %4788 = vtanh.f32 %v3414_v28  ;;  %v3529_v36 = vunpack.c.l.bf16 %v4193_v26 }
 0x112   : > { %v4779_v45 = vpop.eup %4778  ;;  %2443 = vmatpush.bf16.msra.mxu3 %v2066_v38  ;;  %v2041_v46 = vpack.c.bf16 %v4777_v41, %v4775_v37  ;;  %4790 = vtanh.f32 %v3313_v32  ;;  %v4201_v32 = vld [vmem:[%s5950_s18 + $0x3f8] sm:$0xff]   ;;  %v3530_v38 = vunpack.c.h.bf16 %v4193_v26  ;;  %v4176_v41 = vld [vmem:[%s5950_s18 + $0x330] sm:$0xff]  }
 0x113   : > { %v4781_v49 = vpop.eup %4780  ;;  %4792 = vtanh.f32 %v3314_v34 }
 0x114   : > { %v4783_v53 = vpop.eup %4782  ;;  %2405 = vmatpush.bf16.msra.mxu0 %v2041_v46  ;;  %v2049_v54 = vpack.c.bf16 %v4781_v49, %v4779_v45  ;;  %4794 = vtanh.f32 %v3345_v39  ;;  %v2272_v39 = vpack.c.bf16 %v6058_v40, %v6058_v40  ;;  %v3561_v45 = vunpack.c.l.bf16 %v4201_v32 }
 0x115   : > { %v4785_v57 = vpop.eup %4784  ;;  %4796 = vtanh.f32 %v3346_v42  ;;  %v2273_v49 = vpack.c.bf16 %v6085_v48, %v6085_v48 }
 0x116   : > { %v4787_v61 = vpop.eup %4786  ;;  %2418 = vmatpush.bf16.msra.mxu1 %v2049_v54  ;;  %v2057_v62 = vpack.c.bf16 %v4785_v57, %v4783_v53  ;;  %4798 = vtanh.f32 %v3377_v47  ;;  %v3562_v47 = vunpack.c.h.bf16 %v4201_v32  ;;  %v3461_v53 = vunpack.c.l.bf16 %v4176_v41  ;;  %v4192_v57 = vld [vmem:[%s5950_s18 + $0x3b0] sm:$0xff]  }
 0x117   : > { %v4789_v0 = vpop.eup %4788  ;;  %4800 = vtanh.f32 %v3378_v50  ;;  %v4184_v50 = vld [vmem:[%s5950_s18 + $0x370] sm:$0xff]   ;;  %v2274_v54 = vpack.c.bf16 %v6091_v56, %v6091_v56  ;;  %v3525_v56 = vunpack.c.l.bf16 %v4192_v57 }
 0x118   : > { %v4791_v4 = vpop.eup %4790  ;;  %2431 = vmatpush.bf16.msra.mxu2 %v2057_v62  ;;  %v2065_v35 = vpack.c.bf16 %v4789_v0, %v4787_v61  ;;  %4802 = vtanh.f32 %v3409_v55  ;;  %v3462_v55 = vunpack.c.h.bf16 %v4176_v41  ;;  %v3493_v48 = vunpack.c.l.bf16 %v4184_v50  ;;  %v4190_v41 = vld [vmem:[%s5950_s18 + $0x3a0] sm:$0xff]  }
 0x119   : > { %v4793_v6 = vpop.eup %4792  ;;  %4804 = vtanh.f32 %v3410_v58  ;;  %v2275_v61 = vpack.c.bf16 %v6096_v63, %v6096_v63  ;;  %v3494_v62 = vunpack.c.h.bf16 %v4184_v50 }
 0x11a   : > { %v4795_v9 = vpop.eup %4794  ;;  %2444 = vmatpush.bf16.msra.mxu3 %v2065_v35  ;;  %v2040_v10 = vpack.c.bf16 %v4793_v6, %v4791_v4  ;;  %4806 = vtanh.f32 %v3309_v44  ;;  %v4200_v44 = vld [vmem:[%s5950_s18 + $0x3f0] sm:$0xff]   ;;  %v3526_v4 = vunpack.c.h.bf16 %v4192_v57  ;;  %v4175_v35 = vld [vmem:[%s5950_s18 + $0x328] sm:$0xff]  }
 0x11b   : > { %v4797_v12 = vpop.eup %4796  ;;  %4808 = vtanh.f32 %v3310_v1  ;;  %v3558_v8 = vunpack.c.h.bf16 %v4200_v44  ;;  %v3458_v14 = vunpack.c.h.bf16 %v4175_v35 }
 0x11c   : > { %v4799_v15 = vpop.eup %4798  ;;  %2406 = vmatpush.bf16.msra.mxu0 %v2040_v10  ;;  %v2048_v16 = vpack.c.bf16 %v4797_v12, %v4795_v9  ;;  %4810 = vtanh.f32 %v3341_v5  ;;  %v4183_v9 = vld [vmem:[%s5950_s18 + $0x368] sm:$0xff]   ;;  %v3457_v12 = vunpack.c.l.bf16 %v4175_v35 }
 0x11d   : > { %v4801_v18 = vpop.eup %4800  ;;  %4812 = vtanh.f32 %v3342_v7  ;;  %v3557_v7 = vunpack.c.l.bf16 %v4200_v44  ;;  %v3490_v20 = vunpack.c.h.bf16 %v4183_v9 }
 0x11e   : > { %v4803_v21 = vpop.eup %4802  ;;  %2419 = vmatpush.bf16.msra.mxu1 %v2048_v16  ;;  %v2056_v22 = vpack.c.bf16 %v4801_v18, %v4799_v15  ;;  %4814 = vtanh.f32 %v3373_v11  ;;  %v4191_v15 = vld [vmem:[%s5950_s18 + $0x3a8] sm:$0xff]   ;;  %v3489_v18 = vunpack.c.l.bf16 %v4183_v9 }
 0x11f   : > { %v4805_v24 = vpop.eup %4804  ;;  %4816 = vtanh.f32 %v3374_v13  ;;  %v3522_v26 = vunpack.c.h.bf16 %v4191_v15 }
 0x120   : > { %v4807_v27 = vpop.eup %4806  ;;  %2432 = vmatpush.bf16.msra.mxu2 %v2056_v22  ;;  %v2064_v28 = vpack.c.bf16 %v4805_v24, %v4803_v21  ;;  %4818 = vtanh.f32 %v3405_v17  ;;  %v4199_v21 = vld [vmem:[%s5950_s18 + $0x3e8] sm:$0xff]   ;;  %v3521_v24 = vunpack.c.l.bf16 %v4191_v15 }
 0x121   : > { %v4809_v30 = vpop.eup %4808  ;;  %4820 = vtanh.f32 %v3406_v19  ;;  %v3554_v32 = vunpack.c.h.bf16 %v4199_v21 }
 0x122   : > { %v4811_v33 = vpop.eup %4810  ;;  %2445 = vmatpush.bf16.msra.mxu3 %v2064_v28  ;;  %v2039_v34 = vpack.c.bf16 %v4809_v30, %v4807_v27  ;;  %4822 = vtanh.f32 %v3465_v23  ;;  %v4174_v27 = vld [vmem:[%s5950_s18 + $0x320] sm:$0xff]   ;;  %v3553_v30 = vunpack.c.l.bf16 %v4199_v21 }
 0x123   : > { %v4813_v37 = vpop.eup %4812  ;;  %4824 = vtanh.f32 %v3466_v25 }
 0x124   : > { %v4815_v42 = vpop.eup %4814  ;;  %2407 = vmatpush.bf16.msra.mxu0 %v2039_v34  ;;  %v2047_v43 = vpack.c.bf16 %v4813_v37, %v4811_v33  ;;  %4826 = vtanh.f32 %v3497_v29  ;;  %v4182_v33 = vld [vmem:[%s5950_s18 + $0x360] sm:$0xff]   ;;  %v3453_v37 = vunpack.c.l.bf16 %v4174_v27 }
 0x125   : > { %v4817_v46 = vpop.eup %4816  ;;  %4828 = vtanh.f32 %v3498_v31 }
 0x126   : > { %v4819_v51 = vpop.eup %4818  ;;  %2420 = vmatpush.bf16.msra.mxu1 %v2047_v43  ;;  %v2055_v52 = vpack.c.bf16 %v4817_v46, %v4815_v42  ;;  %4830 = vtanh.f32 %v3529_v36 }
 0x127   : > { %v4821_v40 = vpop.eup %4820  ;;  %4832 = vtanh.f32 %v3530_v38  ;;  %2408 = vmatmul.bf16.vlgmr.msra.gmra.mxu0 %v2272_v39  ;;  %v3454_v39 = vunpack.c.h.bf16 %v4174_v27 }
 0x128   : > { %v4823_v58 = vpop.eup %4822  ;;  %2433 = vmatpush.bf16.msra.mxu2 %v2055_v52  ;;  %v2063_v59 = vpack.c.bf16 %v4821_v40, %v4819_v51  ;;  %4834 = vtanh.f32 %v3561_v45  ;;  %v3485_v45 = vunpack.c.l.bf16 %v4182_v33  ;;  %v3517_v52 = vunpack.c.l.bf16 %v4190_v41 }
 0x129   : > { %v4825_v60 = vpop.eup %4824  ;;  %4836 = vtanh.f32 %v3562_v47  ;;  %2421 = vmatmul.bf16.vlgmr.msra.gmra.mxu1 %v2273_v49  ;;  %v3486_v47 = vunpack.c.h.bf16 %v4182_v33  ;;  %v4198_v49 = vld [vmem:[%s5950_s18 + $0x3e0] sm:$0xff]   ;;  %v3518_v40 = vunpack.c.h.bf16 %v4190_v41 }
 0x12a   : > { %v4827_v0 = vpop.eup %4826  ;;  %2446 = vmatpush.bf16.msra.mxu3 %v2063_v59  ;;  %v2078_v1 = vpack.c.bf16 %v4825_v60, %v4823_v58  ;;  %4838 = vtanh.f32 %v3461_v53  ;;  %v3549_v58 = vunpack.c.l.bf16 %v4198_v49  ;;  %v4181_v60 = vld [vmem:[%s5950_s18 + $0x358] sm:$0xff]  }
 0x12b   : > { %v4829_v2 = vpop.eup %4828  ;;  %2434 = vmatmul.bf16.vlgmr.msra.gmra.mxu2 %v2274_v54  ;;  %4840 = vtanh.f32 %v3462_v55  ;;  %v4173_v54 = vld [vmem:[%s5950_s18 + $0x318] sm:$0xff]   ;;  %v3481_v35 = vunpack.c.l.bf16 %v4181_v60 }
 0x12c   : > { %v4831_v5 = vpop.eup %4830  ;;  %2452 = vmatpush.bf16.msrb.mxu0 %v2078_v1  ;;  %v2086_v6 = vpack.c.bf16 %v4829_v2, %v4827_v0  ;;  %4842 = vtanh.f32 %v3493_v48  ;;  %v3550_v48 = vunpack.c.h.bf16 %v4198_v49  ;;  %v3449_v44 = vunpack.c.l.bf16 %v4173_v54 }
 0x12d   : > { %v4833_v63 = vpop.eup %4832  ;;  %2447 = vmatmul.bf16.vlgmr.msra.gmra.mxu3 %v2275_v61  ;;  %4844 = vtanh.f32 %v3494_v62  ;;  %v3450_v1 = vunpack.c.h.bf16 %v4173_v54 }
 0x12e   : > { %v4835_v10 = vpop.eup %4834  ;;  %2465 = vmatpush.bf16.msrb.mxu1 %v2086_v6  ;;  %v2094_v11 = vpack.c.bf16 %v4833_v63, %v4831_v5  ;;  %4846 = vtanh.f32 %v3525_v56  ;;  %v4189_v56 = vld [vmem:[%s5950_s18 + $0x398] sm:$0xff]   ;;  %v3482_v6 = vunpack.c.h.bf16 %v4181_v60 }
 0x12f   : > { %v4837_v13 = vpop.eup %4836  ;;  %4848 = vtanh.f32 %v3526_v4  ;;  %v3513_v9 = vunpack.c.l.bf16 %v4189_v56 }
 0x130   : > { %v4839_v16 = vpop.eup %4838  ;;  %2478 = vmatpush.bf16.msrb.mxu2 %v2094_v11  ;;  %v2102_v17 = vpack.c.bf16 %v4837_v13, %v4835_v10  ;;  %4850 = vtanh.f32 %v3557_v7  ;;  %v4197_v7 = vld [vmem:[%s5950_s18 + $0x3d8] sm:$0xff]   ;;  %v3514_v11 = vunpack.c.h.bf16 %v4189_v56  ;;  %v6146_v56 = vld [vmem:[%s5943_s19 + $0x68] sm:$0xff] }
 0x131   : > { %v4841_v19 = vpop.eup %4840  ;;  %4852 = vtanh.f32 %v3558_v8  ;;  %v3545_v15 = vunpack.c.l.bf16 %v4197_v7 }
 0x132   : > { %v4843_v22 = vpop.eup %4842  ;;  %2491 = vmatpush.bf16.msrb.mxu3 %v2102_v17  ;;  %v2077_v23 = vpack.c.bf16 %v4841_v19, %v4839_v16  ;;  %4854 = vtanh.f32 %v3457_v12  ;;  %v4172_v12 = vld [vmem:[%s5950_s18 + $0x310] sm:$0xff]   ;;  %v3546_v17 = vunpack.c.h.bf16 %v4197_v7 }
 0x133   : > { %v4845_v25 = vpop.eup %4844  ;;  %4856 = vtanh.f32 %v3458_v14  ;;  %v3445_v21 = vunpack.c.l.bf16 %v4172_v12 }
 0x134   : > { %v4847_v28 = vpop.eup %4846  ;;  %2453 = vmatpush.bf16.msrb.mxu0 %v2077_v23  ;;  %v2085_v29 = vpack.c.bf16 %v4845_v25, %v4843_v22  ;;  %4858 = vtanh.f32 %v3489_v18  ;;  %v4180_v18 = vld [vmem:[%s5950_s18 + $0x350] sm:$0xff]   ;;  %v3446_v23 = vunpack.c.h.bf16 %v4172_v12 }
 0x135   : > { %v4849_v31 = vpop.eup %4848  ;;  %4860 = vtanh.f32 %v3490_v20  ;;  %v3477_v27 = vunpack.c.l.bf16 %v4180_v18 }
 0x136   : > { %v4851_v34 = vpop.eup %4850  ;;  %2466 = vmatpush.bf16.msrb.mxu1 %v2085_v29  ;;  %v2093_v36 = vpack.c.bf16 %v4849_v31, %v4847_v28  ;;  %4862 = vtanh.f32 %v3521_v24  ;;  %v4188_v24 = vld [vmem:[%s5950_s18 + $0x390] sm:$0xff]   ;;  %v3478_v29 = vunpack.c.h.bf16 %v4180_v18 }
 0x137   : > { %v4853_v38 = vpop.eup %4852  ;;  %4864 = vtanh.f32 %v3522_v26  ;;  %v3509_v33 = vunpack.c.l.bf16 %v4188_v24 }
 0x138   : > { %v4855_v42 = vpop.eup %4854  ;;  %2479 = vmatpush.bf16.msrb.mxu2 %v2093_v36  ;;  %v2101_v43 = vpack.c.bf16 %v4853_v38, %v4851_v34  ;;  %4866 = vtanh.f32 %v3553_v30  ;;  %v4196_v30 = vld [vmem:[%s5950_s18 + $0x3d0] sm:$0xff]   ;;  %v3510_v36 = vunpack.c.h.bf16 %v4188_v24 }
 0x139   : > { %v4857_v46 = vpop.eup %4856  ;;  %4868 = vtanh.f32 %v3554_v32  ;;  %v3541_v41 = vunpack.c.l.bf16 %v4196_v30 }
 0x13a   : > { %v4859_v50 = vpop.eup %4858  ;;  %2492 = vmatpush.bf16.msrb.mxu3 %v2101_v43  ;;  %v2076_v51 = vpack.c.bf16 %v4857_v46, %v4855_v42  ;;  %4870 = vtanh.f32 %v3453_v37  ;;  %v4171_v37 = vld [vmem:[%s5950_s18 + $0x308] sm:$0xff]   ;;  %v3542_v43 = vunpack.c.h.bf16 %v4196_v30 }
 0x13b   : > { %v4861_v53 = vpop.eup %4860  ;;  %4872 = vtanh.f32 %v3454_v39  ;;  %v3441_v49 = vunpack.c.l.bf16 %v4171_v37 }
 0x13c   : > { %v4863_v55 = vpop.eup %4862  ;;  %2454 = vmatpush.bf16.msrb.mxu0 %v2076_v51  ;;  %v2084_v57 = vpack.c.bf16 %v4861_v53, %v4859_v50  ;;  %4874 = vtanh.f32 %v3485_v45  ;;  %v4179_v45 = vld [vmem:[%s5950_s18 + $0x348] sm:$0xff]   ;;  %v3442_v51 = vunpack.c.h.bf16 %v4171_v37 }
 0x13d   : > { %v4865_v59 = vpop.eup %4864  ;;  %4876 = vtanh.f32 %v3486_v47  ;;  %v3473_v54 = vunpack.c.l.bf16 %v4179_v45 }
 0x13e   : > { %v4867_v61 = vpop.eup %4866  ;;  %2467 = vmatpush.bf16.msrb.mxu1 %v2084_v57  ;;  %v2092_v62 = vpack.c.bf16 %v4865_v59, %v4863_v55  ;;  %4878 = vtanh.f32 %v3517_v52  ;;  %v4187_v52 = vld [vmem:[%s5950_s18 + $0x388] sm:$0xff]   ;;  %v3474_v57 = vunpack.c.h.bf16 %v4179_v45  ;;  %v6140_v59 = vld [vmem:[%s5943_s19 + $0x60] sm:$0xff] }
 0x13f   : > { %v4869_v0 = vpop.eup %4868  ;;  %4880 = vtanh.f32 %v3518_v40 }
 0x140   : > { %v4871_v2 = vpop.eup %4870  ;;  %2480 = vmatpush.bf16.msrb.mxu2 %v2092_v62  ;;  %v2100_v4 = vpack.c.bf16 %v4869_v0, %v4867_v61  ;;  %4882 = vtanh.f32 %v3549_v58  ;;  %v4195_v58 = vld [vmem:[%s5950_s18 + $0x3c8] sm:$0xff]   ;;  %v3505_v61 = vunpack.c.l.bf16 %v4187_v52  ;;  %v2726_v62 = vadd.f32 %v6100_v3, %v6140_v59  ;;  %v4178_v3 = vld [vmem:[%s5950_s18 + $0x340] sm:$0xff]  }
 0x141   : > { %v4873_v5 = vpop.eup %4872  ;;  %4884 = vtanh.f32 %v3550_v48  ;;  %v3506_v0 = vunpack.c.h.bf16 %v4187_v52  ;;  %v3538_v7 = vunpack.c.h.bf16 %v4195_v58  ;;  %v3469_v18 = vunpack.c.l.bf16 %v4178_v3 }
 0x142   : > { %v4875_v63 = vpop.eup %4874  ;;  %2493 = vmatpush.bf16.msrb.mxu3 %v2100_v4  ;;  %v2075_v8 = vpack.c.bf16 %v4873_v5, %v4871_v2  ;;  %4886 = vtanh.f32 %v3449_v44  ;;  %v2727_v5 = vadd.f32 %v2726_v62, %v6146_v56 }
 0x143   : > { %v4877_v10 = vpop.eup %4876  ;;  %4888 = vtanh.f32 %v3450_v1  ;;  %v4170_v1 = vld [vmem:[%s5950_s18 + $0x300] sm:$0xff]  }
 0x144   : > { %v4879_v13 = vpop.eup %4878  ;;  %2455 = vmatpush.bf16.msrb.mxu0 %v2075_v8  ;;  %v2083_v14 = vpack.c.bf16 %v4877_v10, %v4875_v63  ;;  %4890 = vtanh.f32 %v3481_v35  ;;  %v3537_v35 = vunpack.c.l.bf16 %v4195_v58  ;;  %v6151_v63 = vld [vmem:[%s5943_s19 + $0x70] sm:$0xff]  ;;  %v3437_v10 = vunpack.c.l.bf16 %v4170_v1 }
 0x145   : > { %v4881_v16 = vpop.eup %4880  ;;  %4892 = vtanh.f32 %v3482_v6 }
 0x146   : > { %v4883_v19 = vpop.eup %4882  ;;  %2468 = vmatpush.bf16.msrb.mxu1 %v2083_v14  ;;  %v2091_v20 = vpack.c.bf16 %v4881_v16, %v4879_v13  ;;  %4894 = vtanh.f32 %v3513_v9  ;;  %v3438_v13 = vunpack.c.h.bf16 %v4170_v1  ;;  %v4186_v14 = vld [vmem:[%s5950_s18 + $0x380] sm:$0xff]  }
 0x147   : > { %v4885_v22 = vpop.eup %4884  ;;  %4896 = vtanh.f32 %v3514_v11  ;;  %v2728_v11 = vadd.f32 %v2727_v5, %v6151_v63 }
 0x148   : > { %v4887_v25 = vpop.eup %4886  ;;  %2481 = vmatpush.bf16.msrb.mxu2 %v2091_v20  ;;  %v2099_v26 = vpack.c.bf16 %v4885_v22, %v4883_v19  ;;  %4898 = vtanh.f32 %v3545_v15  ;;  %v6156_v15 = vld [vmem:[%s5943_s19 + $0x78] sm:$0xff]  ;;  %v4194_v22 = vld [vmem:[%s5950_s18 + $0x3c0] sm:$0xff]  }
 0x149   : > { %v4889_v28 = vpop.eup %4888  ;;  %4900 = vtanh.f32 %v3546_v17  ;;  %v6159_v19 = vadd.f32 %v2728_v11, %v6156_v15  ;;  %v4232_v11 = vld [vmem:[%s5950_s18 + $0x4f0] sm:$0xff]  }
 0x14a   : > { %v4891_v31 = vpop.eup %4890  ;;  %2494 = vmatpush.bf16.msrb.mxu3 %v2099_v26  ;;  %v2074_v32 = vpack.c.bf16 %v4889_v28, %v4887_v25  ;;  %4902 = vtanh.f32 %v3445_v21  ;;  %v3470_v21 = vunpack.c.h.bf16 %v4178_v3  ;;  %v3501_v25 = vunpack.c.l.bf16 %v4186_v14  ;;  %v4209_v28 = vld [vmem:[%s5950_s18 + $0x438] sm:$0xff]  }
 0x14b   : > { %v4893_v34 = vpop.eup %4892  ;;  %4904 = vtanh.f32 %v3446_v23 }
 0x14c   : > { %v4895_v38 = vpop.eup %4894  ;;  %2456 = vmatpush.bf16.msrb.mxu0 %v2074_v32  ;;  %v2082_v39 = vpack.c.bf16 %v4893_v34, %v4891_v31  ;;  %4906 = vtanh.f32 %v3477_v27  ;;  %v3502_v27 = vunpack.c.h.bf16 %v4186_v14  ;;  %v3533_v31 = vunpack.c.l.bf16 %v4194_v22  ;;  %v4217_v34 = vld [vmem:[%s5950_s18 + $0x478] sm:$0xff]  }
 0x14d   : > { %v4897_v42 = vpop.eup %4896  ;;  %4908 = vtanh.f32 %v3478_v29 }
 0x14e   : > { %v4899_v46 = vpop.eup %4898  ;;  %2469 = vmatpush.bf16.msrb.mxu1 %v2082_v39  ;;  %v2090_v47 = vpack.c.bf16 %v4897_v42, %v4895_v38  ;;  %4910 = vtanh.f32 %v3509_v33  ;;  %v3534_v33 = vunpack.c.h.bf16 %v4194_v22  ;;  %v3593_v38 = vunpack.c.l.bf16 %v4209_v28  ;;  %v4225_v42 = vld [vmem:[%s5950_s18 + $0x4b8] sm:$0xff]  }
 0x14f   : > { %v4901_v50 = vpop.eup %4900  ;;  %4912 = vtanh.f32 %v3510_v36  ;;  %v3686_v22 = vunpack.c.h.bf16 %v4232_v11 }
 0x150   : > { %v4903_v53 = vpop.eup %4902  ;;  %2482 = vmatpush.bf16.msrb.mxu2 %v2090_v47  ;;  %v2098_v40 = vpack.c.bf16 %v4901_v50, %v4899_v46  ;;  %4914 = vtanh.f32 %v3541_v41  ;;  %v3594_v41 = vunpack.c.h.bf16 %v4209_v28  ;;  %v3625_v46 = vunpack.c.l.bf16 %v4217_v34  ;;  %v4233_v50 = vld [vmem:[%s5950_s18 + $0x4f8] sm:$0xff]  }
 0x151   : > { %v4905_v55 = vpop.eup %4904  ;;  %4916 = vtanh.f32 %v3542_v43  ;;  %v3690_v62 = vunpack.c.h.bf16 %v4233_v50 }
 0x152   : > { %v4907_v48 = vpop.eup %4906  ;;  %2495 = vmatpush.bf16.msrb.mxu3 %v2098_v40  ;;  %v2073_v60 = vpack.c.bf16 %v4905_v55, %v4903_v53  ;;  %4918 = vtanh.f32 %v3441_v49  ;;  %v3626_v49 = vunpack.c.h.bf16 %v4217_v34  ;;  %v3657_v53 = vunpack.c.l.bf16 %v4225_v42 }
 0x153   : > { %v4909_v44 = vpop.eup %4908  ;;  %4920 = vtanh.f32 %v3442_v51  ;;  %v2276_v55 = vpack.c.bf16 %v6140_v59, %v6140_v59 }
 0x154   : > { %v4911_v2 = vpop.eup %4910  ;;  %2457 = vmatpush.bf16.msrb.mxu0 %v2073_v60  ;;  %v2081_v4 = vpack.c.bf16 %v4909_v44, %v4907_v48  ;;  %4922 = vtanh.f32 %v3473_v54  ;;  %v3658_v54 = vunpack.c.h.bf16 %v4225_v42  ;;  %v3689_v60 = vunpack.c.l.bf16 %v4233_v50 }
 0x155   : > { %v4913_v6 = vpop.eup %4912  ;;  %4924 = vtanh.f32 %v3474_v57  ;;  %v4208_v57 = vld [vmem:[%s5950_s18 + $0x430] sm:$0xff]   ;;  %v2277_v44 = vpack.c.bf16 %v6146_v56, %v6146_v56 }
 0x156   : > { %v4915_v8 = vpop.eup %4914  ;;  %2470 = vmatpush.bf16.msrb.mxu1 %v2081_v4  ;;  %v2089_v9 = vpack.c.bf16 %v4913_v6, %v4911_v2  ;;  %4926 = vtanh.f32 %v3505_v61  ;;  %v3589_v4 = vunpack.c.l.bf16 %v4208_v57  ;;  %v3590_v5 = vunpack.c.h.bf16 %v4208_v57  ;;  %v4224_v6 = vld [vmem:[%s5950_s18 + $0x4b0] sm:$0xff]   ;;  %v4222_v57 = vld [vmem:[%s5950_s18 + $0x4a0] sm:$0xff]  }
 0x157   : > { %v4917_v12 = vpop.eup %4916  ;;  %4928 = vtanh.f32 %v3506_v0  ;;  %v4216_v0 = vld [vmem:[%s5950_s18 + $0x470] sm:$0xff]  }
 0x158   : > { %v4919_v16 = vpop.eup %4918  ;;  %2483 = vmatpush.bf16.msrb.mxu2 %v2089_v9  ;;  %v2097_v17 = vpack.c.bf16 %v4917_v12, %v4915_v8  ;;  %4930 = vtanh.f32 %v3537_v35  ;;  %v2278_v35 = vpack.c.bf16 %v6151_v63, %v6151_v63  ;;  %v3621_v56 = vunpack.c.l.bf16 %v4216_v0 }
 0x159   : > { %v4921_v20 = vpop.eup %4920  ;;  %4932 = vtanh.f32 %v3538_v7  ;;  %v2279_v9 = vpack.c.bf16 %v6156_v15, %v6156_v15  ;;  %v3653_v63 = vunpack.c.l.bf16 %v4224_v6 }
 0x15a   : > { %v4923_v23 = vpop.eup %4922  ;;  %2496 = vmatpush.bf16.msrb.mxu3 %v2097_v17  ;;  %v2072_v24 = vpack.c.bf16 %v4921_v20, %v4919_v16  ;;  %4934 = vtanh.f32 %v3437_v10  ;;  %v3622_v10 = vunpack.c.h.bf16 %v4216_v0  ;;  %v3654_v16 = vunpack.c.h.bf16 %v4224_v6  ;;  %v4207_v17 = vld [vmem:[%s5950_s18 + $0x428] sm:$0xff]  }
 0x15b   : > { %v4925_v26 = vpop.eup %4924  ;;  %4936 = vtanh.f32 %v3438_v13  ;;  %v3586_v28 = vunpack.c.h.bf16 %v4207_v17 }
 0x15c   : > { %v4927_v29 = vpop.eup %4926  ;;  %2458 = vmatpush.bf16.msrb.mxu0 %v2072_v24  ;;  %v2080_v30 = vpack.c.bf16 %v4925_v26, %v4923_v23  ;;  %4938 = vtanh.f32 %v3469_v18  ;;  %v4215_v23 = vld [vmem:[%s5950_s18 + $0x468] sm:$0xff]   ;;  %v3585_v26 = vunpack.c.l.bf16 %v4207_v17 }
 0x15d   : > { %v4929_v32 = vpop.eup %4928  ;;  %4940 = vtanh.f32 %v3470_v21  ;;  %v3685_v21 = vunpack.c.l.bf16 %v4232_v11  ;;  %v3618_v34 = vunpack.c.h.bf16 %v4215_v23 }
 0x15e   : > { %v4931_v36 = vpop.eup %4930  ;;  %2471 = vmatpush.bf16.msrb.mxu1 %v2080_v30  ;;  %v2088_v37 = vpack.c.bf16 %v4929_v32, %v4927_v29  ;;  %4942 = vtanh.f32 %v3501_v25  ;;  %v4223_v29 = vld [vmem:[%s5950_s18 + $0x4a8] sm:$0xff]   ;;  %v3617_v32 = vunpack.c.l.bf16 %v4215_v23 }
 0x15f   : > { %v4933_v39 = vpop.eup %4932  ;;  %4944 = vtanh.f32 %v3502_v27  ;;  %v3650_v42 = vunpack.c.h.bf16 %v4223_v29 }
 0x160   : > { %v4935_v43 = vpop.eup %4934  ;;  %2484 = vmatpush.bf16.msrb.mxu2 %v2088_v37  ;;  %v2096_v45 = vpack.c.bf16 %v4933_v39, %v4931_v36  ;;  %4946 = vtanh.f32 %v3533_v31  ;;  %v4231_v36 = vld [vmem:[%s5950_s18 + $0x4e8] sm:$0xff]   ;;  %v3649_v39 = vunpack.c.l.bf16 %v4223_v29 }
 0x161   : > { %v4937_v47 = vpop.eup %4936  ;;  %4948 = vtanh.f32 %v3534_v33  ;;  %v3682_v50 = vunpack.c.h.bf16 %v4231_v36 }
 0x162   : > { %v4939_v51 = vpop.eup %4938  ;;  %2497 = vmatpush.bf16.msrb.mxu3 %v2096_v45  ;;  %v2071_v52 = vpack.c.bf16 %v4937_v47, %v4935_v43  ;;  %4950 = vtanh.f32 %v3593_v38  ;;  %v4206_v43 = vld [vmem:[%s5950_s18 + $0x420] sm:$0xff]   ;;  %v3681_v47 = vunpack.c.l.bf16 %v4231_v36 }
 0x163   : > { %v4941_v40 = vpop.eup %4940  ;;  %4952 = vtanh.f32 %v3594_v41 }
 0x164   : > { %v4943_v58 = vpop.eup %4942  ;;  %2459 = vmatpush.bf16.msrb.mxu0 %v2071_v52  ;;  %v2079_v48 = vpack.c.bf16 %v4941_v40, %v4939_v51  ;;  %4954 = vtanh.f32 %v3625_v46  ;;  %v4214_v51 = vld [vmem:[%s5950_s18 + $0x460] sm:$0xff]   ;;  %v3581_v40 = vunpack.c.l.bf16 %v4206_v43 }
 0x165   : > { %v4945_v61 = vpop.eup %4944  ;;  %4956 = vtanh.f32 %v3626_v49 }
 0x166   : > { %v4947_v1 = vpop.eup %4946  ;;  %2472 = vmatpush.bf16.msrb.mxu1 %v2079_v48  ;;  %v2087_v2 = vpack.c.bf16 %v4945_v61, %v4943_v58  ;;  %4958 = vtanh.f32 %v3657_v53 }
 0x167   : > { %v4949_v59 = vpop.eup %4948  ;;  %4960 = vtanh.f32 %v3658_v54  ;;  %2460 = vmatmul.bf16.vlgmr.msrb.gmra.mxu0 %v2276_v55  ;;  %v3582_v55 = vunpack.c.h.bf16 %v4206_v43 }
 0x168   : > { %v4951_v7 = vpop.eup %4950  ;;  %2485 = vmatpush.bf16.msrb.mxu2 %v2087_v2  ;;  %v2095_v3 = vpack.c.bf16 %v4949_v59, %v4947_v1  ;;  %4962 = vtanh.f32 %v3689_v60  ;;  %v3613_v60 = vunpack.c.l.bf16 %v4214_v51  ;;  %v3645_v2 = vunpack.c.l.bf16 %v4222_v57 }
 0x169   : > { %v4953_v8 = vpop.eup %4952  ;;  %4964 = vtanh.f32 %v3690_v62  ;;  %2473 = vmatmul.bf16.vlgmr.msrb.gmra.mxu1 %v2277_v44  ;;  %v3614_v62 = vunpack.c.h.bf16 %v4214_v51  ;;  %v4230_v44 = vld [vmem:[%s5950_s18 + $0x4e0] sm:$0xff]   ;;  %v3646_v59 = vunpack.c.h.bf16 %v4222_v57 }
 0x16a   : > { %v4955_v12 = vpop.eup %4954  ;;  %2498 = vmatpush.bf16.msrb.mxu3 %v2095_v3  ;;  %v2110_v13 = vpack.c.bf16 %v4953_v8, %v4951_v7  ;;  %4966 = vtanh.f32 %v3589_v4  ;;  %v3677_v7 = vunpack.c.l.bf16 %v4230_v44  ;;  %v4213_v8 = vld [vmem:[%s5950_s18 + $0x458] sm:$0xff]  }
 0x16b   : > { %v4957_v14 = vpop.eup %4956  ;;  %2486 = vmatmul.bf16.vlgmr.msrb.gmra.mxu2 %v2278_v35  ;;  %4968 = vtanh.f32 %v3590_v5  ;;  %v4205_v35 = vld [vmem:[%s5950_s18 + $0x418] sm:$0xff]   ;;  %v3609_v17 = vunpack.c.l.bf16 %v4213_v8 }
 0x16c   : > { %v4959_v18 = vpop.eup %4958  ;;  %2504 = vmatpush.bf16.msra.mxu0 %v2110_v13  ;;  %v2118_v20 = vpack.c.bf16 %v4957_v14, %v4955_v12  ;;  %4970 = vtanh.f32 %v3621_v56  ;;  %v3678_v56 = vunpack.c.h.bf16 %v4230_v44  ;;  %v3577_v11 = vunpack.c.l.bf16 %v4205_v35 }
 0x16d   : > { %v4961_v15 = vpop.eup %4960  ;;  %2499 = vmatmul.bf16.vlgmr.msrb.gmra.mxu3 %v2279_v9  ;;  %4972 = vtanh.f32 %v3622_v10  ;;  %v3578_v13 = vunpack.c.h.bf16 %v4205_v35 }
 0x16e   : > { %v4963_v24 = vpop.eup %4962  ;;  %2517 = vmatpush.bf16.msra.mxu1 %v2118_v20  ;;  %v2126_v25 = vpack.c.bf16 %v4961_v15, %v4959_v18  ;;  %4974 = vtanh.f32 %v3653_v63  ;;  %v4221_v63 = vld [vmem:[%s5950_s18 + $0x498] sm:$0xff]   ;;  %v3610_v20 = vunpack.c.h.bf16 %v4213_v8 }
 0x16f   : > { %v4965_v27 = vpop.eup %4964  ;;  %4976 = vtanh.f32 %v3654_v16  ;;  %v3641_v23 = vunpack.c.l.bf16 %v4221_v63 }
 0x170   : > { %v4967_v30 = vpop.eup %4966  ;;  %2530 = vmatpush.bf16.msra.mxu2 %v2126_v25  ;;  %v2134_v31 = vpack.c.bf16 %v4965_v27, %v4963_v24  ;;  %4978 = vtanh.f32 %v3685_v21  ;;  %v4229_v21 = vld [vmem:[%s5950_s18 + $0x4d8] sm:$0xff]   ;;  %v3642_v25 = vunpack.c.h.bf16 %v4221_v63  ;;  %v6205_v63 = vld [vmem:[%s5943_s19 + $0x88] sm:$0xff] }
 0x171   : > { %v4969_v33 = vpop.eup %4968  ;;  %4980 = vtanh.f32 %v3686_v22  ;;  %v3673_v29 = vunpack.c.l.bf16 %v4229_v21 }
 0x172   : > { %v4971_v37 = vpop.eup %4970  ;;  %2543 = vmatpush.bf16.msra.mxu3 %v2134_v31  ;;  %v2109_v38 = vpack.c.bf16 %v4969_v33, %v4967_v30  ;;  %4982 = vtanh.f32 %v3585_v26  ;;  %v4204_v26 = vld [vmem:[%s5950_s18 + $0x410] sm:$0xff]   ;;  %v3674_v31 = vunpack.c.h.bf16 %v4229_v21 }
 0x173   : > { %v4973_v41 = vpop.eup %4972  ;;  %4984 = vtanh.f32 %v3586_v28  ;;  %v3573_v36 = vunpack.c.l.bf16 %v4204_v26 }
 0x174   : > { %v4975_v45 = vpop.eup %4974  ;;  %2505 = vmatpush.bf16.msra.mxu0 %v2109_v38  ;;  %v2117_v46 = vpack.c.bf16 %v4973_v41, %v4971_v37  ;;  %4986 = vtanh.f32 %v3617_v32  ;;  %v4212_v32 = vld [vmem:[%s5950_s18 + $0x450] sm:$0xff]   ;;  %v3574_v38 = vunpack.c.h.bf16 %v4204_v26 }
 0x175   : > { %v4977_v49 = vpop.eup %4976  ;;  %4988 = vtanh.f32 %v3618_v34  ;;  %v3605_v43 = vunpack.c.l.bf16 %v4212_v32 }
 0x176   : > { %v4979_v52 = vpop.eup %4978  ;;  %2518 = vmatpush.bf16.msra.mxu1 %v2117_v46  ;;  %v2125_v53 = vpack.c.bf16 %v4977_v49, %v4975_v45  ;;  %4990 = vtanh.f32 %v3649_v39  ;;  %v4220_v39 = vld [vmem:[%s5950_s18 + $0x490] sm:$0xff]   ;;  %v3606_v46 = vunpack.c.h.bf16 %v4212_v32 }
 0x177   : > { %v4981_v54 = vpop.eup %4980  ;;  %4992 = vtanh.f32 %v3650_v42  ;;  %v3637_v51 = vunpack.c.l.bf16 %v4220_v39 }
 0x178   : > { %v4983_v58 = vpop.eup %4982  ;;  %2531 = vmatpush.bf16.msra.mxu2 %v2125_v53  ;;  %v2133_v48 = vpack.c.bf16 %v4981_v54, %v4979_v52  ;;  %4994 = vtanh.f32 %v3681_v47  ;;  %v4228_v47 = vld [vmem:[%s5950_s18 + $0x4d0] sm:$0xff]   ;;  %v3638_v53 = vunpack.c.h.bf16 %v4220_v39 }
 0x179   : > { %v4985_v61 = vpop.eup %4984  ;;  %4996 = vtanh.f32 %v3682_v50  ;;  %v3669_v57 = vunpack.c.l.bf16 %v4228_v47 }
 0x17a   : > { %v4987_v0 = vpop.eup %4986  ;;  %2544 = vmatpush.bf16.msra.mxu3 %v2133_v48  ;;  %v2108_v1 = vpack.c.bf16 %v4985_v61, %v4983_v58  ;;  %4998 = vtanh.f32 %v3581_v40  ;;  %v4203_v40 = vld [vmem:[%s5950_s18 + $0x408] sm:$0xff]   ;;  %v3670_v48 = vunpack.c.h.bf16 %v4228_v47 }
 0x17b   : > { %v4989_v4 = vpop.eup %4988  ;;  %5000 = vtanh.f32 %v3582_v55  ;;  %v3569_v44 = vunpack.c.l.bf16 %v4203_v40 }
 0x17c   : > { %v4991_v5 = vpop.eup %4990  ;;  %2506 = vmatpush.bf16.msra.mxu0 %v2108_v1  ;;  %v2116_v6 = vpack.c.bf16 %v4989_v4, %v4987_v0  ;;  %5002 = vtanh.f32 %v3613_v60  ;;  %v4211_v60 = vld [vmem:[%s5950_s18 + $0x448] sm:$0xff]   ;;  %v3570_v1 = vunpack.c.h.bf16 %v4203_v40 }
 0x17d   : > { %v4993_v3 = vpop.eup %4992  ;;  %5004 = vtanh.f32 %v3614_v62  ;;  %v3601_v35 = vunpack.c.l.bf16 %v4211_v60 }
 0x17e   : > { %v4995_v9 = vpop.eup %4994  ;;  %2519 = vmatpush.bf16.msra.mxu1 %v2116_v6  ;;  %v2124_v10 = vpack.c.bf16 %v4993_v3, %v4991_v5  ;;  %5006 = vtanh.f32 %v3645_v2  ;;  %v4219_v2 = vld [vmem:[%s5950_s18 + $0x488] sm:$0xff]   ;;  %v3602_v6 = vunpack.c.h.bf16 %v4211_v60  ;;  %v6199_v3 = vld [vmem:[%s5943_s19 + $0x80] sm:$0xff] }
 0x17f   : > { %v4997_v12 = vpop.eup %4996  ;;  %5008 = vtanh.f32 %v3646_v59 }
 0x180   : > { %v4999_v14 = vpop.eup %4998  ;;  %2532 = vmatpush.bf16.msra.mxu2 %v2124_v10  ;;  %v2132_v16 = vpack.c.bf16 %v4997_v12, %v4995_v9  ;;  %5010 = vtanh.f32 %v3677_v7  ;;  %v4227_v7 = vld [vmem:[%s5950_s18 + $0x4c8] sm:$0xff]   ;;  %v3633_v9 = vunpack.c.l.bf16 %v4219_v2  ;;  %v2730_v10 = vadd.f32 %v6159_v19, %v6199_v3  ;;  %v4210_v19 = vld [vmem:[%s5950_s18 + $0x440] sm:$0xff]  }
 0x181   : > { %v5001_v18 = vpop.eup %5000  ;;  %5012 = vtanh.f32 %v3678_v56  ;;  %v3634_v12 = vunpack.c.h.bf16 %v4219_v2  ;;  %v3666_v21 = vunpack.c.h.bf16 %v4227_v7  ;;  %v3597_v32 = vunpack.c.l.bf16 %v4210_v19 }
 0x182   : > { %v5003_v15 = vpop.eup %5002  ;;  %2545 = vmatpush.bf16.msra.mxu3 %v2132_v16  ;;  %v2107_v22 = vpack.c.bf16 %v5001_v18, %v4999_v14  ;;  %5014 = vtanh.f32 %v3577_v11  ;;  %v2731_v18 = vadd.f32 %v2730_v10, %v6205_v63 }
 0x183   : > { %v5005_v24 = vpop.eup %5004  ;;  %5016 = vtanh.f32 %v3578_v13  ;;  %v4202_v13 = vld [vmem:[%s5950_s18 + $0x400] sm:$0xff]  }
 0x184   : > { %v5007_v27 = vpop.eup %5006  ;;  %2507 = vmatpush.bf16.msra.mxu0 %v2107_v22  ;;  %v2115_v28 = vpack.c.bf16 %v5005_v24, %v5003_v15  ;;  %5018 = vtanh.f32 %v3609_v17  ;;  %v3665_v17 = vunpack.c.l.bf16 %v4227_v7  ;;  %v6210_v15 = vld [vmem:[%s5943_s19 + $0x90] sm:$0xff]  ;;  %v3565_v24 = vunpack.c.l.bf16 %v4202_v13 }
 0x185   : > { %v5009_v30 = vpop.eup %5008  ;;  %5020 = vtanh.f32 %v3610_v20 }
 0x186   : > { %v5011_v33 = vpop.eup %5010  ;;  %2520 = vmatpush.bf16.msra.mxu1 %v2115_v28  ;;  %v2123_v34 = vpack.c.bf16 %v5009_v30, %v5007_v27  ;;  %5022 = vtanh.f32 %v3641_v23  ;;  %v3566_v27 = vunpack.c.h.bf16 %v4202_v13  ;;  %v4218_v28 = vld [vmem:[%s5950_s18 + $0x480] sm:$0xff]  }
 0x187   : > { %v5013_v37 = vpop.eup %5012  ;;  %5024 = vtanh.f32 %v3642_v25  ;;  %v2732_v25 = vadd.f32 %v2731_v18, %v6210_v15 }
 0x188   : > { %v5015_v41 = vpop.eup %5014  ;;  %2533 = vmatpush.bf16.msra.mxu2 %v2123_v34  ;;  %v2131_v42 = vpack.c.bf16 %v5013_v37, %v5011_v33  ;;  %5026 = vtanh.f32 %v3673_v29  ;;  %v6215_v29 = vld [vmem:[%s5943_s19 + $0x98] sm:$0xff]  ;;  %v4226_v37 = vld [vmem:[%s5950_s18 + $0x4c0] sm:$0xff]  }
 0x189   : > { %v5017_v45 = vpop.eup %5016  ;;  %5028 = vtanh.f32 %v3674_v31  ;;  %v6218_v33 = vadd.f32 %v2732_v25, %v6215_v29  ;;  %v4264_v25 = vld [vmem:[%s5950_s18 + $0x5f0] sm:$0xff]  }
 0x18a   : > { %v5019_v49 = vpop.eup %5018  ;;  %2546 = vmatpush.bf16.msra.mxu3 %v2131_v42  ;;  %v2106_v50 = vpack.c.bf16 %v5017_v45, %v5015_v41  ;;  %5030 = vtanh.f32 %v3573_v36  ;;  %v3598_v36 = vunpack.c.h.bf16 %v4210_v19  ;;  %v3629_v41 = vunpack.c.l.bf16 %v4218_v28  ;;  %v4241_v45 = vld [vmem:[%s5950_s18 + $0x538] sm:$0xff]  }
 0x18b   : > { %v5021_v52 = vpop.eup %5020  ;;  %5032 = vtanh.f32 %v3574_v38 }
 0x18c   : > { %v5023_v54 = vpop.eup %5022  ;;  %2508 = vmatpush.bf16.msra.mxu0 %v2106_v50  ;;  %v2114_v55 = vpack.c.bf16 %v5021_v52, %v5019_v49  ;;  %5034 = vtanh.f32 %v3605_v43  ;;  %v3630_v43 = vunpack.c.h.bf16 %v4218_v28  ;;  %v3661_v49 = vunpack.c.l.bf16 %v4226_v37  ;;  %v4249_v52 = vld [vmem:[%s5950_s18 + $0x578] sm:$0xff]  }
 0x18d   : > { %v5025_v58 = vpop.eup %5024  ;;  %5036 = vtanh.f32 %v3606_v46 }
 0x18e   : > { %v5027_v61 = vpop.eup %5026  ;;  %2521 = vmatpush.bf16.msra.mxu1 %v2114_v55  ;;  %v2122_v62 = vpack.c.bf16 %v5025_v58, %v5023_v54  ;;  %5038 = vtanh.f32 %v3637_v51  ;;  %v3662_v51 = vunpack.c.h.bf16 %v4226_v37  ;;  %v3721_v54 = vunpack.c.l.bf16 %v4241_v45  ;;  %v4257_v58 = vld [vmem:[%s5950_s18 + $0x5b8] sm:$0xff]  }
 0x18f   : > { %v5029_v0 = vpop.eup %5028  ;;  %5040 = vtanh.f32 %v3638_v53  ;;  %v3814_v37 = vunpack.c.h.bf16 %v4264_v25 }
 0x190   : > { %v5031_v4 = vpop.eup %5030  ;;  %2534 = vmatpush.bf16.msra.mxu2 %v2122_v62  ;;  %v2130_v59 = vpack.c.bf16 %v5029_v0, %v5027_v61  ;;  %5042 = vtanh.f32 %v3669_v57  ;;  %v3722_v57 = vunpack.c.h.bf16 %v4241_v45  ;;  %v3753_v61 = vunpack.c.l.bf16 %v4249_v52  ;;  %v4265_v0 = vld [vmem:[%s5950_s18 + $0x5f8] sm:$0xff]  }
 0x191   : > { %v5033_v5 = vpop.eup %5032  ;;  %5044 = vtanh.f32 %v3670_v48  ;;  %v3818_v10 = vunpack.c.h.bf16 %v4265_v0 }
 0x192   : > { %v5035_v56 = vpop.eup %5034  ;;  %2547 = vmatpush.bf16.msra.mxu3 %v2130_v59  ;;  %v2105_v8 = vpack.c.bf16 %v5033_v5, %v5031_v4  ;;  %5046 = vtanh.f32 %v3569_v44  ;;  %v3754_v44 = vunpack.c.h.bf16 %v4249_v52  ;;  %v3785_v4 = vunpack.c.l.bf16 %v4257_v58 }
 0x193   : > { %v5037_v11 = vpop.eup %5036  ;;  %5048 = vtanh.f32 %v3570_v1  ;;  %v2280_v5 = vpack.c.bf16 %v6199_v3, %v6199_v3 }
 0x194   : > { %v5039_v14 = vpop.eup %5038  ;;  %2509 = vmatpush.bf16.msra.mxu0 %v2105_v8  ;;  %v2113_v16 = vpack.c.bf16 %v5037_v11, %v5035_v56  ;;  %5050 = vtanh.f32 %v3601_v35  ;;  %v3786_v35 = vunpack.c.h.bf16 %v4257_v58  ;;  %v3817_v8 = vunpack.c.l.bf16 %v4265_v0 }
 0x195   : > { %v5041_v20 = vpop.eup %5040  ;;  %5052 = vtanh.f32 %v3602_v6  ;;  %v4240_v6 = vld [vmem:[%s5950_s18 + $0x530] sm:$0xff]   ;;  %v2281_v11 = vpack.c.bf16 %v6205_v63, %v6205_v63 }
 0x196   : > { %v5043_v22 = vpop.eup %5042  ;;  %2522 = vmatpush.bf16.msra.mxu1 %v2113_v16  ;;  %v2121_v23 = vpack.c.bf16 %v5041_v20, %v5039_v14  ;;  %5054 = vtanh.f32 %v3633_v9  ;;  %v3717_v16 = vunpack.c.l.bf16 %v4240_v6  ;;  %v3718_v18 = vunpack.c.h.bf16 %v4240_v6  ;;  %v4256_v20 = vld [vmem:[%s5950_s18 + $0x5b0] sm:$0xff]   ;;  %v4254_v6 = vld [vmem:[%s5950_s18 + $0x5a0] sm:$0xff]  }
 0x197   : > { %v5045_v26 = vpop.eup %5044  ;;  %5056 = vtanh.f32 %v3634_v12  ;;  %v4248_v12 = vld [vmem:[%s5950_s18 + $0x570] sm:$0xff]  }
 0x198   : > { %v5047_v30 = vpop.eup %5046  ;;  %2535 = vmatpush.bf16.msra.mxu2 %v2121_v23  ;;  %v2129_v31 = vpack.c.bf16 %v5045_v26, %v5043_v22  ;;  %5058 = vtanh.f32 %v3665_v17  ;;  %v2282_v17 = vpack.c.bf16 %v6210_v15, %v6210_v15  ;;  %v3749_v63 = vunpack.c.l.bf16 %v4248_v12 }
 0x199   : > { %v5049_v34 = vpop.eup %5048  ;;  %5060 = vtanh.f32 %v3666_v21  ;;  %v2283_v23 = vpack.c.bf16 %v6215_v29, %v6215_v29  ;;  %v3781_v15 = vunpack.c.l.bf16 %v4256_v20 }
 0x19a   : > { %v5051_v38 = vpop.eup %5050  ;;  %2548 = vmatpush.bf16.msra.mxu3 %v2129_v31  ;;  %v2104_v39 = vpack.c.bf16 %v5049_v34, %v5047_v30  ;;  %5062 = vtanh.f32 %v3565_v24  ;;  %v3750_v24 = vunpack.c.h.bf16 %v4248_v12  ;;  %v3782_v30 = vunpack.c.h.bf16 %v4256_v20  ;;  %v4239_v31 = vld [vmem:[%s5950_s18 + $0x528] sm:$0xff]  }
 0x19b   : > { %v5053_v42 = vpop.eup %5052  ;;  %5064 = vtanh.f32 %v3566_v27  ;;  %v3714_v45 = vunpack.c.h.bf16 %v4239_v31 }
 0x19c   : > { %v5055_v46 = vpop.eup %5054  ;;  %2510 = vmatpush.bf16.msra.mxu0 %v2104_v39  ;;  %v2112_v47 = vpack.c.bf16 %v5053_v42, %v5051_v38  ;;  %5066 = vtanh.f32 %v3597_v32  ;;  %v4247_v38 = vld [vmem:[%s5950_s18 + $0x568] sm:$0xff]   ;;  %v3713_v42 = vunpack.c.l.bf16 %v4239_v31 }
 0x19d   : > { %v5057_v50 = vpop.eup %5056  ;;  %5068 = vtanh.f32 %v3598_v36  ;;  %v3813_v36 = vunpack.c.l.bf16 %v4264_v25  ;;  %v3746_v52 = vunpack.c.h.bf16 %v4247_v38 }
 0x19e   : > { %v5059_v53 = vpop.eup %5058  ;;  %2523 = vmatpush.bf16.msra.mxu1 %v2112_v47  ;;  %v2120_v40 = vpack.c.bf16 %v5057_v50, %v5055_v46  ;;  %5070 = vtanh.f32 %v3629_v41  ;;  %v4255_v46 = vld [vmem:[%s5950_s18 + $0x5a8] sm:$0xff]   ;;  %v3745_v50 = vunpack.c.l.bf16 %v4247_v38 }
 0x19f   : > { %v5061_v55 = vpop.eup %5060  ;;  %5072 = vtanh.f32 %v3630_v43  ;;  %v3778_v58 = vunpack.c.h.bf16 %v4255_v46 }
 0x1a0   : > { %v5063_v48 = vpop.eup %5062  ;;  %2536 = vmatpush.bf16.msra.mxu2 %v2120_v40  ;;  %v2128_v60 = vpack.c.bf16 %v5061_v55, %v5059_v53  ;;  %5074 = vtanh.f32 %v3661_v49  ;;  %v4263_v53 = vld [vmem:[%s5950_s18 + $0x5e8] sm:$0xff]   ;;  %v3777_v55 = vunpack.c.l.bf16 %v4255_v46 }
 0x1a1   : > { %v5065_v62 = vpop.eup %5064  ;;  %5076 = vtanh.f32 %v3662_v51  ;;  %v3810_v0 = vunpack.c.h.bf16 %v4263_v53 }
 0x1a2   : > { %v5067_v1 = vpop.eup %5066  ;;  %2549 = vmatpush.bf16.msra.mxu3 %v2128_v60  ;;  %v2103_v2 = vpack.c.bf16 %v5065_v62, %v5063_v48  ;;  %5078 = vtanh.f32 %v3721_v54  ;;  %v4238_v48 = vld [vmem:[%s5950_s18 + $0x520] sm:$0xff]   ;;  %v3809_v62 = vunpack.c.l.bf16 %v4263_v53 }
 0x1a3   : > { %v5069_v59 = vpop.eup %5068  ;;  %5080 = vtanh.f32 %v3722_v57 }
 0x1a4   : > { %v5071_v7 = vpop.eup %5070  ;;  %2511 = vmatpush.bf16.msra.mxu0 %v2103_v2  ;;  %v2111_v56 = vpack.c.bf16 %v5069_v59, %v5067_v1  ;;  %5082 = vtanh.f32 %v3753_v61  ;;  %v4246_v1 = vld [vmem:[%s5950_s18 + $0x560] sm:$0xff]   ;;  %v3709_v59 = vunpack.c.l.bf16 %v4238_v48 }
 0x1a5   : > { %v5073_v9 = vpop.eup %5072  ;;  %5084 = vtanh.f32 %v3754_v44 }
 0x1a6   : > { %v5075_v13 = vpop.eup %5074  ;;  %2524 = vmatpush.bf16.msra.mxu1 %v2111_v56  ;;  %v2119_v14 = vpack.c.bf16 %v5073_v9, %v5071_v7  ;;  %5086 = vtanh.f32 %v3785_v4 }
 0x1a7   : > { %v5077_v3 = vpop.eup %5076  ;;  %5088 = vtanh.f32 %v3786_v35  ;;  %2512 = vmatmul.bf16.vlgmr.msra.gmra.mxu0 %v2280_v5  ;;  %v3710_v5 = vunpack.c.h.bf16 %v4238_v48 }
 0x1a8   : > { %v5079_v21 = vpop.eup %5078  ;;  %2537 = vmatpush.bf16.msra.mxu2 %v2119_v14  ;;  %v2127_v19 = vpack.c.bf16 %v5077_v3, %v5075_v13  ;;  %5090 = vtanh.f32 %v3817_v8  ;;  %v3741_v8 = vunpack.c.l.bf16 %v4246_v1  ;;  %v3773_v14 = vunpack.c.l.bf16 %v4254_v6 }
 0x1a9   : > { %v5081_v22 = vpop.eup %5080  ;;  %5092 = vtanh.f32 %v3818_v10  ;;  %2525 = vmatmul.bf16.vlgmr.msra.gmra.mxu1 %v2281_v11  ;;  %v3742_v10 = vunpack.c.h.bf16 %v4246_v1  ;;  %v4262_v11 = vld [vmem:[%s5950_s18 + $0x5e0] sm:$0xff]   ;;  %v3774_v3 = vunpack.c.h.bf16 %v4254_v6 }
 0x1aa   : > { %v5083_v26 = vpop.eup %5082  ;;  %2550 = vmatpush.bf16.msra.mxu3 %v2127_v19  ;;  %v2142_v27 = vpack.c.bf16 %v5081_v22, %v5079_v21  ;;  %5094 = vtanh.f32 %v3717_v16  ;;  %v3805_v21 = vunpack.c.l.bf16 %v4262_v11  ;;  %v4245_v22 = vld [vmem:[%s5950_s18 + $0x558] sm:$0xff]  }
 0x1ab   : > { %v5085_v28 = vpop.eup %5084  ;;  %2538 = vmatmul.bf16.vlgmr.msra.gmra.mxu2 %v2282_v17  ;;  %5096 = vtanh.f32 %v3718_v18  ;;  %v4237_v17 = vld [vmem:[%s5950_s18 + $0x518] sm:$0xff]   ;;  %v3737_v31 = vunpack.c.l.bf16 %v4245_v22 }
 0x1ac   : > { %v5087_v32 = vpop.eup %5086  ;;  %2556 = vmatpush.bf16.msrb.mxu0 %v2142_v27  ;;  %v2150_v34 = vpack.c.bf16 %v5085_v28, %v5083_v26  ;;  %5098 = vtanh.f32 %v3749_v63  ;;  %v3806_v63 = vunpack.c.h.bf16 %v4262_v11  ;;  %v3705_v25 = vunpack.c.l.bf16 %v4237_v17 }
 0x1ad   : > { %v5089_v29 = vpop.eup %5088  ;;  %2551 = vmatmul.bf16.vlgmr.msra.gmra.mxu3 %v2283_v23  ;;  %5100 = vtanh.f32 %v3750_v24  ;;  %v3706_v27 = vunpack.c.h.bf16 %v4237_v17 }
 0x1ae   : > { %v5091_v39 = vpop.eup %5090  ;;  %2569 = vmatpush.bf16.msrb.mxu1 %v2150_v34  ;;  %v2158_v41 = vpack.c.bf16 %v5089_v29, %v5087_v32  ;;  %5102 = vtanh.f32 %v3781_v15  ;;  %v4253_v15 = vld [vmem:[%s5950_s18 + $0x598] sm:$0xff]   ;;  %v3738_v34 = vunpack.c.h.bf16 %v4245_v22 }
 0x1af   : > { %v5093_v43 = vpop.eup %5092  ;;  %5104 = vtanh.f32 %v3782_v30  ;;  %v3769_v38 = vunpack.c.l.bf16 %v4253_v15 }
 0x1b0   : > { %v5095_v47 = vpop.eup %5094  ;;  %2582 = vmatpush.bf16.msrb.mxu2 %v2158_v41  ;;  %v2166_v49 = vpack.c.bf16 %v5093_v43, %v5091_v39  ;;  %5106 = vtanh.f32 %v3813_v36  ;;  %v4261_v36 = vld [vmem:[%s5950_s18 + $0x5d8] sm:$0xff]   ;;  %v3770_v41 = vunpack.c.h.bf16 %v4253_v15 }
 0x1b1   : > { %v5097_v51 = vpop.eup %5096  ;;  %5108 = vtanh.f32 %v3814_v37  ;;  %v3801_v46 = vunpack.c.l.bf16 %v4261_v36 }
 0x1b2   : > { %v5099_v40 = vpop.eup %5098  ;;  %2595 = vmatpush.bf16.msrb.mxu3 %v2166_v49  ;;  %v2141_v54 = vpack.c.bf16 %v5097_v51, %v5095_v47  ;;  %5110 = vtanh.f32 %v3713_v42  ;;  %v4236_v42 = vld [vmem:[%s5950_s18 + $0x510] sm:$0xff]   ;;  %v3802_v49 = vunpack.c.h.bf16 %v4261_v36 }
 0x1b3   : > { %v5101_v57 = vpop.eup %5100  ;;  %5112 = vtanh.f32 %v3714_v45  ;;  %v3701_v53 = vunpack.c.l.bf16 %v4236_v42 }
 0x1b4   : > { %v5103_v60 = vpop.eup %5102  ;;  %2557 = vmatpush.bf16.msrb.mxu0 %v2141_v54  ;;  %v2149_v61 = vpack.c.bf16 %v5101_v57, %v5099_v40  ;;  %5114 = vtanh.f32 %v3745_v50  ;;  %v4244_v50 = vld [vmem:[%s5950_s18 + $0x550] sm:$0xff]   ;;  %v3702_v54 = vunpack.c.h.bf16 %v4236_v42 }
 0x1b5   : > { %v5105_v44 = vpop.eup %5104  ;;  %5116 = vtanh.f32 %v3746_v52  ;;  %v3733_v48 = vunpack.c.l.bf16 %v4244_v50 }
 0x1b6   : > { %v5107_v2 = vpop.eup %5106  ;;  %2570 = vmatpush.bf16.msrb.mxu1 %v2149_v61  ;;  %v2157_v4 = vpack.c.bf16 %v5105_v44, %v5103_v60  ;;  %5118 = vtanh.f32 %v3777_v55  ;;  %v4252_v55 = vld [vmem:[%s5950_s18 + $0x590] sm:$0xff]   ;;  %v3734_v61 = vunpack.c.h.bf16 %v4244_v50  ;;  %v6274_v50 = vld [vmem:[%s5943_s19 + $0xb8] sm:$0xff] }
 0x1b7   : > { %v5109_v35 = vpop.eup %5108  ;;  %5120 = vtanh.f32 %v3778_v58  ;;  %v3765_v1 = vunpack.c.l.bf16 %v4252_v55 }
 0x1b8   : > { %v5111_v7 = vpop.eup %5110  ;;  %2583 = vmatpush.bf16.msrb.mxu2 %v2157_v4  ;;  %v2165_v56 = vpack.c.bf16 %v5109_v35, %v5107_v2  ;;  %5122 = vtanh.f32 %v3809_v62  ;;  %v4260_v62 = vld [vmem:[%s5950_s18 + $0x5d0] sm:$0xff]   ;;  %v3766_v4 = vunpack.c.h.bf16 %v4252_v55 }
 0x1b9   : > { %v5113_v9 = vpop.eup %5112  ;;  %5124 = vtanh.f32 %v3810_v0  ;;  %v3797_v6 = vunpack.c.l.bf16 %v4260_v62 }
 0x1ba   : > { %v5115_v12 = vpop.eup %5114  ;;  %2596 = vmatpush.bf16.msrb.mxu3 %v2165_v56  ;;  %v2140_v13 = vpack.c.bf16 %v5113_v9, %v5111_v7  ;;  %5126 = vtanh.f32 %v3709_v59  ;;  %v4235_v59 = vld [vmem:[%s5950_s18 + $0x508] sm:$0xff]   ;;  %v3798_v56 = vunpack.c.h.bf16 %v4260_v62  ;;  %v2344_v62 = vpop.f32.mrf.mxu3 }
 0x1bb   : > { %v5117_v16 = vpop.eup %5116  ;;  %5128 = vtanh.f32 %v3710_v5  ;;  %v3697_v11 = vunpack.c.l.bf16 %v4235_v59 }
 0x1bc   : > { %v5119_v18 = vpop.eup %5118  ;;  %2558 = vmatpush.bf16.msrb.mxu0 %v2140_v13  ;;  %v2148_v20 = vpack.c.bf16 %v5117_v16, %v5115_v12  ;;  %5130 = vtanh.f32 %v3741_v8  ;;  %v4243_v8 = vld [vmem:[%s5950_s18 + $0x548] sm:$0xff]   ;;  %v3698_v13 = vunpack.c.h.bf16 %v4235_v59 }
 0x1bd   : > { %v5121_v19 = vpop.eup %5120  ;;  %5132 = vtanh.f32 %v3742_v10  ;;  %v3729_v17 = vunpack.c.l.bf16 %v4243_v8 }
 0x1be   : > { %v5123_v23 = vpop.eup %5122  ;;  %2571 = vmatpush.bf16.msrb.mxu1 %v2148_v20  ;;  %v2156_v24 = vpack.c.bf16 %v5121_v19, %v5119_v18  ;;  %5134 = vtanh.f32 %v3773_v14  ;;  %v4251_v14 = vld [vmem:[%s5950_s18 + $0x588] sm:$0xff]   ;;  %v3730_v20 = vunpack.c.h.bf16 %v4243_v8  ;;  %v6258_v19 = vld [vmem:[%s5943_s19 + $0xa0] sm:$0xff]  ;;  %v4281_v8 = vld [vmem:[%s5950_s18 + $0x678] sm:$0xff]  }
 0x1bf   : > { %v5125_v26 = vpop.eup %5124  ;;  %5136 = vtanh.f32 %v3774_v3  ;;  %v3762_v15 = vunpack.c.h.bf16 %v4251_v14 }
 0x1c0   : > { %v5127_v28 = vpop.eup %5126  ;;  %2584 = vmatpush.bf16.msrb.mxu2 %v2156_v24  ;;  %v2164_v30 = vpack.c.bf16 %v5125_v26, %v5123_v23  ;;  %5138 = vtanh.f32 %v3805_v21  ;;  %v4259_v21 = vld [vmem:[%s5950_s18 + $0x5c8] sm:$0xff]   ;;  %v3761_v23 = vunpack.c.l.bf16 %v4251_v14  ;;  %v2305_v24 = vpop.f32.mrf.mxu0 }
 0x1c1   : > { %v5129_v32 = vpop.eup %5128  ;;  %5140 = vtanh.f32 %v3806_v63  ;;  %v2318_v26 = vpop.f32.mrf.mxu1  ;;  %v3793_v36 = vunpack.c.l.bf16 %v4259_v21 }
 0x1c2   : > { %v5131_v29 = vpop.eup %5130  ;;  %2597 = vmatpush.bf16.msrb.mxu3 %v2164_v30  ;;  %v2139_v37 = vpack.c.bf16 %v5129_v32, %v5127_v28  ;;  %5142 = vtanh.f32 %v3705_v25  ;;  %v2734_v25 = vadd.f32 %v6218_v33, %v6258_v19  ;;  %v4234_v28 = vld [vmem:[%s5950_s18 + $0x500] sm:$0xff]   ;;  %v2319_v30 = vadd.f32 %v2318_v26, %v2305_v24  ;;  %v2346_v26 = vpop.f32.mrf.mxu3 }
 0x1c3   : > { %v5133_v39 = vpop.eup %5132  ;;  %5144 = vtanh.f32 %v3706_v27 }
 0x1c4   : > { %v5135_v43 = vpop.eup %5134  ;;  %2559 = vmatpush.bf16.msrb.mxu0 %v2139_v37  ;;  %v2147_v45 = vpack.c.bf16 %v5133_v39, %v5131_v29  ;;  %5146 = vtanh.f32 %v3737_v31  ;;  %v6264_v31 = vld [vmem:[%s5943_s19 + $0xa8] sm:$0xff]  ;;  %v3794_v37 = vunpack.c.h.bf16 %v4259_v21  ;;  %v6269_v39 = vld [vmem:[%s5943_s19 + $0xb0] sm:$0xff]  ;;  %v3882_v21 = vunpack.c.h.bf16 %v4281_v8 }
 0x1c5   : > { %v5137_v47 = vpop.eup %5136  ;;  %5148 = vtanh.f32 %v3738_v34  ;;  %v2735_v29 = vadd.f32 %v2734_v25, %v6264_v31 }
 0x1c6   : > { %v5139_v51 = vpop.eup %5138  ;;  %2572 = vmatpush.bf16.msrb.mxu1 %v2147_v45  ;;  %v2155_v52 = vpack.c.bf16 %v5137_v47, %v5135_v43  ;;  %5150 = vtanh.f32 %v3769_v38  ;;  %v4242_v38 = vld [vmem:[%s5950_s18 + $0x540] sm:$0xff]   ;;  %v3693_v43 = vunpack.c.l.bf16 %v4234_v28  ;;  %v3694_v47 = vunpack.c.h.bf16 %v4234_v28 }
 0x1c7   : > { %v5141_v40 = vpop.eup %5140  ;;  %5152 = vtanh.f32 %v3770_v41  ;;  %v2736_v45 = vadd.f32 %v2735_v29, %v6269_v39  ;;  %v3726_v55 = vunpack.c.h.bf16 %v4242_v38  ;;  %v2284_v28 = vpack.c.bf16 %v6258_v19, %v6258_v19 }
 0x1c8   : > { %v5143_v57 = vpop.eup %5142  ;;  %2585 = vmatpush.bf16.msrb.mxu2 %v2155_v52  ;;  %v2163_v58 = vpack.c.bf16 %v5141_v40, %v5139_v51  ;;  %5154 = vtanh.f32 %v3801_v46 }
 0x1c9   : > { %v5145_v60 = vpop.eup %5144  ;;  %5156 = vtanh.f32 %v3802_v49  ;;  %v4250_v49 = vld [vmem:[%s5950_s18 + $0x580] sm:$0xff]   ;;  %v6277_v40 = vadd.f32 %v2736_v45, %v6274_v50  ;;  %v2320_v59 = vpop.f32.mrf.mxu1  ;;  %v2286_v45 = vpack.c.bf16 %v6269_v39, %v6269_v39 }
 0x1ca   : > { %v5147_v44 = vpop.eup %5146  ;;  %2598 = vmatpush.bf16.msrb.mxu3 %v2163_v58  ;;  %v2138_v0 = vpack.c.bf16 %v5145_v60, %v5143_v57  ;;  %5158 = vtanh.f32 %v3701_v53  ;;  %v3725_v53 = vunpack.c.l.bf16 %v4242_v38  ;;  %v4258_v57 = vld [vmem:[%s5950_s18 + $0x5c0] sm:$0xff]   ;;  %v3757_v60 = vunpack.c.l.bf16 %v4250_v49  ;;  %v4280_v38 = vld [vmem:[%s5950_s18 + $0x670] sm:$0xff]  }
 0x1cb   : > { %v5149_v2 = vpop.eup %5148  ;;  %5160 = vtanh.f32 %v3702_v54 }
 0x1cc   : > { %v5151_v35 = vpop.eup %5150  ;;  %2560 = vmatpush.bf16.msrb.mxu0 %v2138_v0  ;;  %v2146_v5 = vpack.c.bf16 %v5149_v2, %v5147_v44  ;;  %5162 = vtanh.f32 %v3733_v48  ;;  %v3758_v0 = vunpack.c.h.bf16 %v4250_v49 }
 0x1cd   : > { %v5153_v7 = vpop.eup %5152  ;;  %5164 = vtanh.f32 %v3734_v61  ;;  %v2331_v61 = vpop.f32.mrf.mxu2 }
 0x1ce   : > { %v5155_v9 = vpop.eup %5154  ;;  %2573 = vmatpush.bf16.msrb.mxu1 %v2146_v5  ;;  %v2154_v10 = vpack.c.bf16 %v5153_v7, %v5151_v35  ;;  %5166 = vtanh.f32 %v3765_v1  ;;  %v4273_v1 = vld [vmem:[%s5950_s18 + $0x638] sm:$0xff]   ;;  %v2332_v2 = vadd.f32 %v2331_v61, %v2319_v30  ;;  %v4272_v30 = vld [vmem:[%s5950_s18 + $0x630] sm:$0xff]   ;;  %v4271_v61 = vld [vmem:[%s5950_s18 + $0x628] sm:$0xff]  }
 0x1cf   : > { %v5157_v12 = vpop.eup %5156  ;;  %5168 = vtanh.f32 %v3766_v4  ;;  %v2307_v4 = vpop.f32.mrf.mxu0  ;;  %v3850_v14 = vunpack.c.h.bf16 %v4273_v1 }
 0x1d0   : > { %v5159_v16 = vpop.eup %5158  ;;  %2586 = vmatpush.bf16.msrb.mxu2 %v2154_v10  ;;  %v2162_v3 = vpack.c.bf16 %v5157_v12, %v5155_v9  ;;  %5170 = vtanh.f32 %v3797_v6  ;;  %v3789_v6 = vunpack.c.l.bf16 %v4258_v57  ;;  %v6282_v9 = vadd.f32 %v2344_v62, %v2332_v2  ;;  %v4279_v2 = vld [vmem:[%s5950_s18 + $0x668] sm:$0xff]  }
 0x1d1   : > { %v5161_v18 = vpop.eup %5160  ;;  %5172 = vtanh.f32 %v3798_v56  ;;  %v3790_v56 = vunpack.c.h.bf16 %v4258_v57  ;;  %v3849_v12 = vunpack.c.l.bf16 %v4273_v1 }
 0x1d2   : > { %v5163_v63 = vpop.eup %5162  ;;  %2599 = vmatpush.bf16.msrb.mxu3 %v2162_v3  ;;  %v2137_v22 = vpack.c.bf16 %v5161_v18, %v5159_v16  ;;  %5174 = vtanh.f32 %v3697_v11  ;;  %v4289_v16 = vld [vmem:[%s5950_s18 + $0x6b8] sm:$0xff]   ;;  %v3881_v18 = vunpack.c.l.bf16 %v4281_v8 }
 0x1d3   : > { %v5165_v27 = vpop.eup %5164  ;;  %5176 = vtanh.f32 %v3698_v13  ;;  %v3913_v24 = vunpack.c.l.bf16 %v4289_v16 }
 0x1d4   : > { %v5167_v32 = vpop.eup %5166  ;;  %2561 = vmatpush.bf16.msrb.mxu0 %v2137_v22  ;;  %v2145_v34 = vpack.c.bf16 %v5165_v27, %v5163_v63  ;;  %5178 = vtanh.f32 %v3729_v17  ;;  %v4297_v63 = vld [vmem:[%s5950_s18 + $0x6f8] sm:$0xff]  }
 0x1d5   : > { %v5169_v33 = vpop.eup %5168  ;;  %5180 = vtanh.f32 %v3730_v20  ;;  %v2333_v25 = vpop.f32.mrf.mxu2 }
 0x1d6   : > { %v5171_v41 = vpop.eup %5170  ;;  %2574 = vmatpush.bf16.msrb.mxu1 %v2145_v34  ;;  %v2153_v42 = vpack.c.bf16 %v5169_v33, %v5167_v32  ;;  %5182 = vtanh.f32 %v3761_v23  ;;  %v3946_v33 = vunpack.c.h.bf16 %v4297_v63 }
 0x1d7   : > { %v5173_v46 = vpop.eup %5172  ;;  %5184 = vtanh.f32 %v3762_v15  ;;  %v3914_v15 = vunpack.c.h.bf16 %v4289_v16 }
 0x1d8   : > { %v5175_v51 = vpop.eup %5174  ;;  %2587 = vmatpush.bf16.msrb.mxu2 %v2153_v42  ;;  %v2161_v52 = vpack.c.bf16 %v5173_v46, %v5171_v41  ;;  %5186 = vtanh.f32 %v3793_v36  ;;  %v3945_v36 = vunpack.c.l.bf16 %v4297_v63  ;;  %v3846_v46 = vunpack.c.h.bf16 %v4272_v30  ;;  %v4270_v63 = vld [vmem:[%s5950_s18 + $0x620] sm:$0xff]  }
 0x1d9   : > { %v5177_v54 = vpop.eup %5176  ;;  %5188 = vtanh.f32 %v3794_v37  ;;  %v2285_v37 = vpack.c.bf16 %v6264_v31, %v6264_v31  ;;  %v3877_v31 = vunpack.c.l.bf16 %v4280_v38 }
 0x1da   : > { %v5179_v58 = vpop.eup %5178  ;;  %2600 = vmatpush.bf16.msrb.mxu3 %v2161_v52  ;;  %v2136_v48 = vpack.c.bf16 %v5177_v54, %v5175_v51  ;;  %5190 = vtanh.f32 %v3693_v43  ;;  %v3845_v43 = vunpack.c.l.bf16 %v4272_v30  ;;  %v3878_v54 = vunpack.c.h.bf16 %v4280_v38 }
 0x1db   : > { %v5181_v44 = vpop.eup %5180  ;;  %5192 = vtanh.f32 %v3694_v47  ;;  %v4288_v47 = vld [vmem:[%s5950_s18 + $0x6b0] sm:$0xff]  }
 0x1dc   : > { %v5183_v35 = vpop.eup %5182  ;;  %2562 = vmatpush.bf16.msrb.mxu0 %v2136_v48  ;;  %v2144_v5 = vpack.c.bf16 %v5181_v44, %v5179_v58  ;;  %5194 = vtanh.f32 %v3725_v53  ;;  %v2287_v53 = vpack.c.bf16 %v6274_v50, %v6274_v50  ;;  %v3909_v39 = vunpack.c.l.bf16 %v4288_v47 }
 0x1dd   : > { %v5185_v7 = vpop.eup %5184  ;;  %5196 = vtanh.f32 %v3726_v55  ;;  %v4296_v55 = vld [vmem:[%s5950_s18 + $0x6f0] sm:$0xff]  }
 0x1de   : > { %v5187_v10 = vpop.eup %5186  ;;  %2575 = vmatpush.bf16.msrb.mxu1 %v2144_v5  ;;  %v2152_v11 = vpack.c.bf16 %v5185_v7, %v5183_v35  ;;  %5198 = vtanh.f32 %v3757_v60  ;;  %v3910_v60 = vunpack.c.h.bf16 %v4288_v47  ;;  %v3942_v1 = vunpack.c.h.bf16 %v4296_v55  ;;  %v4287_v7 = vld [vmem:[%s5950_s18 + $0x6a8] sm:$0xff]   ;;  %v2383_v47 = vpop.f32.mrf.mxu2 }
 0x1df   : > { %v5189_v13 = vpop.eup %5188  ;;  %5200 = vtanh.f32 %v3758_v0  ;;  %v3941_v0 = vunpack.c.l.bf16 %v4296_v55  ;;  %v3841_v35 = vunpack.c.l.bf16 %v4271_v61 }
 0x1e0   : > { %v5191_v3 = vpop.eup %5190  ;;  %2588 = vmatpush.bf16.msrb.mxu2 %v2152_v11  ;;  %v2160_v17 = vpack.c.bf16 %v5189_v13, %v5187_v10  ;;  %5202 = vtanh.f32 %v3789_v6  ;;  %v3842_v6 = vunpack.c.h.bf16 %v4271_v61  ;;  %v3873_v10 = vunpack.c.l.bf16 %v4279_v2  ;;  %v4295_v13 = vld [vmem:[%s5950_s18 + $0x6e8] sm:$0xff]   ;;  %v4277_v61 = vld [vmem:[%s5950_s18 + $0x658] sm:$0xff]  }
 0x1e1   : > { %v5193_v20 = vpop.eup %5192  ;;  %5204 = vtanh.f32 %v3790_v56  ;;  %v3937_v25 = vunpack.c.l.bf16 %v4295_v13 }
 0x1e2   : > { %v5195_v22 = vpop.eup %5194  ;;  %2601 = vmatpush.bf16.msrb.mxu3 %v2160_v17  ;;  %v2135_v23 = vpack.c.bf16 %v5193_v20, %v5191_v3  ;;  %5206 = vtanh.f32 %v3849_v12  ;;  %v3874_v12 = vunpack.c.h.bf16 %v4279_v2  ;;  %v3905_v3 = vunpack.c.l.bf16 %v4287_v7  ;;  %v2357_v17 = vpop.f32.mrf.mxu0 }
 0x1e3   : > { %v5197_v27 = vpop.eup %5196  ;;  %5208 = vtanh.f32 %v3850_v14 }
 0x1e4   : > { %v5199_v32 = vpop.eup %5198  ;;  %2563 = vmatpush.bf16.msrb.mxu0 %v2135_v23  ;;  %v2143_v34 = vpack.c.bf16 %v5197_v27, %v5195_v22  ;;  %5210 = vtanh.f32 %v3881_v18  ;;  %v2370_v18 = vpop.f32.mrf.mxu1  ;;  %v2358_v22 = vadd.f32 %v2357_v17, %v6282_v9  ;;  %v3938_v27 = vunpack.c.h.bf16 %v4295_v13 }
 0x1e5   : > { %v5201_v29 = vpop.eup %5200  ;;  %5212 = vtanh.f32 %v3882_v21  ;;  %v3906_v21 = vunpack.c.h.bf16 %v4287_v7  ;;  %v3838_v9 = vunpack.c.h.bf16 %v4270_v63  ;;  %v3866_v7 = vunpack.c.h.bf16 %v4277_v61 }
 0x1e6   : > { %v5203_v41 = vpop.eup %5202  ;;  %2576 = vmatpush.bf16.msrb.mxu1 %v2143_v34  ;;  %v2151_v42 = vpack.c.bf16 %v5201_v29, %v5199_v32  ;;  %5214 = vtanh.f32 %v3913_v24  ;;  %v3837_v34 = vunpack.c.l.bf16 %v4270_v63  ;;  %v4286_v29 = vld [vmem:[%s5950_s18 + $0x6a0] sm:$0xff]  }
 0x1e7   : > { %v5205_v19 = vpop.eup %5204  ;;  %5216 = vtanh.f32 %v3914_v15  ;;  %2564 = vmatmul.bf16.vlgmr.msrb.gmra.mxu0 %v2284_v28  ;;  %v4278_v15 = vld [vmem:[%s5950_s18 + $0x660] sm:$0xff]   ;;  %v2371_v28 = vadd.f32 %v2370_v18, %v2358_v22  ;;  %v4276_v22 = vld [vmem:[%s5950_s18 + $0x650] sm:$0xff]  }
 0x1e8   : > { %v5207_v49 = vpop.eup %5206  ;;  %2589 = vmatpush.bf16.msrb.mxu2 %v2151_v42  ;;  %v2159_v51 = vpack.c.bf16 %v5205_v19, %v5203_v41  ;;  %5218 = vtanh.f32 %v3945_v36  ;;  %v3869_v38 = vunpack.c.l.bf16 %v4278_v15  ;;  %v3870_v42 = vunpack.c.h.bf16 %v4278_v15  ;;  %v4284_v15 = vld [vmem:[%s5950_s18 + $0x690] sm:$0xff]  }
 0x1e9   : > { %v5209_v52 = vpop.eup %5208  ;;  %5220 = vtanh.f32 %v3946_v33  ;;  %2577 = vmatmul.bf16.vlgmr.msrb.gmra.mxu1 %v2285_v37 }
 0x1ea   : > { %v5211_v57 = vpop.eup %5210  ;;  %2602 = vmatpush.bf16.msrb.mxu3 %v2159_v51  ;;  %v2174_v58 = vpack.c.bf16 %v5209_v52, %v5207_v49  ;;  %5222 = vtanh.f32 %v3845_v43  ;;  %v4294_v43 = vld [vmem:[%s5950_s18 + $0x6e0] sm:$0xff]   ;;  %v2396_v49 = vpop.f32.mrf.mxu3  ;;  %v4269_v52 = vld [vmem:[%s5950_s18 + $0x618] sm:$0xff]  }
 0x1eb   : > { %v5213_v48 = vpop.eup %5212  ;;  %2590 = vmatmul.bf16.vlgmr.msrb.gmra.mxu2 %v2286_v45  ;;  %5224 = vtanh.f32 %v3846_v46  ;;  %v3901_v46 = vunpack.c.l.bf16 %v4286_v29  ;;  %v3834_v2 = vunpack.c.h.bf16 %v4269_v52 }
 0x1ec   : > { %v5215_v62 = vpop.eup %5214  ;;  %2608 = vmatpush.bf16.msra.mxu0 %v2174_v58  ;;  %v2182_v44 = vpack.c.bf16 %v5213_v48, %v5211_v57  ;;  %5226 = vtanh.f32 %v3877_v31  ;;  %v3902_v31 = vunpack.c.h.bf16 %v4286_v29  ;;  %v2372_v55 = vpop.f32.mrf.mxu1 }
 0x1ed   : > { %v5217_v50 = vpop.eup %5216  ;;  %2603 = vmatmul.bf16.vlgmr.msrb.gmra.mxu3 %v2287_v53  ;;  %5228 = vtanh.f32 %v3878_v54  ;;  %v2384_v53 = vadd.f32 %v2383_v47, %v2371_v28  ;;  %v2359_v54 = vpop.f32.mrf.mxu0  ;;  %v4283_v55 = vld [vmem:[%s5950_s18 + $0x688] sm:$0xff]  }
 0x1ee   : > { %v5219_v4 = vpop.eup %5218  ;;  %2621 = vmatpush.bf16.msra.mxu1 %v2182_v44  ;;  %v2190_v59 = vpack.c.bf16 %v5217_v50, %v5215_v62  ;;  %5230 = vtanh.f32 %v3909_v39  ;;  %v3933_v39 = vunpack.c.l.bf16 %v4294_v43  ;;  %v3833_v50 = vunpack.c.l.bf16 %v4269_v52 }
 0x1ef   : > { %v5221_v5 = vpop.eup %5220  ;;  %5232 = vtanh.f32 %v3910_v60  ;;  %v3934_v60 = vunpack.c.h.bf16 %v4294_v43  ;;  %v6309_v62 = vadd.f32 %v2396_v49, %v2384_v53  ;;  %v4275_v49 = vld [vmem:[%s5950_s18 + $0x648] sm:$0xff]  }
 0x1f0   : > { %v5223_v56 = vpop.eup %5222  ;;  %2634 = vmatpush.bf16.msra.mxu2 %v2190_v59  ;;  %v2198_v8 = vpack.c.bf16 %v5221_v5, %v5219_v4  ;;  %5234 = vtanh.f32 %v3941_v0  ;;  %v4285_v4 = vld [vmem:[%s5950_s18 + $0x698] sm:$0xff]   ;;  %v3865_v5 = vunpack.c.l.bf16 %v4277_v61  ;;  %v4291_v61 = vld [vmem:[%s5950_s18 + $0x6c8] sm:$0xff]  }
 0x1f1   : > { %v5225_v11 = vpop.eup %5224  ;;  %5236 = vtanh.f32 %v3942_v1 }
 0x1f2   : > { %v5227_v14 = vpop.eup %5226  ;;  %2647 = vmatpush.bf16.msra.mxu3 %v2198_v8  ;;  %v2173_v16 = vpack.c.bf16 %v5225_v11, %v5223_v56  ;;  %5238 = vtanh.f32 %v3841_v35  ;;  %v4293_v56 = vld [vmem:[%s5950_s18 + $0x6d8] sm:$0xff]   ;;  %v3897_v11 = vunpack.c.l.bf16 %v4285_v4  ;;  %v2398_v13 = vpop.f32.mrf.mxu3 }
 0x1f3   : > { %v5229_v20 = vpop.eup %5228  ;;  %5240 = vtanh.f32 %v3842_v6  ;;  %v3930_v63 = vunpack.c.h.bf16 %v4293_v56 }
 0x1f4   : > { %v5231_v23 = vpop.eup %5230  ;;  %2609 = vmatpush.bf16.msra.mxu0 %v2173_v16  ;;  %v2181_v24 = vpack.c.bf16 %v5229_v20, %v5227_v14  ;;  %5242 = vtanh.f32 %v3873_v10  ;;  %v3898_v16 = vunpack.c.h.bf16 %v4285_v4  ;;  %v3929_v20 = vunpack.c.l.bf16 %v4293_v56  ;;  %v4266_v4 = vld [vmem:[%s5950_s18 + $0x600] sm:$0xff]  }
 0x1f5   : > { %v5233_v26 = vpop.eup %5232  ;;  %5244 = vtanh.f32 %v3874_v12  ;;  %v2385_v12 = vpop.f32.mrf.mxu2  ;;  %v4274_v56 = vld [vmem:[%s5950_s18 + $0x640] sm:$0xff]   ;;  %v3822_v13 = vunpack.c.h.bf16 %v4266_v4 }
 0x1f6   : > { %v5235_v30 = vpop.eup %5234  ;;  %2622 = vmatpush.bf16.msra.mxu1 %v2181_v24  ;;  %v2189_v32 = vpack.c.bf16 %v5233_v26, %v5231_v23  ;;  %5246 = vtanh.f32 %v3905_v3  ;;  %v4268_v3 = vld [vmem:[%s5950_s18 + $0x610] sm:$0xff]  }
 0x1f7   : > { %v5237_v36 = vpop.eup %5236  ;;  %5248 = vtanh.f32 %v3906_v21 }
 0x1f8   : > { %v5239_v33 = vpop.eup %5238  ;;  %2635 = vmatpush.bf16.msra.mxu2 %v2189_v32  ;;  %v2197_v37 = vpack.c.bf16 %v5237_v36, %v5235_v30  ;;  %5250 = vtanh.f32 %v3937_v25  ;;  %v3829_v25 = vunpack.c.l.bf16 %v4268_v3  ;;  %v3861_v32 = vunpack.c.l.bf16 %v4276_v22 }
 0x1f9   : > { %v5241_v41 = vpop.eup %5240  ;;  %5252 = vtanh.f32 %v3938_v27  ;;  %v3830_v27 = vunpack.c.h.bf16 %v4268_v3  ;;  %v3862_v36 = vunpack.c.h.bf16 %v4276_v22 }
 0x1fa   : > { %v5243_v19 = vpop.eup %5242  ;;  %2648 = vmatpush.bf16.msra.mxu3 %v2197_v37  ;;  %v2172_v45 = vpack.c.bf16 %v5241_v41, %v5239_v33  ;;  %5254 = vtanh.f32 %v3837_v34  ;;  %v3893_v37 = vunpack.c.l.bf16 %v4284_v15  ;;  %v3894_v41 = vunpack.c.h.bf16 %v4284_v15 }
 0x1fb   : > { %v5245_v51 = vpop.eup %5244  ;;  %5256 = vtanh.f32 %v3838_v9  ;;  %v4292_v9 = vld [vmem:[%s5950_s18 + $0x6d0] sm:$0xff]  }
 0x1fc   : > { %v5247_v57 = vpop.eup %5246  ;;  %2610 = vmatpush.bf16.msra.mxu0 %v2172_v45  ;;  %v2180_v58 = vpack.c.bf16 %v5245_v51, %v5243_v19  ;;  %5258 = vtanh.f32 %v3869_v38  ;;  %v3925_v45 = vunpack.c.l.bf16 %v4292_v9  ;;  %v3926_v47 = vunpack.c.h.bf16 %v4292_v9 }
 0x1fd   : > { %v5249_v48 = vpop.eup %5248  ;;  %5260 = vtanh.f32 %v3870_v42  ;;  %v4267_v42 = vld [vmem:[%s5950_s18 + $0x608] sm:$0xff]  }
 0x1fe   : > { %v5251_v44 = vpop.eup %5250  ;;  %2623 = vmatpush.bf16.msra.mxu1 %v2180_v58  ;;  %v2188_v0 = vpack.c.bf16 %v5249_v48, %v5247_v57  ;;  %5262 = vtanh.f32 %v3901_v46  ;;  %v3825_v52 = vunpack.c.l.bf16 %v4267_v42  ;;  %v3826_v54 = vunpack.c.h.bf16 %v4267_v42 }
 0x1ff   : > { %v5253_v1 = vpop.eup %5252  ;;  %5264 = vtanh.f32 %v3902_v31 }
 0x200   : > { %v5255_v59 = vpop.eup %5254  ;;  %2636 = vmatpush.bf16.msra.mxu2 %v2188_v0  ;;  %v2196_v35 = vpack.c.bf16 %v5253_v1, %v5251_v44  ;;  %5266 = vtanh.f32 %v3933_v39  ;;  %v3857_v39 = vunpack.c.l.bf16 %v4275_v49 }
 0x201   : > { %v5257_v6 = vpop.eup %5256  ;;  %5268 = vtanh.f32 %v3934_v60  ;;  %v3858_v60 = vunpack.c.h.bf16 %v4275_v49 }
 0x202   : > { %v5259_v8 = vpop.eup %5258  ;;  %2649 = vmatpush.bf16.msra.mxu3 %v2196_v35  ;;  %v2171_v10 = vpack.c.bf16 %v5257_v6, %v5255_v59  ;;  %5270 = vtanh.f32 %v3833_v50  ;;  %v3889_v50 = vunpack.c.l.bf16 %v4283_v55 }
 0x203   : > { %v5261_v14 = vpop.eup %5260  ;;  %5272 = vtanh.f32 %v3834_v2  ;;  %v3890_v2 = vunpack.c.h.bf16 %v4283_v55 }
 0x204   : > { %v5263_v17 = vpop.eup %5262  ;;  %2611 = vmatpush.bf16.msra.mxu0 %v2171_v10  ;;  %v2179_v18 = vpack.c.bf16 %v5261_v14, %v5259_v8  ;;  %5274 = vtanh.f32 %v3865_v5  ;;  %v3921_v5 = vunpack.c.l.bf16 %v4291_v61  ;;  %v4282_v14 = vld [vmem:[%s5950_s18 + $0x680] sm:$0xff]  }
 0x205   : > { %v5265_v21 = vpop.eup %5264  ;;  %5276 = vtanh.f32 %v3866_v7  ;;  %v3922_v7 = vunpack.c.h.bf16 %v4291_v61 }
 0x206   : > { %v5267_v23 = vpop.eup %5266  ;;  %2624 = vmatpush.bf16.msra.mxu1 %v2179_v18  ;;  %v2187_v24 = vpack.c.bf16 %v5265_v21, %v5263_v17  ;;  %5278 = vtanh.f32 %v3897_v11  ;;  %v3821_v11 = vunpack.c.l.bf16 %v4266_v4  ;;  %v3853_v17 = vunpack.c.l.bf16 %v4274_v56  ;;  %v4290_v21 = vld [vmem:[%s5950_s18 + $0x6c0] sm:$0xff]  }
 0x207   : > { %v5269_v26 = vpop.eup %5268  ;;  %5280 = vtanh.f32 %v3898_v16 }
 0x208   : > { %v5271_v28 = vpop.eup %5270  ;;  %2637 = vmatpush.bf16.msra.mxu2 %v2187_v24  ;;  %v2195_v30 = vpack.c.bf16 %v5269_v26, %v5267_v23  ;;  %5282 = vtanh.f32 %v3929_v20  ;;  %v3854_v20 = vunpack.c.h.bf16 %v4274_v56  ;;  %v3885_v23 = vunpack.c.l.bf16 %v4282_v14  ;;  %v4305_v26 = vld [vmem:[%s5950_s18 + $0x738] sm:$0xff]   ;;  %v4320_v56 = vld [vmem:[%s5950_s18 + $0x7b0] sm:$0xff]  }
 0x209   : > { %v5273_v34 = vpop.eup %5272  ;;  %5284 = vtanh.f32 %v3930_v63 }
 0x20a   : > { %v5275_v29 = vpop.eup %5274  ;;  %2650 = vmatpush.bf16.msra.mxu3 %v2195_v30  ;;  %v2170_v33 = vpack.c.bf16 %v5273_v34, %v5271_v28  ;;  %5286 = vtanh.f32 %v3829_v25  ;;  %v3886_v25 = vunpack.c.h.bf16 %v4282_v14  ;;  %v3917_v28 = vunpack.c.l.bf16 %v4290_v21  ;;  %v4313_v34 = vld [vmem:[%s5950_s18 + $0x778] sm:$0xff]  }
 0x20b   : > { %v5277_v38 = vpop.eup %5276  ;;  %5288 = vtanh.f32 %v3830_v27 }
 0x20c   : > { %v5279_v43 = vpop.eup %5278  ;;  %2612 = vmatpush.bf16.msra.mxu0 %v2170_v33  ;;  %v2178_v19 = vpack.c.bf16 %v5277_v38, %v5275_v29  ;;  %5290 = vtanh.f32 %v3861_v32  ;;  %v3918_v32 = vunpack.c.h.bf16 %v4290_v21  ;;  %v3977_v29 = vunpack.c.l.bf16 %v4305_v26  ;;  %v4321_v38 = vld [vmem:[%s5950_s18 + $0x7b8] sm:$0xff]  }
 0x20d   : > { %v5281_v46 = vpop.eup %5280  ;;  %5292 = vtanh.f32 %v3862_v36  ;;  %v4042_v55 = vunpack.c.h.bf16 %v4321_v38 }
 0x20e   : > { %v5283_v51 = vpop.eup %5282  ;;  %2625 = vmatpush.bf16.msra.mxu1 %v2178_v19  ;;  %v2186_v31 = vpack.c.bf16 %v5281_v46, %v5279_v43  ;;  %5294 = vtanh.f32 %v3893_v37  ;;  %v3978_v37 = vunpack.c.h.bf16 %v4305_v26  ;;  %v4009_v43 = vunpack.c.l.bf16 %v4313_v34  ;;  %v6329_v19 = vld [vmem:[%s5943_s19 + $0xc0] sm:$0xff] }
 0x20f   : > { %v5285_v53 = vpop.eup %5284  ;;  %5296 = vtanh.f32 %v3894_v41  ;;  %v4010_v46 = vunpack.c.h.bf16 %v4313_v34 }
 0x210   : > { %v5287_v57 = vpop.eup %5286  ;;  %2638 = vmatpush.bf16.msra.mxu2 %v2186_v31  ;;  %v2194_v58 = vpack.c.bf16 %v5285_v53, %v5283_v51  ;;  %5298 = vtanh.f32 %v3925_v45  ;;  %v4041_v31 = vunpack.c.l.bf16 %v4321_v38  ;;  %v2409_v53 = vpop.f32.mrf.mxu0 }
 0x211   : > { %v5289_v48 = vpop.eup %5288  ;;  %5300 = vtanh.f32 %v3926_v47  ;;  %v4329_v47 = vld [vmem:[%s5950_s18 + $0x7f8] sm:$0xff]  }
 0x212   : > { %v5291_v44 = vpop.eup %5290  ;;  %2651 = vmatpush.bf16.msra.mxu3 %v2194_v58  ;;  %v2169_v0 = vpack.c.bf16 %v5289_v48, %v5287_v57  ;;  %5302 = vtanh.f32 %v3825_v52  ;;  %v6333_v52 = vld [vmem:[%s5943_s19 + $0xc8] sm:$0xff]  ;;  %v2288_v57 = vpack.c.bf16 %v6329_v19, %v6329_v19  ;;  %v4304_v58 = vld [vmem:[%s5950_s18 + $0x730] sm:$0xff]   ;;  %v4073_v61 = vunpack.c.l.bf16 %v4329_v47 }
 0x213   : > { %v5293_v1 = vpop.eup %5292  ;;  %5304 = vtanh.f32 %v3826_v54 }
 0x214   : > { %v5295_v59 = vpop.eup %5294  ;;  %2613 = vmatpush.bf16.msra.mxu0 %v2169_v0  ;;  %v2177_v35 = vpack.c.bf16 %v5293_v1, %v5291_v44  ;;  %5306 = vtanh.f32 %v3857_v39  ;;  %v2410_v39 = vadd.f32 %v2409_v53, %v6309_v62  ;;  %v6340_v44 = vld [vmem:[%s5943_s19 + $0xd0] sm:$0xff]  ;;  %v2289_v1 = vpack.c.bf16 %v6333_v52, %v6333_v52  ;;  %v6346_v62 = vld [vmem:[%s5943_s19 + $0xd8] sm:$0xff] }
 0x215   : > { %v5297_v6 = vpop.eup %5296  ;;  %5308 = vtanh.f32 %v3858_v60 }
 0x216   : > { %v5299_v8 = vpop.eup %5298  ;;  %2626 = vmatpush.bf16.msra.mxu1 %v2177_v35  ;;  %v2185_v10 = vpack.c.bf16 %v5297_v6, %v5295_v59  ;;  %5310 = vtanh.f32 %v3889_v50  ;;  %v4074_v50 = vunpack.c.h.bf16 %v4329_v47  ;;  %v3973_v35 = vunpack.c.l.bf16 %v4304_v58 }
 0x217   : > { %v5301_v12 = vpop.eup %5300  ;;  %5312 = vtanh.f32 %v3890_v2  ;;  %v4312_v2 = vld [vmem:[%s5950_s18 + $0x770] sm:$0xff]   ;;  %v2290_v6 = vpack.c.bf16 %v6340_v44, %v6340_v44 }
 0x218   : > { %v5303_v16 = vpop.eup %5302  ;;  %2639 = vmatpush.bf16.msra.mxu2 %v2185_v10  ;;  %v2193_v3 = vpack.c.bf16 %v5301_v12, %v5299_v8  ;;  %5314 = vtanh.f32 %v3921_v5  ;;  %v4006_v14 = vunpack.c.h.bf16 %v4312_v2  ;;  %v2411_v21 = vpop.f32.mrf.mxu0 }
 0x219   : > { %v5305_v18 = vpop.eup %5304  ;;  %5316 = vtanh.f32 %v3922_v7  ;;  %v3974_v7 = vunpack.c.h.bf16 %v4304_v58  ;;  %v4301_v21 = vld [vmem:[%s5950_s18 + $0x718] sm:$0xff]  }
 0x21a   : > { %v5307_v63 = vpop.eup %5306  ;;  %2652 = vmatpush.bf16.msra.mxu3 %v2193_v3  ;;  %v2168_v22 = vpack.c.bf16 %v5305_v18, %v5303_v16  ;;  %5318 = vtanh.f32 %v3821_v11  ;;  %v4005_v11 = vunpack.c.l.bf16 %v4312_v2  ;;  %v4328_v16 = vld [vmem:[%s5950_s18 + $0x7f0] sm:$0xff]   ;;  %v4037_v18 = vunpack.c.l.bf16 %v4320_v56 }
 0x21b   : > { %v5309_v24 = vpop.eup %5308  ;;  %5320 = vtanh.f32 %v3822_v13  ;;  %v2291_v13 = vpack.c.bf16 %v6346_v62, %v6346_v62 }
 0x21c   : > { %v5311_v27 = vpop.eup %5310  ;;  %2614 = vmatpush.bf16.msra.mxu0 %v2168_v22  ;;  %v2176_v15 = vpack.c.bf16 %v5309_v24, %v5307_v63  ;;  %5322 = vtanh.f32 %v3853_v17  ;;  %v4038_v22 = vunpack.c.h.bf16 %v4320_v56 }
 0x21d   : > { %v5313_v30 = vpop.eup %5312  ;;  %5324 = vtanh.f32 %v3854_v20  ;;  %v2422_v20 = vpop.f32.mrf.mxu1 }
 0x21e   : > { %v5315_v36 = vpop.eup %5314  ;;  %2627 = vmatpush.bf16.msra.mxu1 %v2176_v15  ;;  %v2184_v9 = vpack.c.bf16 %v5313_v30, %v5311_v27  ;;  %5326 = vtanh.f32 %v3885_v23  ;;  %v4303_v23 = vld [vmem:[%s5950_s18 + $0x728] sm:$0xff]   ;;  %v2423_v24 = vadd.f32 %v2422_v20, %v2410_v39  ;;  %v4069_v27 = vunpack.c.l.bf16 %v4328_v16 }
 0x21f   : > { %v5317_v33 = vpop.eup %5316  ;;  %5328 = vtanh.f32 %v3886_v25  ;;  %v4311_v30 = vld [vmem:[%s5950_s18 + $0x768] sm:$0xff]  }
 0x220   : > { %v5319_v41 = vpop.eup %5318  ;;  %2640 = vmatpush.bf16.msra.mxu2 %v2184_v9  ;;  %v2192_v42 = vpack.c.bf16 %v5317_v33, %v5315_v36  ;;  %5330 = vtanh.f32 %v3917_v28  ;;  %v4070_v28 = vunpack.c.h.bf16 %v4328_v16  ;;  %v3969_v36 = vunpack.c.l.bf16 %v4303_v23  ;;  %v4319_v33 = vld [vmem:[%s5950_s18 + $0x7a8] sm:$0xff]  }
 0x221   : > { %v5321_v45 = vpop.eup %5320  ;;  %5332 = vtanh.f32 %v3918_v32 }
 0x222   : > { %v5323_v49 = vpop.eup %5322  ;;  %2653 = vmatpush.bf16.msra.mxu3 %v2192_v42  ;;  %v2167_v51 = vpack.c.bf16 %v5321_v45, %v5319_v41  ;;  %5334 = vtanh.f32 %v3977_v29  ;;  %v3970_v29 = vunpack.c.h.bf16 %v4303_v23  ;;  %v4001_v41 = vunpack.c.l.bf16 %v4311_v30  ;;  %v4327_v45 = vld [vmem:[%s5950_s18 + $0x7e8] sm:$0xff]  }
 0x223   : > { %v5325_v54 = vpop.eup %5324  ;;  %5336 = vtanh.f32 %v3978_v37 }
 0x224   : > { %v5327_v48 = vpop.eup %5326  ;;  %2615 = vmatpush.bf16.msra.mxu0 %v2167_v51  ;;  %v2175_v60 = vpack.c.bf16 %v5325_v54, %v5323_v49  ;;  %5338 = vtanh.f32 %v4009_v43  ;;  %v4002_v43 = vunpack.c.h.bf16 %v4311_v30  ;;  %v4033_v49 = vunpack.c.l.bf16 %v4319_v33  ;;  %v2435_v51 = vpop.f32.mrf.mxu2 }
 0x225   : > { %v5329_v0 = vpop.eup %5328  ;;  %5340 = vtanh.f32 %v4010_v46  ;;  %v4034_v54 = vunpack.c.h.bf16 %v4319_v33  ;;  %v2424_v58 = vpop.f32.mrf.mxu1 }
 0x226   : > { %v5331_v4 = vpop.eup %5330  ;;  %2628 = vmatpush.bf16.msra.mxu1 %v2175_v60  ;;  %v2183_v59 = vpack.c.bf16 %v5329_v0, %v5327_v48  ;;  %5342 = vtanh.f32 %v4041_v31  ;;  %v2448_v31 = vpop.f32.mrf.mxu3  ;;  %v4065_v60 = vunpack.c.l.bf16 %v4327_v45  ;;  %v4066_v0 = vunpack.c.h.bf16 %v4327_v45 }
 0x227   : > { %v5333_v5 = vpop.eup %5332  ;;  %5344 = vtanh.f32 %v4042_v55  ;;  %2616 = vmatmul.bf16.vlgmr.msra.gmra.mxu0 %v2288_v57  ;;  %v4302_v55 = vld [vmem:[%s5950_s18 + $0x720] sm:$0xff]   ;;  %v2436_v57 = vadd.f32 %v2435_v51, %v2423_v24 }
 0x228   : > { %v5335_v8 = vpop.eup %5334  ;;  %2641 = vmatpush.bf16.msra.mxu2 %v2183_v59  ;;  %v2191_v10 = vpack.c.bf16 %v5333_v5, %v5331_v4  ;;  %5346 = vtanh.f32 %v4073_v61  ;;  %v3965_v59 = vunpack.c.l.bf16 %v4302_v55  ;;  %v3966_v5 = vunpack.c.h.bf16 %v4302_v55 }
 0x229   : > { %v5337_v12 = vpop.eup %5336  ;;  %5348 = vtanh.f32 %v4074_v50  ;;  %2629 = vmatmul.bf16.vlgmr.msra.gmra.mxu1 %v2289_v1  ;;  %v4310_v50 = vld [vmem:[%s5950_s18 + $0x760] sm:$0xff]   ;;  %v6360_v1 = vadd.f32 %v2448_v31, %v2436_v57  ;;  %v4308_v57 = vld [vmem:[%s5950_s18 + $0x750] sm:$0xff]  }
 0x22a   : > { %v5339_v3 = vpop.eup %5338  ;;  %2654 = vmatpush.bf16.msra.mxu3 %v2191_v10  ;;  %v2206_v17 = vpack.c.bf16 %v5337_v12, %v5335_v8  ;;  %5350 = vtanh.f32 %v3973_v35  ;;  %v3997_v8 = vunpack.c.l.bf16 %v4310_v50  ;;  %v4326_v12 = vld [vmem:[%s5950_s18 + $0x7e0] sm:$0xff]  }
 0x22b   : > { %v5341_v63 = vpop.eup %5340  ;;  %2642 = vmatmul.bf16.vlgmr.msra.gmra.mxu2 %v2290_v6  ;;  %5352 = vtanh.f32 %v3974_v7  ;;  %v4318_v6 = vld [vmem:[%s5950_s18 + $0x7a0] sm:$0xff]   ;;  %v4061_v23 = vunpack.c.l.bf16 %v4326_v12 }
 0x22c   : > { %v5343_v25 = vpop.eup %5342  ;;  %2660 = vmatpush.bf16.msrb.mxu0 %v2206_v17  ;;  %v2214_v26 = vpack.c.bf16 %v5341_v63, %v5339_v3  ;;  %5354 = vtanh.f32 %v4005_v11  ;;  %v3998_v11 = vunpack.c.h.bf16 %v4310_v50  ;;  %v4029_v16 = vunpack.c.l.bf16 %v4318_v6  ;;  %v2437_v3 = vpop.f32.mrf.mxu2 }
 0x22d   : > { %v5345_v15 = vpop.eup %5344  ;;  %2655 = vmatmul.bf16.vlgmr.msra.gmra.mxu3 %v2291_v13  ;;  %5356 = vtanh.f32 %v4006_v14  ;;  %v4030_v20 = vunpack.c.h.bf16 %v4318_v6  ;;  %v2461_v3 = vpop.f32.mrf.mxu0 }
 0x22e   : > { %v5347_v32 = vpop.eup %5346  ;;  %2673 = vmatpush.bf16.msrb.mxu1 %v2214_v26  ;;  %v2222_v34 = vpack.c.bf16 %v5345_v15, %v5343_v25  ;;  %5358 = vtanh.f32 %v4037_v18  ;;  %v2450_v17 = vpop.f32.mrf.mxu3  ;;  %v4062_v25 = vunpack.c.h.bf16 %v4326_v12  ;;  %v4309_v26 = vld [vmem:[%s5950_s18 + $0x758] sm:$0xff]  }
 0x22f   : > { %v5349_v9 = vpop.eup %5348  ;;  %5360 = vtanh.f32 %v4038_v22  ;;  %v2474_v17 = vpop.f32.mrf.mxu1 }
 0x230   : > { %v5351_v37 = vpop.eup %5350  ;;  %2686 = vmatpush.bf16.msrb.mxu2 %v2222_v34  ;;  %v2230_v38 = vpack.c.bf16 %v5349_v9, %v5347_v32  ;;  %5362 = vtanh.f32 %v4069_v27  ;;  %v3962_v32 = vunpack.c.h.bf16 %v4301_v21  ;;  %v4317_v34 = vld [vmem:[%s5950_s18 + $0x798] sm:$0xff]  }
 0x231   : > { %v5353_v42 = vpop.eup %5352  ;;  %5364 = vtanh.f32 %v4070_v28  ;;  %v3961_v28 = vunpack.c.l.bf16 %v4301_v21 }
 0x232   : > { %v5355_v46 = vpop.eup %5354  ;;  %2699 = vmatpush.bf16.msrb.mxu3 %v2230_v38  ;;  %v2205_v47 = vpack.c.bf16 %v5353_v42, %v5351_v37  ;;  %5366 = vtanh.f32 %v3969_v36  ;;  %v3994_v37 = vunpack.c.h.bf16 %v4309_v26  ;;  %v4325_v38 = vld [vmem:[%s5950_s18 + $0x7d8] sm:$0xff]  }
 0x233   : > { %v5357_v53 = vpop.eup %5356  ;;  %5368 = vtanh.f32 %v3970_v29  ;;  %v3993_v29 = vunpack.c.l.bf16 %v4309_v26  ;;  %v4057_v31 = vunpack.c.l.bf16 %v4325_v38  ;;  %v4058_v55 = vunpack.c.h.bf16 %v4325_v38  ;;  %v6387_v38 = vld [vmem:[%s5943_s19 + $0xe8] sm:$0xff] }
 0x234   : > { %v5359_v39 = vpop.eup %5358  ;;  %2661 = vmatpush.bf16.msrb.mxu0 %v2205_v47  ;;  %v2213_v48 = vpack.c.bf16 %v5357_v53, %v5355_v46  ;;  %5370 = vtanh.f32 %v4001_v41  ;;  %v4026_v46 = vunpack.c.h.bf16 %v4317_v34  ;;  %v4300_v47 = vld [vmem:[%s5950_s18 + $0x710] sm:$0xff]  }
 0x235   : > { %v5361_v61 = vpop.eup %5360  ;;  %5372 = vtanh.f32 %v4002_v43  ;;  %v4025_v43 = vunpack.c.l.bf16 %v4317_v34 }
 0x236   : > { %v5363_v2 = vpop.eup %5362  ;;  %2674 = vmatpush.bf16.msrb.mxu1 %v2213_v48  ;;  %v2221_v4 = vpack.c.bf16 %v5361_v61, %v5359_v39  ;;  %5374 = vtanh.f32 %v4033_v49  ;;  %v3957_v48 = vunpack.c.l.bf16 %v4300_v47  ;;  %v3958_v61 = vunpack.c.h.bf16 %v4300_v47 }
 0x237   : > { %v5365_v35 = vpop.eup %5364  ;;  %5376 = vtanh.f32 %v4034_v54  ;;  %v2738_v54 = vadd.f32 %v6277_v40, %v6329_v19 }
 0x238   : > { %v5367_v7 = vpop.eup %5366  ;;  %2687 = vmatpush.bf16.msrb.mxu2 %v2221_v4  ;;  %v2229_v56 = vpack.c.bf16 %v5365_v35, %v5363_v2  ;;  %5378 = vtanh.f32 %v4065_v60  ;;  %v3989_v4 = vunpack.c.l.bf16 %v4308_v57  ;;  %v4324_v35 = vld [vmem:[%s5950_s18 + $0x7d0] sm:$0xff]  }
 0x239   : > { %v5369_v10 = vpop.eup %5368  ;;  %5380 = vtanh.f32 %v4066_v0  ;;  %v4316_v0 = vld [vmem:[%s5950_s18 + $0x790] sm:$0xff]   ;;  %v2739_v19 = vadd.f32 %v2738_v54, %v6333_v52  ;;  %v4054_v52 = vunpack.c.h.bf16 %v4324_v35 }
 0x23a   : > { %v5371_v13 = vpop.eup %5370  ;;  %2700 = vmatpush.bf16.msrb.mxu3 %v2229_v56  ;;  %v2204_v14 = vpack.c.bf16 %v5369_v10, %v5367_v7  ;;  %5382 = vtanh.f32 %v3965_v59  ;;  %v3990_v59 = vunpack.c.h.bf16 %v4308_v57  ;;  %v4021_v7 = vunpack.c.l.bf16 %v4316_v0  ;;  %v4299_v10 = vld [vmem:[%s5950_s18 + $0x708] sm:$0xff]   ;;  %v4306_v57 = vld [vmem:[%s5950_s18 + $0x740] sm:$0xff]  }
 0x23b   : > { %v5373_v18 = vpop.eup %5372  ;;  %5384 = vtanh.f32 %v3966_v5  ;;  %v3954_v26 = vunpack.c.h.bf16 %v4299_v10 }
 0x23c   : > { %v5375_v63 = vpop.eup %5374  ;;  %2662 = vmatpush.bf16.msrb.mxu0 %v2204_v14  ;;  %v2212_v22 = vpack.c.bf16 %v5373_v18, %v5371_v13  ;;  %5386 = vtanh.f32 %v3997_v8  ;;  %v4022_v8 = vunpack.c.h.bf16 %v4316_v0  ;;  %v4053_v13 = vunpack.c.l.bf16 %v4324_v35 }
 0x23d   : > { %v5377_v24 = vpop.eup %5376  ;;  %5388 = vtanh.f32 %v3998_v11  ;;  %v2740_v18 = vadd.f32 %v2739_v19, %v6340_v44 }
 0x23e   : > { %v5379_v27 = vpop.eup %5378  ;;  %2675 = vmatpush.bf16.msrb.mxu1 %v2212_v22  ;;  %v2220_v15 = vpack.c.bf16 %v5377_v24, %v5375_v63  ;;  %5390 = vtanh.f32 %v4029_v16  ;;  %v4307_v16 = vld [vmem:[%s5950_s18 + $0x748] sm:$0xff]   ;;  %v3953_v63 = vunpack.c.l.bf16 %v4299_v10  ;;  %v2462_v22 = vadd.f32 %v2461_v3, %v6360_v1  ;;  %v2500_v24 = vpop.f32.mrf.mxu3  ;;  %v4322_v10 = vld [vmem:[%s5950_s18 + $0x7c0] sm:$0xff]  }
 0x23f   : > { %v5381_v30 = vpop.eup %5380  ;;  %5392 = vtanh.f32 %v4030_v20 }
 0x240   : > { %v5383_v36 = vpop.eup %5382  ;;  %2688 = vmatpush.bf16.msrb.mxu2 %v2220_v15  ;;  %v2228_v9 = vpack.c.bf16 %v5381_v30, %v5379_v27  ;;  %5394 = vtanh.f32 %v4061_v23  ;;  %v2487_v23 = vpop.f32.mrf.mxu2  ;;  %v4315_v27 = vld [vmem:[%s5950_s18 + $0x788] sm:$0xff]   ;;  %v2741_v15 = vadd.f32 %v2740_v18, %v6346_v62  ;;  %v3985_v30 = vunpack.c.l.bf16 %v4307_v16 }
 0x241   : > { %v5385_v33 = vpop.eup %5384  ;;  %5396 = vtanh.f32 %v4062_v25  ;;  %v2475_v34 = vadd.f32 %v2474_v17, %v2462_v22  ;;  %v4045_v17 = vunpack.c.l.bf16 %v4322_v10 }
 0x242   : > { %v5387_v41 = vpop.eup %5386  ;;  %2701 = vmatpush.bf16.msrb.mxu3 %v2228_v9  ;;  %v2203_v42 = vpack.c.bf16 %v5385_v33, %v5383_v36  ;;  %5398 = vtanh.f32 %v3961_v28  ;;  %v3986_v36 = vunpack.c.h.bf16 %v4307_v16  ;;  %v4323_v9 = vld [vmem:[%s5950_s18 + $0x7c8] sm:$0xff]  }
 0x243   : > { %v5389_v45 = vpop.eup %5388  ;;  %5400 = vtanh.f32 %v3962_v32  ;;  %v6382_v32 = vld [vmem:[%s5943_s19 + $0xe0] sm:$0xff] }
 0x244   : > { %v5391_v49 = vpop.eup %5390  ;;  %2663 = vmatpush.bf16.msrb.mxu0 %v2203_v42  ;;  %v2211_v51 = vpack.c.bf16 %v5389_v45, %v5387_v41  ;;  %5402 = vtanh.f32 %v3993_v29  ;;  %v2742_v29 = vadd.f32 %v2741_v15, %v6382_v32  ;;  %v2488_v41 = vadd.f32 %v2487_v23, %v2475_v34  ;;  %v4298_v45 = vld [vmem:[%s5950_s18 + $0x700] sm:$0xff]  }
 0x245   : > { %v5393_v53 = vpop.eup %5392  ;;  %5404 = vtanh.f32 %v3994_v37  ;;  %v4017_v37 = vunpack.c.l.bf16 %v4315_v27  ;;  %v3949_v0 = vunpack.c.l.bf16 %v4298_v45  ;;  %v3950_v19 = vunpack.c.h.bf16 %v4298_v45 }
 0x246   : > { %v5395_v58 = vpop.eup %5394  ;;  %2676 = vmatpush.bf16.msrb.mxu1 %v2211_v51  ;;  %v2219_v39 = vpack.c.bf16 %v5393_v53, %v5391_v49  ;;  %5406 = vtanh.f32 %v4025_v43  ;;  %v4018_v43 = vunpack.c.h.bf16 %v4315_v27  ;;  %v4049_v51 = vunpack.c.l.bf16 %v4323_v9 }
 0x247   : > { %v5397_v60 = vpop.eup %5396  ;;  %5408 = vtanh.f32 %v4026_v46  ;;  %v2743_v46 = vadd.f32 %v2742_v29, %v6387_v38  ;;  %v2501_v53 = vadd.f32 %v2500_v24, %v2488_v41  ;;  %v2292_v29 = vpack.c.bf16 %v6382_v32, %v6382_v32 }
 0x248   : > { %v5399_v50 = vpop.eup %5398  ;;  %2689 = vmatpush.bf16.msrb.mxu2 %v2219_v39  ;;  %v2227_v2 = vpack.c.bf16 %v5397_v60, %v5395_v58  ;;  %5410 = vtanh.f32 %v4057_v31  ;;  %v6392_v31 = vld [vmem:[%s5943_s19 + $0xf0] sm:$0xff]  ;;  %v2463_v39 = vpop.f32.mrf.mxu0 }
 0x249   : > { %v5401_v40 = vpop.eup %5400  ;;  %5412 = vtanh.f32 %v4058_v55  ;;  %v4050_v55 = vunpack.c.h.bf16 %v4323_v9  ;;  %v2744_v58 = vadd.f32 %v2743_v46, %v6392_v31  ;;  %v2294_v32 = vpack.c.bf16 %v6392_v31, %v6392_v31 }
 0x24a   : > { %v5403_v5 = vpop.eup %5402  ;;  %2702 = vmatpush.bf16.msrb.mxu3 %v2227_v2  ;;  %v2202_v6 = vpack.c.bf16 %v5401_v40, %v5399_v50  ;;  %5414 = vtanh.f32 %v3957_v48  ;;  %v2476_v48 = vpop.f32.mrf.mxu1  ;;  %v6397_v50 = vld [vmem:[%s5943_s19 + $0xf8] sm:$0xff] }
 0x24b   : > { %v5405_v56 = vpop.eup %5404  ;;  %5416 = vtanh.f32 %v3958_v61  ;;  %v2489_v2 = vpop.f32.mrf.mxu2  ;;  %v2745_v35 = vadd.f32 %v2744_v58, %v6397_v50 }
 0x24c   : > { %v5407_v11 = vpop.eup %5406  ;;  %2664 = vmatpush.bf16.msrb.mxu0 %v2202_v6  ;;  %v2210_v12 = vpack.c.bf16 %v5405_v56, %v5403_v5  ;;  %5418 = vtanh.f32 %v3989_v4  ;;  %v2502_v4 = vpop.f32.mrf.mxu3 }
 0x24d   : > { %v5409_v14 = vpop.eup %5408  ;;  %5420 = vtanh.f32 %v3990_v59  ;;  %v4314_v59 = vld [vmem:[%s5950_s18 + $0x780] sm:$0xff]   ;;  %2746 = vadd.xlane.f32.xlu0 %v2745_v35 }
 0x24e   : > { %v5411_v20 = vpop.eup %5410  ;;  %2677 = vmatpush.bf16.msrb.mxu1 %v2210_v12  ;;  %v2218_v21 = vpack.c.bf16 %v5409_v14, %v5407_v11  ;;  %5422 = vtanh.f32 %v4021_v7  ;;  %v3981_v7 = vunpack.c.l.bf16 %v4306_v57 }
 0x24f   : > { %v5413_v25 = vpop.eup %5412  ;;  %5424 = vtanh.f32 %v4022_v8  ;;  %v3982_v8 = vunpack.c.h.bf16 %v4306_v57 }
 0x250   : > { %v5415_v28 = vpop.eup %5414  ;;  %2690 = vmatpush.bf16.msrb.mxu2 %v2218_v21  ;;  %v2226_v44 = vpack.c.bf16 %v5413_v25, %v5411_v20  ;;  %5426 = vtanh.f32 %v4053_v13  ;;  %v4013_v13 = vunpack.c.l.bf16 %v4314_v59  ;;  %v4046_v20 = vunpack.c.h.bf16 %v4322_v10  ;;  %v2513_v21 = vpop.f32.mrf.mxu0 }
 0x251   : > { %v5417_v1 = vpop.eup %5416  ;;  %5428 = vtanh.f32 %v4054_v52  ;;  %v4014_v52 = vunpack.c.h.bf16 %v4314_v59  ;;  %v2514_v24 = vadd.f32 %v2513_v21, %v2501_v53 }
 0x252   : > { %v5419_v33 = vpop.eup %5418  ;;  %2703 = vmatpush.bf16.msrb.mxu3 %v2226_v44  ;;  %v2201_v62 = vpack.c.bf16 %v5417_v1, %v5415_v28  ;;  %5430 = vtanh.f32 %v3953_v63  ;;  %v2526_v63 = vpop.f32.mrf.mxu1 }
 0x253   : > { %v5421_v42 = vpop.eup %5420  ;;  %5432 = vtanh.f32 %v3954_v26  ;;  %v2539_v25 = vpop.f32.mrf.mxu2  ;;  %v2527_v44 = vadd.f32 %v2526_v63, %v2514_v24 }
 0x254   : > { %v5423_v47 = vpop.eup %5422  ;;  %2665 = vmatpush.bf16.msrb.mxu0 %v2201_v62  ;;  %v2209_v49 = vpack.c.bf16 %v5421_v42, %v5419_v33  ;;  %5434 = vtanh.f32 %v3985_v30  ;;  %v2552_v26 = vpop.f32.mrf.mxu3  ;;  %v2293_v42 = vpack.c.bf16 %v6387_v38, %v6387_v38 }
 0x255   : > { %v5425_v54 = vpop.eup %5424  ;;  %5436 = vtanh.f32 %v3986_v36  ;;  %v2540_v36 = vadd.f32 %v2539_v25, %v2527_v44 }
 0x256   : > { %v5427_v60 = vpop.eup %5426  ;;  %2678 = vmatpush.bf16.msrb.mxu1 %v2209_v49  ;;  %v2217_v61 = vpack.c.bf16 %v5425_v54, %v5423_v47  ;;  %5438 = vtanh.f32 %v4017_v37 }
 0x257   : > { %v5429_v40 = vpop.eup %5428  ;;  %5440 = vtanh.f32 %v4018_v43  ;;  %v2553_v37 = vadd.f32 %v2552_v26, %v2540_v36 }
 0x258   : > { %v5431_v5 = vpop.eup %5430  ;;  %2691 = vmatpush.bf16.msrb.mxu2 %v2217_v61  ;;  %v2225_v6 = vpack.c.bf16 %v5429_v40, %v5427_v60  ;;  %5442 = vtanh.f32 %v4049_v51  ;;  %v2515_v43 = vpop.f32.mrf.mxu0 }
 0x259   : > { %v5433_v56 = vpop.eup %5432  ;;  %5444 = vtanh.f32 %v4050_v55  ;;  %v2295_v55 = vpack.c.bf16 %v6397_v50, %v6397_v50 }
 0x25a   : > { %v5435_v11 = vpop.eup %5434  ;;  %2704 = vmatpush.bf16.msrb.mxu3 %v2225_v6  ;;  %v2200_v12 = vpack.c.bf16 %v5433_v56, %v5431_v5  ;;  %5446 = vtanh.f32 %v3949_v0  ;;  %v2528_v45 = vpop.f32.mrf.mxu1 }
 0x25b   : > { %v5437_v14 = vpop.eup %5436  ;;  %5448 = vtanh.f32 %v3950_v19  ;;  %v2541_v49 = vpop.f32.mrf.mxu2 }
 0x25c   : > { %v5439_v16 = vpop.eup %5438  ;;  %2666 = vmatpush.bf16.msrb.mxu0 %v2200_v12  ;;  %v2208_v3 = vpack.c.bf16 %v5437_v14, %v5435_v11  ;;  %5450 = vtanh.f32 %v3981_v7  ;;  %v2554_v51 = vpop.f32.mrf.mxu3 }
 0x25d   : > { %v5441_v18 = vpop.eup %5440  ;;  %5452 = vtanh.f32 %v3982_v8  ;;  %v2714_v8 = vld [vmem:[#allocation3] sm:$0xff] }
 0x25e   : > { %v5443_v22 = vpop.eup %5442  ;;  %2679 = vmatpush.bf16.msrb.mxu1 %v2208_v3  ;;  %v2216_v23 = vpack.c.bf16 %v5441_v18, %v5439_v16  ;;  %5454 = vtanh.f32 %v4013_v13 }
 0x25f   : > { %v5445_v27 = vpop.eup %5444  ;;  %5456 = vtanh.f32 %v4014_v52 }
 0x260   : > { %v5447_v15 = vpop.eup %5446  ;;  %2692 = vmatpush.bf16.msrb.mxu2 %v2216_v23  ;;  %v2224_v28 = vpack.c.bf16 %v5445_v27, %v5443_v22  ;;  %5458 = vtanh.f32 %v4045_v17  ;;  %v2263_v23 = vld [vmem:[#allocation2] sm:$0xff] }
 0x261   : > { %v5449_v30 = vpop.eup %5448  ;;  %5460 = vtanh.f32 %v4046_v20 }
 0x262   : > { %v5451_v34 = vpop.eup %5450  ;;  %2705 = vmatpush.bf16.msrb.mxu3 %v2224_v28  ;;  %v2199_v1 = vpack.c.bf16 %v5449_v30, %v5447_v15 }
 0x263   : > { %v5453_v9 = vpop.eup %5452 }
 0x264   : > { %v5455_v33 = vpop.eup %5454  ;;  %2667 = vmatpush.bf16.msrb.mxu0 %v2199_v1  ;;  %v2207_v62 = vpack.c.bf16 %v5453_v9, %v5451_v34  ;;  %v2565_v38 = vpop.f32.mrf.mxu0 }
 0x265   : > { %v5457_v41 = vpop.eup %5456  ;;  %v2566_v58 = vadd.f32 %v2565_v38, %v2553_v37 }
 0x266   : > { %v5459_v46 = vpop.eup %5458  ;;  %2680 = vmatpush.bf16.msrb.mxu1 %v2207_v62  ;;  %v2215_v47 = vpack.c.bf16 %v5457_v41, %v5455_v33  ;;  %v2578_v57 = vpop.f32.mrf.mxu1 }
 0x267   : > { %v5461_v53 = vpop.eup %5460  ;;  %2668 = vmatmul.bf16.vlgmr.msrb.gmra.mxu0 %v2292_v29  ;;  %v2579_v48 = vadd.f32 %v2578_v57, %v2566_v58 }
 0x268   : > { %2693 = vmatpush.bf16.msrb.mxu2 %v2215_v47  ;;  %v2223_v54 = vpack.c.bf16 %v5461_v53, %v5459_v46 }
 0x269   : > { %2681 = vmatmul.bf16.vlgmr.msrb.gmra.mxu1 %v2293_v42 }
 0x26a   : > { %2706 = vmatpush.bf16.msrb.mxu3 %v2223_v54 }
 0x26b   : > { %2694 = vmatmul.bf16.vlgmr.msrb.gmra.mxu2 %v2294_v32 }
 0x26c   : > { %v2567_v2 = vpop.f32.mrf.mxu0 }
 0x26d   : > { %2707 = vmatmul.bf16.vlgmr.msrb.gmra.mxu3 %v2295_v55 }
 0x26e   : > { %v2591_v39 = vpop.f32.mrf.mxu2  ;;  %v2580_v4 = vpop.f32.mrf.mxu1 }
 0x26f   : > { %v2592_v61 = vadd.f32 %v2591_v39, %v2579_v48 }
 0x270   : > { %v2604_v60 = vpop.f32.mrf.mxu3 }
 0x271   : > { %v2605_v0 = vadd.f32 %v2604_v60, %v2592_v61 }
 0x276   : > { %v2593_v31 = vpop.f32.mrf.mxu2 }
 0x278   : > { %v2606_v40 = vpop.f32.mrf.mxu3 }
 0x2a4   : > { %v2617_v19 = vpop.f32.mrf.mxu0 }
 0x2a5   : > { %v2618_v12 = vadd.f32 %v2617_v19, %v2605_v0 }
 0x2a6   : > { %v2630_v59 = vpop.f32.mrf.mxu1 }
 0x2a7   : > { %v2631_v13 = vadd.f32 %v2630_v59, %v2618_v12 }
 0x2ac   : > { %v2619_v35 = vpop.f32.mrf.mxu0 }
 0x2ae   : > { %v2643_v5 = vpop.f32.mrf.mxu2  ;;  %v2632_v50 = vpop.f32.mrf.mxu1 }
 0x2af   : > { %v2644_v14 = vadd.f32 %v2643_v5, %v2631_v13 }
 0x2b0   : > { %v2656_v6 = vpop.f32.mrf.mxu3 }
 0x2b1   : > { %v2657_v3 = vadd.f32 %v2656_v6, %v2644_v14 }
 0x2b6   : > { %v2645_v7 = vpop.f32.mrf.mxu2 }
 0x2b8   : > { %v2658_v56 = vpop.f32.mrf.mxu3 }
 0x2c0   : > { %v2747_v10 = vpop.xlane.xlu0 %2746 }
 0x2c1   : > { %v2748_v11 = vadd.f32 %v2747_v10, %v2714_v8 }
 0x2c3   : > { %2750 = vst.msk [vmem:[#allocation3] sm:$0xff] %vm2749_vm1, %v2748_v11 }
 0x2e4   : > { %v2669_v52 = vpop.f32.mrf.mxu0 }
 0x2e5   : > { %v2670_v17 = vadd.f32 %v2669_v52, %v2657_v3 }
 0x2e6   : > { %v2682_v16 = vpop.f32.mrf.mxu1 }
 0x2e7   : > { %v2683_v20 = vadd.f32 %v2682_v16, %v2670_v17 }
 0x2ec   : > { %v2671_v18 = vpop.f32.mrf.mxu0 }
 0x2ee   : > { %v2695_v21 = vpop.f32.mrf.mxu2  ;;  %v2684_v63 = vpop.f32.mrf.mxu1 }
 0x2ef   : > { %v2696_v22 = vadd.f32 %v2695_v21, %v2683_v20 }
 0x2f0   : > { %v2708_v24 = vpop.f32.mrf.mxu3 }
 0x2f1   : > { %v2709_v25 = vadd.f32 %v2708_v24, %v2696_v22 }
 0x2f3   : > { %v2712_v26 = vadd.f32 %v2709_v25, %v2263_v23 }
 0x2f4   : > { %2754 = sbr.rel (%p3044_p1) target bundleno = 1277 (0x4fd), region = 88 }
 0x2f5   : > { %2713 = vst [vmem:[#allocation2] sm:$0xff] %v2712_v26 }
 0x2f6   : > { %v2697_v27 = vpop.f32.mrf.mxu2 }
 0x2f8   : > { %v2710_v15 = vpop.f32.mrf.mxu3 }
 0x2f9   : > { %v2757_v28 = vld [vmem:[#allocation3] sm:$0xff]  ;;  %v2778_v30 = vld [vmem:[#allocation9 + $0x70] sm:$0xff]  ;;  %v5770_v34 = vmov 0   ;;  %v2777_v1 = vld [vmem:[#allocation9 + $0x68] sm:$0xff]  ;;  %vm2890_vm4 = vcmask 64512  }
 0x2fa   : > { %v2779_v44 = vld [vmem:[#allocation9 + $0x78] sm:$0xff]  ;;  %5462 = vset.pattern.permute.xlu0 %v5770_v34  ;;  %v2776_v36 = vld [vmem:[#allocation9 + $0x60] sm:$0xff]  ;;  %v2774_v29 = vld [vmem:[#allocation9 + $0x50] sm:$0xff] }
 0x2fb   : > { %2784 = vmatpush.msra.mxu0 %v2779_v44  ;;  %2760 = vperm.xlu0 %5462, %v2757_v28   ;;  %v2775_v9 = vld [vmem:[#allocation9 + $0x58] sm:$0xff]  ;;  %v2773_v33 = vld [vmem:[#allocation9 + $0x48] sm:$0xff]  ;;  %v2772_v62 = vld [vmem:[#allocation9 + $0x40] sm:$0xff] }
 0x2fc   : > { %v2771_v37 = vld [vmem:[#allocation9 + $0x38] sm:$0xff]  ;;  %v2770_v41 = vld [vmem:[#allocation9 + $0x30] sm:$0xff]  ;;  %v2769_v42 = vld [vmem:[#allocation9 + $0x28] sm:$0xff] }
 0x2fd   : > { %2785 = vmatpush.msra.mxu0 %v2778_v30  ;;  %v2768_v43 = vld [vmem:[#allocation9 + $0x20] sm:$0xff]  ;;  %v2767_v45 = vld [vmem:[#allocation9 + $0x18] sm:$0xff]  ;;  %v2766_v46 = vld [vmem:[#allocation9 + $0x10] sm:$0xff] }
 0x2fe   : > { %v2765_v47 = vld [vmem:[#allocation9 + $0x8] sm:$0xff]  ;;  %v2764_v49 = vld [vmem:[#allocation9] sm:$0xff]  ;;  %v2821_v53 = vld [vmem:[#allocation12 + $0x70] sm:$0xff] }
 0x2ff   : > { %2786 = vmatpush.msra.mxu0 %v2777_v1  ;;  %v2822_v51 = vld [vmem:[#allocation12 + $0x78] sm:$0xff]  ;;  %v2820_v32 = vld [vmem:[#allocation12 + $0x68] sm:$0xff]  ;;  %v2819_v54 = vld [vmem:[#allocation12 + $0x60] sm:$0xff] }
 0x300   : > { %2827 = vmatpush.msra.mxu1 %v2822_v51  ;;  %v2818_v55 = vld [vmem:[#allocation12 + $0x58] sm:$0xff]  ;;  %v2817_v38 = vld [vmem:[#allocation12 + $0x50] sm:$0xff]  ;;  %v2816_v57 = vld [vmem:[#allocation12 + $0x48] sm:$0xff] }
 0x301   : > { %2787 = vmatpush.msra.mxu0 %v2776_v36  ;;  %v2815_v58 = vld [vmem:[#allocation12 + $0x40] sm:$0xff]  ;;  %v2814_v39 = vld [vmem:[#allocation12 + $0x38] sm:$0xff]  ;;  %v2813_v48 = vld [vmem:[#allocation12 + $0x30] sm:$0xff] }
 0x302   : > { %2828 = vmatpush.msra.mxu1 %v2821_v53  ;;  %v2812_v60 = vld [vmem:[#allocation12 + $0x28] sm:$0xff]  ;;  %v2811_v61 = vld [vmem:[#allocation12 + $0x20] sm:$0xff]  ;;  %v2810_v0 = vld [vmem:[#allocation12 + $0x18] sm:$0xff] }
 0x303   : > { %2788 = vmatpush.msra.mxu0 %v2775_v9  ;;  %v2755_v2 = vld [vmem:[#allocation2] sm:$0xff]  ;;  %v2807_v35 = vld [vmem:[#allocation12] sm:$0xff]  ;;  %v2863_v6 = vld [vmem:[%s6482_s6 + $0x68] sm:$0xff] }
 0x304   : > { %2829 = vmatpush.msra.mxu1 %v2820_v32  ;;  %v2756_v4 = vmul.f32 0.9, %v2755_v2  ;;  %v2809_v19 = vld [vmem:[#allocation12 + $0x10] sm:$0xff]  ;;  %v2808_v59 = vld [vmem:[#allocation12 + $0x8] sm:$0xff]  ;;  %v2864_v50 = vld [vmem:[%s6482_s6 + $0x70] sm:$0xff] }
 0x305   : > { %2789 = vmatpush.msra.mxu0 %v2774_v29  ;;  %v2865_v5 = vld [vmem:[%s6482_s6 + $0x78] sm:$0xff]  ;;  %v2862_v7 = vld [vmem:[%s6482_s6 + $0x60] sm:$0xff]  ;;  %v2860_v8 = vld [vmem:[%s6482_s6 + $0x50] sm:$0xff] }
 0x306   : > { %2830 = vmatpush.msra.mxu1 %v2819_v54  ;;  %2870 = vmatpush.msra.mxu2 %v2865_v5  ;;  %v2861_v56 = vld [vmem:[%s6482_s6 + $0x58] sm:$0xff]  ;;  %v2859_v10 = vld [vmem:[%s6482_s6 + $0x48] sm:$0xff]  ;;  %v2858_v11 = vld [vmem:[%s6482_s6 + $0x40] sm:$0xff] }
 0x307   : > { %2790 = vmatpush.msra.mxu0 %v2773_v33  ;;  %v2857_v12 = vld [vmem:[%s6482_s6 + $0x38] sm:$0xff]  ;;  %v2856_v13 = vld [vmem:[%s6482_s6 + $0x30] sm:$0xff]  ;;  %v2855_v14 = vld [vmem:[%s6482_s6 + $0x28] sm:$0xff] }
 0x308   : > { %2831 = vmatpush.msra.mxu1 %v2818_v55  ;;  %2871 = vmatpush.msra.mxu2 %v2864_v50  ;;  %v2854_v52 = vld [vmem:[%s6482_s6 + $0x20] sm:$0xff]  ;;  %v2853_v16 = vld [vmem:[%s6482_s6 + $0x18] sm:$0xff]  ;;  %v5463_v3 = vld [vmem:[#allocation10] ss:$0 sm:$0xff] }
 0x309   : > { %2791 = vmatpush.msra.mxu0 %v2772_v62  ;;  %v2852_v63 = vld [vmem:[%s6482_s6 + $0x10] sm:$0xff]  ;;  %v2851_v22 = vld [vmem:[%s6482_s6 + $0x8] sm:$0xff]  ;;  %v2850_v23 = vld [vmem:[%s6482_s6] sm:$0xff] }
 0x30a   : > { %2832 = vmatpush.msra.mxu1 %v2817_v38  ;;  %2872 = vmatpush.msra.mxu2 %v2863_v6  ;;  %v5464_v24 = vld [vmem:[#allocation13] ss:$0 sm:$0xff]  ;;  %v5465_v28 = vld [vmem:[#allocation15] ss:$0 sm:$0xff] }
 0x30b   : > { %2792 = vmatpush.msra.mxu0 %v2771_v37 }
 0x30c   : > { %2833 = vmatpush.msra.mxu1 %v2816_v57  ;;  %2873 = vmatpush.msra.mxu2 %v2862_v7 }
 0x30d   : > { %2793 = vmatpush.msra.mxu0 %v2770_v41 }
 0x30e   : > { %2834 = vmatpush.msra.mxu1 %v2815_v58  ;;  %2874 = vmatpush.msra.mxu2 %v2861_v56 }
 0x30f   : > { %2794 = vmatpush.msra.mxu0 %v2769_v42 }
 0x310   : > { %2835 = vmatpush.msra.mxu1 %v2814_v39  ;;  %2875 = vmatpush.msra.mxu2 %v2860_v8 }
 0x311   : > { %2795 = vmatpush.msra.mxu0 %v2768_v43 }
 0x312   : > { %2836 = vmatpush.msra.mxu1 %v2813_v48  ;;  %2876 = vmatpush.msra.mxu2 %v2859_v10 }
 0x313   : > { %2796 = vmatpush.msra.mxu0 %v2767_v45 }
 0x314   : > { %2837 = vmatpush.msra.mxu1 %v2812_v60  ;;  %2877 = vmatpush.msra.mxu2 %v2858_v11 }
 0x315   : > { %2797 = vmatpush.msra.mxu0 %v2766_v46 }
 0x316   : > { %2838 = vmatpush.msra.mxu1 %v2811_v61  ;;  %2878 = vmatpush.msra.mxu2 %v2857_v12 }
 0x317   : > { %2798 = vmatpush.msra.mxu0 %v2765_v47 }
 0x318   : > { %2839 = vmatpush.msra.mxu1 %v2810_v0  ;;  %2879 = vmatpush.msra.mxu2 %v2856_v13 }
 0x319   : > { %2799 = vmatpush.msra.mxu0 %v2764_v49 }
 0x31a   : > { %2840 = vmatpush.msra.mxu1 %v2809_v19  ;;  %2880 = vmatpush.msra.mxu2 %v2855_v14 }
 0x31c   : > { %2841 = vmatpush.msra.mxu1 %v2808_v59  ;;  %2881 = vmatpush.msra.mxu2 %v2854_v52 }
 0x31e   : > { %2842 = vmatpush.msra.mxu1 %v2807_v35  ;;  %2882 = vmatpush.msra.mxu2 %v2853_v16 }
 0x320   : > { %2883 = vmatpush.msra.mxu2 %v2852_v63 }
 0x322   : > { %2884 = vmatpush.msra.mxu2 %v2851_v22 }
 0x324   : > { %2885 = vmatpush.msra.mxu2 %v2850_v23 }
 0x36d   : > { %v2761_v31 = vpop.permute.xlu0 %2760 }
 0x36e   : > { %v2763_v40 = vadd.f32 %v2761_v31, %v2756_v4 }
 0x370   : > { %2800 = vmatmul.f32.vlgmr.msra.gmra.mxu0 %v2763_v40 }
 0x3ed   : > { %v2801_v17 = vpop.f32.mrf.mxu0 }
 0x3ee   : > { %v2802_v18 = vadd.f32 %v5463_v3, %v2801_v17 }
 0x3f0   : > { %vm2804_vm2 = vcmp.ge.f32.partialorder %v2802_v18, 0.0  ;;  %v2805_v20 = vmul.f32 0.1, %v2802_v18 }
 0x3f2   : > { %v2806_v21 = vsel %vm2804_vm2, %v2802_v18, %v2805_v20 }
 0x3f3   : > { %2843 = vmatmul.f32.vlgmr.msra.gmra.mxu1 %v2806_v21 }
 0x470   : > { %v2844_v25 = vpop.f32.mrf.mxu1 }
 0x471   : > { %v2845_v26 = vadd.f32 %v5464_v24, %v2844_v25 }
 0x473   : > { %vm2847_vm3 = vcmp.ge.f32.partialorder %v2845_v26, 0.0  ;;  %v2848_v27 = vmul.f32 0.1, %v2845_v26 }
 0x475   : > { %v2849_v15 = vsel %vm2847_vm3, %v2845_v26, %v2848_v27 }
 0x476   : > { %2886 = vmatmul.f32.vlgmr.msra.gmra.mxu2 %v2849_v15 }
 0x4f9   : > { %v2887_v44 = vpop.f32.mrf.mxu2 }
 0x4fa   : > { %v2888_v30 = vadd.f32 %v5465_v28, %v2887_v44 }
 0x4fc   : > { %2891 = vst.msk [vmem:[#allocation16] sm:$0xff] %vm2890_vm4, %v2888_v30 }
 0x4fd PF: > { %p4392_p3 = scmp.eq.s32.totalorder %s5841_s12, 3  ;;  %s5771_s3 = smov [#allocation16]  }
 0x4fe   : > { %s2898_s4 = sshll.u32 %s5771_s3, 4  ;;  %s2900_s15 = sshll.u32 %s6484_s8, 4  ;;  %s2899_s4 = int_to_ptr.vmem [resolvable:$true] %s2898_s4  ;;  %s2901_s15 = int_to_ptr.hbm [resolvable:$true] %s2900_s15 }
 0x4ff   : > { %4355 = dma.vmem_to_hbm [thread:$0]  (%p4392_p3), %s2899_s4, 128, %s2901_s15, [#allocation6]  }
 0x500   : > { %5741 = dma.done.wait (%p4392_p3), [#allocation6], 128  }
 0x501   : > { %5743 = vsyncadd (%p4392_p3), [#allocation6], 4294967168 }
 0x502 PF: > { %p24_p4 = scmp.ge.s32.totalorder %s5882_s22, 6   ;;  %s6497_s27 = smov %s5750_s28 }
 0x503   : > { %s6498_s28 = smov %s5754_s29  ;;  %s6499_s29 = smov %s5893_s16 }
 0x504   : > { %s6500_s30 = smov %s5882_s22  ;;  %26 = sbr.rel (!%p24_p4) target bundleno = 13 (0xd), region = 130 }
 0x509   :  { %2914 = vsyncpa [#allocation5], 1 }
 0x50a   :  { %2916 = vsyncpa [#allocation5 + $0x1], 1 }
 0x50b   :  { %2917 = vsyncpa [#allocation8], 1 }
 0x50c   :  { %2919 = vsyncpa [#allocation8 + $0x1], 1 }
 0x50d   :  { %2920 = vsyncpa [#allocation11], 1 }
 0x50e   :  { %2921 = vsyncpa [#allocation14], 1 }
 0x50f   :  { %2922 = vsyncpa [#allocation6], 1 }
 0x510   :  { %2924 = vsyncpa [#allocation6 + $0x1], 1 }

</bundles_post_ra>
